<compile_context>
chip_gen: v5e
topology: v5e:2x2
jax: 0.10.0
libtpu: 0.0.40
codegen_flags: <defaults>
</compile_context>

<pallas_src>
import jax
import jax.numpy as jnp
from jax.experimental import pallas as pl
from jax.experimental.pallas import tpu as pltpu

C = 768            # channels of x4_1 (forced by Linear(1536,256) after avg|max concat)
SPATIAL = 4        # D = H = W = 4 so the (4,4,4)/stride-1 pools give one window
S = SPATIAL ** 3   # 64 spatial positions
FEAT = 2 * C       # 1536
HID1 = 256
HID2 = 64
OUT_LANES = 2 * HID2   # 128-lane-dense output slab: [feat(64) | hazard broadcast(64)]


def _surv_kernel(x_ref, w1a_ref, w1m_ref, b1_ref, w2_ref, b2_ref,
                 w3_ref, b3_ref, out_ref):
    # x_ref: (TB, C, S)  (bf16 or f32); pooling = reduce over the spatial lane axis.
    xf = x_ref[...].astype(jnp.float32)
    # AvgPool3d((4,4,4),1): the 1/64 scale is pre-folded into w1a -> plain sum here.
    pooled_sum = jnp.sum(xf, axis=-1)            # (TB, C) f32
    pooled_max = jnp.max(xf, axis=-1)            # (TB, C) f32 (exact)

    # TODO(synk): nn.Dropout(p=0.2) treated as identity (inference / eval mode).

    # Hidder_layer_1 on the "fused" [avg | max] vector, as two matmuls
    # (no (TB,1536) concat buffer):  fused @ W1 == sum @ (W1_avg/64) + max @ W1_max.
    h1 = (jnp.dot(pooled_sum, w1a_ref[...], preferred_element_type=jnp.float32)
          + jnp.dot(pooled_max, w1m_ref[...], preferred_element_type=jnp.float32)
          + b1_ref[...])
    h1 = jnp.maximum(h1, 0.0)                    # (TB, 256)

    # Hidder_layer_2 + ReLU
    h2 = jnp.dot(h1, w2_ref[...], preferred_element_type=jnp.float32) + b2_ref[...]
    h2 = jnp.maximum(h2, 0.0)                    # (TB, 64)

    # classifier (out_features=1): VPU row dot product instead of an N=1 MXU matmul.
    logit = jnp.sum(h2 * w3_ref[...], axis=-1, keepdims=True) + b3_ref[...]  # (TB, 1)
    hazard = jax.nn.sigmoid(logit)
    # NOTE: output_range / output_shift are unused in the PyTorch forward.

    # Lane-dense (TB, 128) output: feat in lanes [0,64), hazard broadcast into [64,128).
    out_ref[...] = jnp.concatenate(
        [h2, jnp.broadcast_to(hazard, h2.shape)], axis=-1)


def surv_network_pallas(x4_1, params, *, block_b=64, x_dtype=jnp.bfloat16):
    """x4_1: (B, C, D, H, W) (PyTorch NCDHW). Returns (x_feat (B,64), hazard (B,1))."""
    B, Cc, D, H, W = x4_1.shape
    assert Cc == C and D == H == W == SPATIAL

    # Pure reshape, no transpose pass: channels stay on the second-minor axis,
    # the 64 spatial positions sit on the lane axis; the pool reduces over lanes
    # in-kernel. bf16 halves the bytes of the only large stream (cast fuses with
    # the producer under jit; pass bf16 / x_dtype=None to skip it entirely).
    x = x4_1.reshape(B, C, S)
    if x_dtype is not None and x.dtype != x_dtype:
        x = x.astype(x_dtype)

    # Kernel-layout params (tiny; constant-folded / hoisted under jit).
    w1 = params["w1"].astype(jnp.float32)             # (1536, 256) stored (in, out)
    w1_avg = w1[:C] * (1.0 / S)                       # fold AvgPool 1/64 (exact, pow2)
    w1_max = w1[C:]
    b1 = params["b1"].reshape(1, HID1).astype(jnp.float32)
    w2 = params["w2"].astype(jnp.float32)             # (256, 64)
    b2 = params["b2"].reshape(1, HID2).astype(jnp.float32)
    w3 = params["w3"].reshape(1, HID2).astype(jnp.float32)   # (64,1) -> row
    b3 = params["b3"].reshape(1, 1).astype(jnp.float32)

    tb = min(block_b, B)
    grid = (pl.cdiv(B, tb),)
    const2 = lambda i: (0, 0)

    in_specs = [
        pl.BlockSpec((tb, C, S), lambda i: (i, 0, 0)),   # x tile, pipelined over B
        pl.BlockSpec((C, HID1), const2),                 # weights: DMA once, stay resident
        pl.BlockSpec((C, HID1), const2),
        pl.BlockSpec((1, HID1), const2),
        pl.BlockSpec((HID1, HID2), const2),
        pl.BlockSpec((1, HID2), const2),
        pl.BlockSpec((1, HID2), const2),
        pl.BlockSpec((1, 1), const2),
    ]
    out_specs = pl.BlockSpec((tb, OUT_LANES), lambda i: (i, 0))

    param_bytes = sum(int(a.size) * a.dtype.itemsize
                      for a in (w1_avg, w1_max, b1, w2, b2, w3, b3))
    cost = pl.CostEstimate(
        flops=int(B) * (2 * C * S + 4 * C * HID1 + 2 * HID1 * HID2 + 2 * HID2),
        transcendentals=int(B),
        bytes_accessed=int(x.size) * x.dtype.itemsize + param_bytes
                       + int(B) * OUT_LANES * 4,
    )

    slab = pl.pallas_call(
        _surv_kernel,
        out_shape=jax.ShapeDtypeStruct((B, OUT_LANES), jnp.float32),
        grid=grid,
        in_specs=in_specs,
        out_specs=out_specs,
        compiler_params=pltpu.CompilerParams(
            dimension_semantics=("parallel",),        # shard B tiles across TCs (v7x)
            vmem_limit_bytes=32 * 1024 * 1024,        # safe on v5e/v6e/v7x; TB<=64 fits
        ),
        cost_estimate=cost,
    )(x, w1_avg, w1_max, b1, w2, b2, w3, b3)

    feat = slab[:, :HID2]              # (B, 64)  == "x" returned by the module
    hazard = slab[:, HID2:HID2 + 1]    # (B, 1)
    return feat, hazard


def surv_network_reference(x4_1_f32, params):
    """Pure-JAX reference matching the PyTorch forward (eval mode)."""
    B = x4_1_f32.shape[0]
    flat = x4_1_f32.reshape(B, C, -1).astype(jnp.float32)
    avg = jnp.mean(flat, axis=-1)
    mx = jnp.max(flat, axis=-1)
    fused = jnp.concatenate([avg, mx], axis=-1)
    h1 = jnp.maximum(fused @ params["w1"] + params["b1"], 0.0)
    h2 = jnp.maximum(h1 @ params["w2"] + params["b2"], 0.0)
    haz = jax.nn.sigmoid(h2 @ params["w3"] + params["b3"])
    return h2, haz


def make_params(key):
    ks = jax.random.split(key, 6)
    # Weights stored as (in, out)  (== PyTorch W.T), biases 1-D.
    return {
        "w1": jax.random.normal(ks[0], (FEAT, HID1), jnp.float32) * 0.02,
        "b1": jax.random.normal(ks[1], (HID1,), jnp.float32) * 0.02,
        "w2": jax.random.normal(ks[2], (HID1, HID2), jnp.float32) * 0.02,
        "b2": jax.random.normal(ks[3], (HID2,), jnp.float32) * 0.02,
        "w3": jax.random.normal(ks[4], (HID2, 1), jnp.float32) * 0.02,
        "b3": jax.random.normal(ks[5], (1,), jnp.float32) * 0.02,
    }


if __name__ == "__main__":
    key = jax.random.PRNGKey(0)
    k_x, k_p = jax.random.split(key)
    B = 2
    x4_1 = jax.random.normal(k_x, (B, C, SPATIAL, SPATIAL, SPATIAL), jnp.float32)
    params = make_params(k_p)

    fwd = jax.jit(surv_network_pallas)
    feat, hazard = jax.block_until_ready(fwd(x4_1, params))

    # Reference consumes the same bf16-quantized activations the kernel reads,
    # so the comparison isolates kernel correctness (all downstream math f32).
    xq = x4_1.astype(jnp.bfloat16).astype(jnp.float32)
    feat_ref, hazard_ref = surv_network_reference(xq, params)

    assert feat.shape == (B, HID2) and hazard.shape == (B, 1)
    assert jnp.allclose(feat, feat_ref, atol=5e-4, rtol=5e-4), \
        float(jnp.max(jnp.abs(feat - feat_ref)))
    assert jnp.allclose(hazard, hazard_ref, atol=1e-4, rtol=1e-4), \
        float(jnp.max(jnp.abs(hazard - hazard_ref)))
    print("KERNEL_OK")
</pallas_src>

<mosaic_0001>
module attributes {stable_mosaic.version = 11 : i64} {
  func.func @_surv_kernel(%arg0: i32, %arg1: memref<2x768x64xbf16, #tpu.memory_space<vmem>>, %arg2: memref<768x256xf32, #tpu.memory_space<vmem>>, %arg3: memref<768x256xf32, #tpu.memory_space<vmem>>, %arg4: memref<1x256xf32, #tpu.memory_space<vmem>>, %arg5: memref<256x64xf32, #tpu.memory_space<vmem>>, %arg6: memref<1x64xf32, #tpu.memory_space<vmem>>, %arg7: memref<1x64xf32, #tpu.memory_space<vmem>>, %arg8: memref<1x1xf32, #tpu.memory_space<vmem>>, %arg9: memref<2x128xf32, #tpu.memory_space<vmem>>) attributes {dimension_semantics = [#tpu.dimension_semantics<parallel>], iteration_bounds = array<i64: 1>, scalar_prefetch = 0 : i64, scratch_operands = 0 : i64, tpu.core_type = #tpu.core_type<tc>, window_params = [{transform_indices = @transform_0, window_bounds = array<i64: 2, 768, 64>}, {pipeline_mode = #tpu.pipeline_mode<synchronous>, transform_indices = @transform_1, window_bounds = array<i64: 768, 256>}, {pipeline_mode = #tpu.pipeline_mode<synchronous>, transform_indices = @transform_2, window_bounds = array<i64: 768, 256>}, {pipeline_mode = #tpu.pipeline_mode<synchronous>, transform_indices = @transform_3, window_bounds = array<i64: 1, 256>}, {pipeline_mode = #tpu.pipeline_mode<synchronous>, transform_indices = @transform_4, window_bounds = array<i64: 256, 64>}, {pipeline_mode = #tpu.pipeline_mode<synchronous>, transform_indices = @transform_5, window_bounds = array<i64: 1, 64>}, {pipeline_mode = #tpu.pipeline_mode<synchronous>, transform_indices = @transform_6, window_bounds = array<i64: 1, 64>}, {pipeline_mode = #tpu.pipeline_mode<synchronous>, transform_indices = @transform_7, window_bounds = array<i64: 1, 1>}, {transform_indices = @transform_8, window_bounds = array<i64: 2, 128>}]} {
    %c0 = arith.constant 0 : index
    %c0_0 = arith.constant 0 : index
    %c0_1 = arith.constant 0 : index
    %0 = vector.load %arg1[%c0, %c0_0, %c0_1] : memref<2x768x64xbf16, #tpu.memory_space<vmem>>, vector<2x768x64xbf16>
    %1 = arith.extf %0 : vector<2x768x64xbf16> to vector<2x768x64xf32>
    %cst = arith.constant dense<0.000000e+00> : vector<2x768xf32>
    %2 = vector.multi_reduction <add>, %1, %cst [2] : vector<2x768x64xf32> to vector<2x768xf32>
    %cst_2 = arith.constant dense<0xFF800000> : vector<2x768xf32>
    %3 = vector.multi_reduction <maximumf>, %1, %cst_2 [2] : vector<2x768x64xf32> to vector<2x768xf32>
    %c0_3 = arith.constant 0 : index
    %c0_4 = arith.constant 0 : index
    %4 = vector.load %arg2[%c0_3, %c0_4] : memref<768x256xf32, #tpu.memory_space<vmem>>, vector<768x256xf32>
    %cst_5 = arith.constant dense<0.000000e+00> : vector<2x256xf32>
    %5 = tpu.matmul %2, %4, %cst_5 {dimension_numbers = #tpu.dot_dimension_numbers<[1], [0], [0], [1], [0, 0, 1, 1], [], []>} : vector<2x768xf32>, vector<768x256xf32>, vector<2x256xf32> -> vector<2x256xf32>
    %c0_6 = arith.constant 0 : index
    %c0_7 = arith.constant 0 : index
    %6 = vector.load %arg3[%c0_6, %c0_7] : memref<768x256xf32, #tpu.memory_space<vmem>>, vector<768x256xf32>
    %cst_8 = arith.constant dense<0.000000e+00> : vector<2x256xf32>
    %7 = tpu.matmul %3, %6, %cst_8 {dimension_numbers = #tpu.dot_dimension_numbers<[1], [0], [0], [1], [0, 0, 1, 1], [], []>} : vector<2x768xf32>, vector<768x256xf32>, vector<2x256xf32> -> vector<2x256xf32>
    %8 = arith.addf %5, %7 : vector<2x256xf32>
    %c0_9 = arith.constant 0 : index
    %c0_10 = arith.constant 0 : index
    %9 = vector.load %arg4[%c0_9, %c0_10] : memref<1x256xf32, #tpu.memory_space<vmem>>, vector<1x256xf32>
    %10 = vector.broadcast %9 : vector<1x256xf32> to vector<2x256xf32>
    %11 = arith.addf %8, %10 : vector<2x256xf32>
    %cst_11 = arith.constant 0.000000e+00 : f32
    %12 = vector.broadcast %cst_11 : f32 to vector<2x256xf32>
    %13 = arith.maximumf %11, %12 : vector<2x256xf32>
    %c0_12 = arith.constant 0 : index
    %c0_13 = arith.constant 0 : index
    %14 = vector.load %arg5[%c0_12, %c0_13] : memref<256x64xf32, #tpu.memory_space<vmem>>, vector<256x64xf32>
    %cst_14 = arith.constant dense<0.000000e+00> : vector<2x64xf32>
    %15 = tpu.matmul %13, %14, %cst_14 {dimension_numbers = #tpu.dot_dimension_numbers<[1], [0], [0], [1], [0, 0, 1, 1], [], []>} : vector<2x256xf32>, vector<256x64xf32>, vector<2x64xf32> -> vector<2x64xf32>
    %c0_15 = arith.constant 0 : index
    %c0_16 = arith.constant 0 : index
    %16 = vector.load %arg6[%c0_15, %c0_16] : memref<1x64xf32, #tpu.memory_space<vmem>>, vector<1x64xf32>
    %17 = vector.broadcast %16 : vector<1x64xf32> to vector<2x64xf32>
    %18 = arith.addf %15, %17 : vector<2x64xf32>
    %cst_17 = arith.constant 0.000000e+00 : f32
    %19 = vector.broadcast %cst_17 : f32 to vector<2x64xf32>
    %20 = arith.maximumf %18, %19 : vector<2x64xf32>
    %c0_18 = arith.constant 0 : index
    %c0_19 = arith.constant 0 : index
    %21 = vector.load %arg7[%c0_18, %c0_19] : memref<1x64xf32, #tpu.memory_space<vmem>>, vector<1x64xf32>
    %22 = vector.broadcast %21 : vector<1x64xf32> to vector<2x64xf32>
    %23 = arith.mulf %20, %22 : vector<2x64xf32>
    %cst_20 = arith.constant dense<0.000000e+00> : vector<2xf32>
    %24 = vector.multi_reduction <add>, %23, %cst_20 [1] : vector<2x64xf32> to vector<2xf32>
    %25 = vector.shape_cast %24 : vector<2xf32> to vector<2x1xf32>
    %c0_21 = arith.constant 0 : index
    %c0_22 = arith.constant 0 : index
    %26 = vector.load %arg8[%c0_21, %c0_22] : memref<1x1xf32, #tpu.memory_space<vmem>>, vector<1x1xf32>
    %27 = vector.broadcast %26 : vector<1x1xf32> to vector<2x1xf32>
    %28 = arith.addf %25, %27 : vector<2x1xf32>
    %29 = arith.negf %28 : vector<2x1xf32>
    %30 = math.exp %29 : vector<2x1xf32>
    %cst_23 = arith.constant 1.000000e+00 : f32
    %31 = vector.broadcast %cst_23 : f32 to vector<2x1xf32>
    %32 = arith.addf %31, %30 : vector<2x1xf32>
    %33 = arith.divf %31, %32 : vector<2x1xf32>
    %34 = vector.shape_cast %33 : vector<2x1xf32> to vector<2x1xf32>
    %35 = vector.broadcast %34 : vector<2x1xf32> to vector<2x64xf32>
    %36 = tpu.concatenate %20, %35 in 1 : vector<2x64xf32>, vector<2x64xf32> -> vector<2x128xf32>
    %c0_24 = arith.constant 0 : index
    %c0_25 = arith.constant 0 : index
    %37 = vector.load %arg9[%c0_24, %c0_25] : memref<2x128xf32, #tpu.memory_space<vmem>>, vector<2x128xf32>
    tpu.vector_store %arg9[%c0_24, %c0_25], %36 {strides = array<i32>} : memref<2x128xf32, #tpu.memory_space<vmem>>, vector<2x128xf32>,
    return
  }
  func.func @transform_0(%arg0: i32) -> (i32, i32, i32) {
    %c0_i32 = arith.constant 0 : i32
    %c0_i32_0 = arith.constant 0 : i32
    %c0_i32_1 = arith.constant 0 : i32
    return %arg0, %c0_i32, %c0_i32_0 : i32, i32, i32
  }
  func.func @transform_1(%arg0: i32) -> (i32, i32) {
    %c0_i32 = arith.constant 0 : i32
    %c0_i32_0 = arith.constant 0 : i32
    %c0_i32_1 = arith.constant 0 : i32
    return %c0_i32, %c0_i32_0 : i32, i32
  }
  func.func @transform_2(%arg0: i32) -> (i32, i32) {
    %c0_i32 = arith.constant 0 : i32
    %c0_i32_0 = arith.constant 0 : i32
    %c0_i32_1 = arith.constant 0 : i32
    return %c0_i32, %c0_i32_0 : i32, i32
  }
  func.func @transform_3(%arg0: i32) -> (i32, i32) {
    %c0_i32 = arith.constant 0 : i32
    %c0_i32_0 = arith.constant 0 : i32
    %c0_i32_1 = arith.constant 0 : i32
    return %c0_i32, %c0_i32_0 : i32, i32
  }
  func.func @transform_4(%arg0: i32) -> (i32, i32) {
    %c0_i32 = arith.constant 0 : i32
    %c0_i32_0 = arith.constant 0 : i32
    %c0_i32_1 = arith.constant 0 : i32
    return %c0_i32, %c0_i32_0 : i32, i32
  }
  func.func @transform_5(%arg0: i32) -> (i32, i32) {
    %c0_i32 = arith.constant 0 : i32
    %c0_i32_0 = arith.constant 0 : i32
    %c0_i32_1 = arith.constant 0 : i32
    return %c0_i32, %c0_i32_0 : i32, i32
  }
  func.func @transform_6(%arg0: i32) -> (i32, i32) {
    %c0_i32 = arith.constant 0 : i32
    %c0_i32_0 = arith.constant 0 : i32
    %c0_i32_1 = arith.constant 0 : i32
    return %c0_i32, %c0_i32_0 : i32, i32
  }
  func.func @transform_7(%arg0: i32) -> (i32, i32) {
    %c0_i32 = arith.constant 0 : i32
    %c0_i32_0 = arith.constant 0 : i32
    %c0_i32_1 = arith.constant 0 : i32
    return %c0_i32, %c0_i32_0 : i32, i32
  }
  func.func @transform_8(%arg0: i32) -> (i32, i32) {
    %c0_i32 = arith.constant 0 : i32
    %c0_i32_0 = arith.constant 0 : i32
    return %arg0, %c0_i32 : i32, i32
  }
}

</mosaic_0001>

<bundles_post_ra>
// kernel: surv_network_pallas.1
= control target key start
LH: loop header
LB: loop body
LE: loop exit
PB: predicated region body
PF: predicated region fallthrough
CT: control target
= control target key end

     0   :  { %vm9512_vm0 = vcmask 523264   ;;  %vm2149_vm1 = vcmask 130112   ;;  %vm2153_vm2 = vcmask 195712   ;;  %vm9511_vm3 = vcmask 261312   ;;  %s9211_s0 = inlined_call_operand.vmem [shape: bf16[2,768,64], index: 0, kind: input, shape index: {}]   ;;  %s9212_s2 = inlined_call_operand.vmem [shape: f32[768,256], index: 2, kind: input, shape index: {}]   ;;  %s9213_s1 = inlined_call_operand.vmem [shape: f32[768,256], index: 1, kind: input, shape index: {}]   ;;  %s9214_s5 = inlined_call_operand.vmem [shape: f32[1,64], index: 5, kind: input, shape index: {}]   ;;  %s9215_s4 = inlined_call_operand.vmem [shape: f32[256,64], index: 4, kind: input, shape index: {}]   ;;  %s9216_s3 = inlined_call_operand.vmem [shape: f32[1,256], index: 3, kind: input, shape index: {}]   ;;  %s9217_s6 = inlined_call_operand.vmem [shape: f32[1,64], index: 6, kind: input, shape index: {}]   ;;  %s9218_s7 = inlined_call_operand.<no memory space> [shape: f32[1,1], index: 7, kind: input, shape index: {}]   ;;  %s9219_s8 = inlined_call_operand.vmem [shape: f32[2,128], index: 8, kind: output, shape index: {}]  }
   0x1   :  { %v4287_v0 = vld [vmem:[%s9211_s0 + $0x10] sm:$0xff]   ;;  %v4292_v1 = vld [vmem:[%s9211_s0 + $0x8] sm:$0xff]   ;;  %v4297_v2 = vld [vmem:[%s9211_s0] sm:$0xff]   ;;  %vm2161_vm4 = vcmask 326912   ;;  %vm2165_vm5 = vcmask 392512   ;;  %vm2169_vm6 = vcmask 458112  }
   0x2   :  { %v9276_v3 = vunpack.c.l.bf16 %v4287_v0  ;;  %v9285_v4 = vunpack.c.l.bf16 %v4292_v1  ;;  %v9280_v5 = vunpack.c.l.bf16 %v4297_v2  ;;  %v9278_v9 = vunpack.c.h.bf16 %v4287_v0  ;;  %v4326_v15 = vld [vmem:[%s9211_s0 + $0x20] sm:$0xff]   ;;  %v4331_v16 = vld [vmem:[%s9211_s0 + $0x18] sm:$0xff]   ;;  %v4348_v23 = vld [vmem:[%s9211_s0 + $0x28] sm:$0xff]  }
   0x3   :  { %v9275_v10 = vunpack.c.h.bf16 %v4292_v1  ;;  %v9283_v11 = vunpack.c.h.bf16 %v4297_v2  ;;  %v9273_v17 = vunpack.c.l.bf16 %v4326_v15  ;;  %v9272_v18 = vunpack.c.h.bf16 %v4331_v16  ;;  %v4365_v30 = vld [vmem:[%s9211_s0 + $0x38] sm:$0xff]   ;;  %v4370_v31 = vld [vmem:[%s9211_s0 + $0x30] sm:$0xff]   ;;  %v4387_v38 = vld [vmem:[%s9211_s0 + $0x40] sm:$0xff]  }
   0x4   :  { %v428_v6 = vsel %vm9512_vm0, %v9276_v3, 0.0  ;;  %v422_v7 = vsel %vm9512_vm0, %v9285_v4, 0.0  ;;  %v416_v8 = vsel %vm9512_vm0, %v9280_v5, 0.0  ;;  %v431_v12 = vsel %vm9512_vm0, %v9278_v9, 0.0  ;;  %v4404_v45 = vld [vmem:[%s9211_s0 + $0x50] sm:$0xff]   ;;  %v4409_v46 = vld [vmem:[%s9211_s0 + $0x48] sm:$0xff]  }
   0x5   :  { %429 = vadd.xlane.f32.xlu2 %v428_v6  ;;  %423 = vadd.xlane.f32.xlu1 %v422_v7  ;;  %v425_v13 = vsel %vm9512_vm0, %v9275_v10, 0.0  ;;  %v419_v14 = vsel %vm9512_vm0, %v9283_v11, 0.0  ;;  %v9271_v19 = vunpack.c.l.bf16 %v4331_v16  ;;  %v440_v20 = vsel %vm9512_vm0, %v9273_v17, 0.0  ;;  %v4426_v53 = vld [vmem:[%s9211_s0 + $0x58] sm:$0xff]   ;;  %v4443_v60 = vld [vmem:[%s9211_s0 + $0x68] sm:$0xff]   ;;  %v4448_v61 = vld [vmem:[%s9211_s0 + $0x60] sm:$0xff]  }
   0x6   :  { %417 = vadd.xlane.f32.xlu0 %v416_v8  ;;  %v437_v21 = vsel %vm9512_vm0, %v9272_v18, 0.0  ;;  %v9270_v24 = vunpack.c.h.bf16 %v4348_v23  ;;  %v9268_v25 = vunpack.c.l.bf16 %v4348_v23  ;;  %v9265_v26 = vunpack.c.h.bf16 %v4326_v15  ;;  %v4763_v5 = vld [vmem:[%s9211_s0 + $0x108] sm:$0xff]  }
   0x7   :  { %v434_v22 = vsel %vm9512_vm0, %v9271_v19, 0.0  ;;  %v9263_v32 = vunpack.c.l.bf16 %v4365_v30  ;;  %v9261_v33 = vunpack.c.h.bf16 %v4370_v31  ;;  %v9260_v34 = vunpack.c.l.bf16 %v4370_v31 }
   0x8   :  { %v449_v27 = vsel %vm9512_vm0, %v9270_v24, 0.0  ;;  %v446_v28 = vsel %vm9512_vm0, %v9268_v25, 0.0  ;;  %v443_v29 = vsel %vm9512_vm0, %v9265_v26, 0.0  ;;  %v9258_v39 = vunpack.c.h.bf16 %v4387_v38  ;;  %v4712_v26 = vld [vmem:[%s9211_s0 + $0xf0] sm:$0xff]  }
   0x9   :  { %v458_v35 = vsel %vm9512_vm0, %v9263_v32, 0.0  ;;  %v455_v36 = vsel %vm9512_vm0, %v9261_v33, 0.0  ;;  %v452_v37 = vsel %vm9512_vm0, %v9260_v34, 0.0  ;;  %v9257_v40 = vunpack.c.l.bf16 %v4387_v38  ;;  %9536 = vst [vmem:[#allocation22_spill] sm:$0xff] %v4712_v26 }
   0xa   :  { %v9256_v41 = vunpack.c.h.bf16 %v4365_v30  ;;  %v467_v42 = vsel %vm9512_vm0, %v9258_v39, 0.0  ;;  %v9255_v47 = vunpack.c.l.bf16 %v4404_v45  ;;  %v9253_v48 = vunpack.c.h.bf16 %v4409_v46 }
   0xb   :  { %v464_v43 = vsel %vm9512_vm0, %v9257_v40, 0.0  ;;  %v9250_v49 = vunpack.c.l.bf16 %v4409_v46  ;;  %v9248_v54 = vunpack.c.h.bf16 %v4426_v53  ;;  %v9246_v55 = vunpack.c.l.bf16 %v4426_v53 }
   0xc   :  { %v461_v44 = vsel %vm9512_vm0, %v9256_v41, 0.0  ;;  %v476_v50 = vsel %vm9512_vm0, %v9255_v47, 0.0  ;;  %v473_v51 = vsel %vm9512_vm0, %v9253_v48, 0.0  ;;  %v9245_v56 = vunpack.c.h.bf16 %v4404_v45 }
   0xd   :  { %432 = vadd.xlane.f32.xlu2 %v431_v12  ;;  %426 = vadd.xlane.f32.xlu1 %v425_v13  ;;  %v470_v52 = vsel %vm9512_vm0, %v9250_v49, 0.0  ;;  %v485_v57 = vsel %vm9512_vm0, %v9248_v54, 0.0  ;;  %v482_v58 = vsel %vm9512_vm0, %v9246_v55, 0.0  ;;  %v9243_v62 = vunpack.c.l.bf16 %v4443_v60  ;;  %v4465_v13 = vld [vmem:[%s9211_s0 + $0x70] sm:$0xff]   ;;  %v4661_v49 = vld [vmem:[%s9211_s0 + $0xd8] sm:$0xff]  }
   0xe   :  { %420 = vadd.xlane.f32.xlu0 %v419_v14  ;;  %v479_v59 = vsel %vm9512_vm0, %v9245_v56, 0.0  ;;  %v9242_v63 = vunpack.c.h.bf16 %v4448_v61  ;;  %v9241_v6 = vunpack.c.l.bf16 %v4448_v61  ;;  %9517 = vst [vmem:[#allocation3_spill] sm:$0xff] %v4465_v13  ;;  %v9222_v14 = vunpack.c.h.bf16 %v4465_v13 }
   0xf   :  { %v494_v7 = vsel %vm9512_vm0, %v9243_v62, 0.0  ;;  %v9264_v48 = vunpack.c.l.bf16 %v4661_v49  ;;  %v9279_v25 = vunpack.c.l.bf16 %v4712_v26  ;;  %v9290_v11 = vunpack.c.l.bf16 %v4763_v5 }
  0x10   :  { %v491_v8 = vsel %vm9512_vm0, %v9242_v63, 0.0  ;;  %v488_v12 = vsel %vm9512_vm0, %v9241_v6, 0.0  ;;  %vm9510_vm7 = vcmask 523712   ;;  %vm2177_vm8 = vcmask 589312  }
  0x11   :  { %vm2181_vm9 = vcmask 654912   ;;  %vm2185_vm10 = vcmask 720512   ;;  %vm2189_vm11 = vcmask 786112   ;;  %vm2193_vm12 = vcmask 851712  }
  0x12   :  { %vm2197_vm13 = vcmask 917312   ;;  %vm2201_vm14 = vcmask 982912   ;;  %vm2205_vm15 = vcmask 1048512  }
  0x15   :  { %441 = vadd.xlane.f32.xlu2 %v440_v20  ;;  %438 = vadd.xlane.f32.xlu1 %v437_v21  ;;  %v9223_v20 = vunpack.c.l.bf16 %v4465_v13  ;;  %v9224_v21 = vunpack.c.h.bf16 %v4443_v60 }
  0x16   :  { %435 = vadd.xlane.f32.xlu0 %v434_v22  ;;  %v503_v22 = vsel %vm9512_vm0, %v9222_v14, 0.0 }
  0x1d   :  { %450 = vadd.xlane.f32.xlu2 %v449_v27  ;;  %447 = vadd.xlane.f32.xlu1 %v446_v28  ;;  %v500_v27 = vsel %vm9512_vm0, %v9223_v20, 0.0  ;;  %v497_v28 = vsel %vm9512_vm0, %v9224_v21, 0.0 }
  0x1e   :  { %444 = vadd.xlane.f32.xlu0 %v443_v29  ;;  %v4482_v29 = vld [vmem:[%s9211_s0 + $0x80] sm:$0xff]  }
  0x25   :  { %459 = vadd.xlane.f32.xlu2 %v458_v35  ;;  %456 = vadd.xlane.f32.xlu1 %v455_v36  ;;  %v4487_v35 = vld [vmem:[%s9211_s0 + $0x78] sm:$0xff]   ;;  %v9238_v36 = vunpack.c.l.bf16 %v4482_v29 }
  0x26   :  { %453 = vadd.xlane.f32.xlu0 %v452_v37  ;;  %9518 = vst [vmem:[#allocation4_spill] sm:$0xff] %v4487_v35  ;;  %v9220_v37 = vunpack.c.h.bf16 %v4487_v35 }
  0x2d   :  { %468 = vadd.xlane.f32.xlu2 %v467_v42  ;;  %465 = vadd.xlane.f32.xlu1 %v464_v43  ;;  %v9221_v42 = vunpack.c.l.bf16 %v4487_v35  ;;  %v512_v43 = vsel %vm9512_vm0, %v9238_v36, 0.0 }
  0x2e   :  { %462 = vadd.xlane.f32.xlu0 %v461_v44  ;;  %v509_v44 = vsel %vm9512_vm0, %v9220_v37, 0.0 }
  0x35   :  { %477 = vadd.xlane.f32.xlu2 %v476_v50  ;;  %474 = vadd.xlane.f32.xlu1 %v473_v51  ;;  %v506_v50 = vsel %vm9512_vm0, %v9221_v42, 0.0  ;;  %v4504_v51 = vld [vmem:[%s9211_s0 + $0x88] sm:$0xff]  }
  0x36   :  { %471 = vadd.xlane.f32.xlu0 %v470_v52  ;;  %v9233_v52 = vunpack.c.h.bf16 %v4504_v51 }
  0x3d   :  { %486 = vadd.xlane.f32.xlu2 %v485_v57  ;;  %483 = vadd.xlane.f32.xlu1 %v482_v58  ;;  %v9235_v57 = vunpack.c.l.bf16 %v4504_v51  ;;  %v9240_v58 = vunpack.c.h.bf16 %v4482_v29 }
  0x3e   :  { %480 = vadd.xlane.f32.xlu0 %v479_v59  ;;  %v521_v59 = vsel %vm9512_vm0, %v9233_v52, 0.0 }
  0x45   :  { %495 = vadd.xlane.f32.xlu2 %v494_v7  ;;  %492 = vadd.xlane.f32.xlu1 %v491_v8  ;;  %v518_v7 = vsel %vm9512_vm0, %v9235_v57, 0.0  ;;  %v515_v8 = vsel %vm9512_vm0, %v9240_v58, 0.0  ;;  %v4610_v57 = vld [vmem:[%s9211_s0 + $0xc0] sm:$0xff]  }
  0x46   :  { %489 = vadd.xlane.f32.xlu0 %v488_v12  ;;  %v4521_v12 = vld [vmem:[%s9211_s0 + $0x98] sm:$0xff]   ;;  %v9249_v36 = vunpack.c.l.bf16 %v4610_v57 }
  0x47   :  { %v9227_v42 = vunpack.c.h.bf16 %v4521_v12 }
  0x4d   :  { %504 = vadd.xlane.f32.xlu2 %v503_v22  ;;  %501 = vadd.xlane.f32.xlu1 %v500_v27  ;;  %v4526_v22 = vld [vmem:[%s9211_s0 + $0x90] sm:$0xff]   ;;  %v9228_v27 = vunpack.c.l.bf16 %v4521_v12 }
  0x4e   :  { %498 = vadd.xlane.f32.xlu0 %v497_v28  ;;  %v9230_v28 = vunpack.c.h.bf16 %v4526_v22 }
  0x55   :  { %513 = vadd.xlane.f32.xlu2 %v512_v43  ;;  %510 = vadd.xlane.f32.xlu1 %v509_v44  ;;  %v9231_v43 = vunpack.c.l.bf16 %v4526_v22  ;;  %v530_v44 = vsel %vm9512_vm0, %v9228_v27, 0.0 }
  0x56   :  { %507 = vadd.xlane.f32.xlu0 %v506_v50  ;;  %v527_v50 = vsel %vm9512_vm0, %v9230_v28, 0.0 }
  0x5d   :  { %522 = vadd.xlane.f32.xlu2 %v521_v59  ;;  %519 = vadd.xlane.f32.xlu1 %v518_v7  ;;  %v524_v59 = vsel %vm9512_vm0, %v9231_v43, 0.0  ;;  %v4543_v7 = vld [vmem:[%s9211_s0 + $0xa0] sm:$0xff]  }
  0x5e   :  { %516 = vadd.xlane.f32.xlu0 %v515_v8  ;;  %v9225_v8 = vunpack.c.h.bf16 %v4543_v7  ;;  %v9226_v37 = vunpack.c.l.bf16 %v4543_v7 }
  0x60   :  { %v539_v14 = vsel %vm9512_vm0, %v9225_v8, 0.0  ;;  %v536_v20 = vsel %vm9512_vm0, %v9226_v37, 0.0 }
  0x65   :  { %531 = vadd.xlane.f32.xlu2 %v530_v44  ;;  %528 = vadd.xlane.f32.xlu1 %v527_v50  ;;  %v533_v44 = vsel %vm9512_vm0, %v9227_v42, 0.0  ;;  %v4560_v50 = vld [vmem:[%s9211_s0 + $0xb0] sm:$0xff]  }
  0x66   :  { %525 = vadd.xlane.f32.xlu0 %v524_v59  ;;  %v4565_v59 = vld [vmem:[%s9211_s0 + $0xa8] sm:$0xff]   ;;  %v9229_v21 = vunpack.c.l.bf16 %v4560_v50  ;;  %v9239_v28 = vunpack.c.h.bf16 %v4560_v50 }
  0x67   :  { %v9232_v8 = vunpack.c.h.bf16 %v4565_v59  ;;  %v9234_v37 = vunpack.c.l.bf16 %v4565_v59 }
  0x68   :  { %v548_v42 = vsel %vm9512_vm0, %v9229_v21, 0.0 }
  0x69   :  { %v545_v27 = vsel %vm9512_vm0, %v9232_v8, 0.0 }
  0x6d   :  { %540 = vadd.xlane.f32.xlu2 %v539_v14  ;;  %537 = vadd.xlane.f32.xlu1 %v536_v20  ;;  %v542_v14 = vsel %vm9512_vm0, %v9234_v37, 0.0  ;;  %v4582_v20 = vld [vmem:[%s9211_s0 + $0xb8] sm:$0xff]  }
  0x6e   :  { %534 = vadd.xlane.f32.xlu0 %v533_v44  ;;  %9519 = vst [vmem:[#allocation5_spill] sm:$0xff] %v4582_v20  ;;  %v9236_v44 = vunpack.c.h.bf16 %v4582_v20  ;;  %v9237_v21 = vunpack.c.l.bf16 %v4582_v20 }
  0x70   :  { %v557_v37 = vsel %vm9512_vm0, %v9236_v44, 0.0 }
  0x75   :  { %549 = vadd.xlane.f32.xlu2 %v548_v42  ;;  %546 = vadd.xlane.f32.xlu1 %v545_v27  ;;  %v554_v42 = vsel %vm9512_vm0, %v9237_v21, 0.0  ;;  %v551_v27 = vsel %vm9512_vm0, %v9239_v28, 0.0  ;;  %v9247_v21 = vunpack.c.h.bf16 %v4610_v57 }
  0x76   :  { %543 = vadd.xlane.f32.xlu0 %v542_v14  ;;  %v4605_v14 = vld [vmem:[%s9211_s0 + $0xc8] sm:$0xff]  }
  0x77   :  { %v9244_v44 = vunpack.c.l.bf16 %v4605_v14  ;;  %v9254_v56 = vunpack.c.h.bf16 %v4605_v14 }
  0x78   :  { %v4587_v43 = vpop.xlane.xlu2 %429  ;;  %v4589_v8 = vpop.xlane.xlu1 %423 }
  0x79   :  { %9520 = vst [vmem:[#allocation6_spill] sm:$0xff] %v4587_v43  ;;  %v4591_v52 = vpop.xlane.xlu0 %417  ;;  %v566_v63 = vsel %vm9512_vm0, %v9244_v44, 0.0 }
  0x7a   :  { %9521 = vst [vmem:[#allocation7_spill] sm:$0xff] %v4589_v8 }
  0x7b   :  { %9522 = vst [vmem:[#allocation8_spill] sm:$0xff] %v4591_v52 }
  0x7d   :  { %558 = vadd.xlane.f32.xlu2 %v557_v37  ;;  %555 = vadd.xlane.f32.xlu1 %v554_v42  ;;  %v563_v37 = vsel %vm9512_vm0, %v9247_v21, 0.0  ;;  %v560_v42 = vsel %vm9512_vm0, %v9249_v36, 0.0 }
  0x7e   :  { %552 = vadd.xlane.f32.xlu0 %v551_v27  ;;  %v4633_v27 = vld [vmem:[%s9211_s0 + $0xd0] sm:$0xff]  }
  0x7f   :  { %v9251_v62 = vunpack.c.h.bf16 %v4633_v27  ;;  %v9252_v44 = vunpack.c.l.bf16 %v4633_v27 }
  0x80   :  { %v4615_v28 = vpop.xlane.xlu2 %432  ;;  %v4617_v58 = vpop.xlane.xlu1 %426 }
  0x81   :  { %9523 = vst [vmem:[#allocation9_spill] sm:$0xff] %v4615_v28  ;;  %v4619_v6 = vpop.xlane.xlu0 %420  ;;  %v575_v36 = vsel %vm9512_vm0, %v9251_v62, 0.0 }
  0x82   :  { %9524 = vst [vmem:[#allocation10_spill] sm:$0xff] %v4617_v58 }
  0x83   :  { %9525 = vst [vmem:[#allocation11_spill] sm:$0xff] %v4619_v6 }
  0x85   :  { %567 = vadd.xlane.f32.xlu2 %v566_v63  ;;  %564 = vadd.xlane.f32.xlu1 %v563_v37  ;;  %v572_v63 = vsel %vm9512_vm0, %v9252_v44, 0.0  ;;  %v569_v37 = vsel %vm9512_vm0, %v9254_v56, 0.0  ;;  %v9262_v44 = vunpack.c.h.bf16 %v4661_v49 }
  0x86   :  { %561 = vadd.xlane.f32.xlu0 %v560_v42  ;;  %v4656_v42 = vld [vmem:[%s9211_s0 + $0xe0] sm:$0xff]  }
  0x87   :  { %v9259_v62 = vunpack.c.l.bf16 %v4656_v42  ;;  %v9269_v34 = vunpack.c.h.bf16 %v4656_v42 }
  0x88   :  { %v4638_v55 = vpop.xlane.xlu2 %441  ;;  %v4640_v21 = vpop.xlane.xlu1 %438 }
  0x89   :  { %9526 = vst [vmem:[#allocation12_spill] sm:$0xff] %v4638_v55  ;;  %v4642_v54 = vpop.xlane.xlu0 %435  ;;  %v584_v40 = vsel %vm9512_vm0, %v9259_v62, 0.0 }
  0x8a   :  { %9527 = vst [vmem:[#allocation13_spill] sm:$0xff] %v4640_v21 }
  0x8b   :  { %9528 = vst [vmem:[#allocation14_spill] sm:$0xff] %v4642_v54 }
  0x8d   :  { %576 = vadd.xlane.f32.xlu2 %v575_v36  ;;  %573 = vadd.xlane.f32.xlu1 %v572_v63  ;;  %v581_v36 = vsel %vm9512_vm0, %v9262_v44, 0.0  ;;  %v578_v63 = vsel %vm9512_vm0, %v9264_v48, 0.0 }
  0x8e   :  { %570 = vadd.xlane.f32.xlu0 %v569_v37  ;;  %v4684_v37 = vld [vmem:[%s9211_s0 + $0xe8] sm:$0xff]  }
  0x8f   :  { %v9266_v39 = vunpack.c.h.bf16 %v4684_v37  ;;  %v9267_v62 = vunpack.c.l.bf16 %v4684_v37 }
  0x90   :  { %v4666_v56 = vpop.xlane.xlu2 %450  ;;  %v4668_v47 = vpop.xlane.xlu1 %447 }
  0x91   :  { %9529 = vst [vmem:[#allocation15_spill] sm:$0xff] %v4666_v56  ;;  %v4670_v41 = vpop.xlane.xlu0 %444  ;;  %v593_v48 = vsel %vm9512_vm0, %v9266_v39, 0.0 }
  0x92   :  { %9530 = vst [vmem:[#allocation16_spill] sm:$0xff] %v4668_v47 }
  0x93   :  { %9531 = vst [vmem:[#allocation17_spill] sm:$0xff] %v4670_v41 }
  0x95   :  { %585 = vadd.xlane.f32.xlu2 %v584_v40  ;;  %582 = vadd.xlane.f32.xlu1 %v581_v36  ;;  %v590_v40 = vsel %vm9512_vm0, %v9267_v62, 0.0  ;;  %v587_v36 = vsel %vm9512_vm0, %v9269_v34, 0.0  ;;  %v9277_v62 = vunpack.c.h.bf16 %v4712_v26 }
  0x96   :  { %579 = vadd.xlane.f32.xlu0 %v578_v63  ;;  %v4707_v63 = vld [vmem:[%s9211_s0 + $0xf8] sm:$0xff]  }
  0x97   :  { %9535 = vst [vmem:[#allocation21_spill] sm:$0xff] %v4707_v63  ;;  %v9274_v39 = vunpack.c.l.bf16 %v4707_v63  ;;  %v9284_v10 = vunpack.c.h.bf16 %v4707_v63 }
  0x98   :  { %v4689_v33 = vpop.xlane.xlu2 %459  ;;  %v4691_v44 = vpop.xlane.xlu1 %456 }
  0x99   :  { %9532 = vst [vmem:[#allocation18_spill] sm:$0xff] %v4689_v33  ;;  %v4693_v32 = vpop.xlane.xlu0 %453  ;;  %v602_v18 = vsel %vm9512_vm0, %v9274_v39, 0.0 }
  0x9a   :  { %9533 = vst [vmem:[#allocation19_spill] sm:$0xff] %v4691_v44 }
  0x9b   :  { %9534 = vst [vmem:[#allocation20_spill] sm:$0xff] %v4693_v32 }
  0x9d   :  { %594 = vadd.xlane.f32.xlu2 %v593_v48  ;;  %591 = vadd.xlane.f32.xlu1 %v590_v40  ;;  %v599_v48 = vsel %vm9512_vm0, %v9277_v62, 0.0  ;;  %v596_v40 = vsel %vm9512_vm0, %v9279_v25, 0.0 }
  0x9e   :  { %588 = vadd.xlane.f32.xlu0 %v587_v36  ;;  %v4735_v36 = vld [vmem:[%s9211_s0 + $0x100] sm:$0xff]  }
  0x9f   :  { %v9281_v17 = vunpack.c.h.bf16 %v4735_v36  ;;  %v9282_v39 = vunpack.c.l.bf16 %v4735_v36 }
  0xa0   :  { %v4717_v34 = vpop.xlane.xlu2 %468  ;;  %v4719_v24 = vpop.xlane.xlu1 %465 }
  0xa1   :  { %9537 = vst [vmem:[#allocation23_spill] sm:$0xff] %v4717_v34  ;;  %v4721_v19 = vpop.xlane.xlu0 %462  ;;  %v611_v25 = vsel %vm9512_vm0, %v9281_v17, 0.0 }
  0xa2   :  { %9538 = vst [vmem:[#allocation24_spill] sm:$0xff] %v4719_v24 }
  0xa3   :  { %9539 = vst [vmem:[#allocation25_spill] sm:$0xff] %v4721_v19 }
  0xa5   :  { %603 = vadd.xlane.f32.xlu2 %v602_v18  ;;  %600 = vadd.xlane.f32.xlu1 %v599_v48  ;;  %v608_v18 = vsel %vm9512_vm0, %v9282_v39, 0.0  ;;  %v605_v48 = vsel %vm9512_vm0, %v9284_v10, 0.0  ;;  %v9289_v39 = vunpack.c.h.bf16 %v4763_v5 }
  0xa6   :  { %597 = vadd.xlane.f32.xlu0 %v596_v40  ;;  %v4758_v40 = vld [vmem:[%s9211_s0 + $0x110] sm:$0xff]  }
  0xa7   :  { %9543 = vst [vmem:[#allocation29_spill] sm:$0xff] %v4758_v40  ;;  %v9288_v17 = vunpack.c.l.bf16 %v4758_v40 }
  0xa8   :  { %v4740_v3 = vpop.xlane.xlu2 %477  ;;  %v4742_v62 = vpop.xlane.xlu1 %474 }
  0xa9   :  { %9540 = vst [vmem:[#allocation26_spill] sm:$0xff] %v4740_v3  ;;  %v4744_v9 = vpop.xlane.xlu0 %471  ;;  %v620_v33 = vsel %vm9512_vm0, %v9288_v17, 0.0 }
  0xaa   :  { %9541 = vst [vmem:[#allocation27_spill] sm:$0xff] %v4742_v62 }
  0xab   :  { %9542 = vst [vmem:[#allocation28_spill] sm:$0xff] %v4744_v9 }
  0xad   :  { %612 = vadd.xlane.f32.xlu2 %v611_v25  ;;  %609 = vadd.xlane.f32.xlu1 %v608_v18  ;;  %v617_v25 = vsel %vm9512_vm0, %v9289_v39, 0.0  ;;  %v614_v18 = vsel %vm9512_vm0, %v9290_v11, 0.0 }
  0xae   :  { %606 = vadd.xlane.f32.xlu0 %v605_v48  ;;  %v4786_v48 = vld [vmem:[%s9211_s0 + $0x118] sm:$0xff]  }
  0xaf   :  { %9547 = vst [vmem:[#allocation33_spill] sm:$0xff] %v4786_v48  ;;  %v9292_v17 = vunpack.c.l.bf16 %v4786_v48 }
  0xb0   :  { %v4768_v10 = vpop.xlane.xlu2 %486  ;;  %v4770_v4 = vpop.xlane.xlu1 %483 }
  0xb1   :  { %9544 = vst [vmem:[#allocation30_spill] sm:$0xff] %v4768_v10  ;;  %v4772_v19 = vpop.xlane.xlu0 %480  ;;  %v9291_v10 = vunpack.c.h.bf16 %v4786_v48 }
  0xb2   :  { %9545 = vst [vmem:[#allocation31_spill] sm:$0xff] %v4770_v4  ;;  %v9293_v4 = vunpack.c.h.bf16 %v4758_v40 }
  0xb3   :  { %9546 = vst [vmem:[#allocation32_spill] sm:$0xff] %v4772_v19  ;;  %v629_v11 = vsel %vm9512_vm0, %v9291_v10, 0.0 }
  0xb5   :  { %621 = vadd.xlane.f32.xlu2 %v620_v33  ;;  %618 = vadd.xlane.f32.xlu1 %v617_v25  ;;  %v626_v33 = vsel %vm9512_vm0, %v9292_v17, 0.0  ;;  %v623_v25 = vsel %vm9512_vm0, %v9293_v4, 0.0 }
  0xb6   :  { %615 = vadd.xlane.f32.xlu0 %v614_v18  ;;  %v4809_v18 = vld [vmem:[%s9211_s0 + $0x128] sm:$0xff]  }
  0xb7   :  { %9551 = vst [vmem:[#allocation37_spill] sm:$0xff] %v4809_v18  ;;  %v9295_v10 = vunpack.c.l.bf16 %v4809_v18 }
  0xb8   :  { %v4791_v19 = vpop.xlane.xlu2 %495  ;;  %v4793_v39 = vpop.xlane.xlu1 %492 }
  0xb9   :  { %9548 = vst [vmem:[#allocation34_spill] sm:$0xff] %v4791_v19  ;;  %v4795_v3 = vpop.xlane.xlu0 %489  ;;  %v4814_v19 = vld [vmem:[%s9211_s0 + $0x120] sm:$0xff]   ;;  %v638_v62 = vsel %vm9512_vm0, %v9295_v10, 0.0 }
  0xba   :  { %9549 = vst [vmem:[#allocation35_spill] sm:$0xff] %v4793_v39  ;;  %v9296_v17 = vunpack.c.h.bf16 %v4814_v19  ;;  %v9297_v39 = vunpack.c.l.bf16 %v4814_v19 }
  0xbb   :  { %9550 = vst [vmem:[#allocation36_spill] sm:$0xff] %v4795_v3 }
  0xbc   :  { %9552 = vst [vmem:[#allocation38_spill] sm:$0xff] %v4814_v19 }
  0xbd   :  { %630 = vadd.xlane.f32.xlu2 %v629_v11  ;;  %627 = vadd.xlane.f32.xlu1 %v626_v33  ;;  %v635_v11 = vsel %vm9512_vm0, %v9296_v17, 0.0  ;;  %v632_v33 = vsel %vm9512_vm0, %v9297_v39, 0.0 }
  0xbe   :  { %624 = vadd.xlane.f32.xlu0 %v623_v25  ;;  %v4837_v25 = vld [vmem:[%s9211_s0 + $0x130] sm:$0xff]  }
  0xbf   :  { %9556 = vst [vmem:[#allocation42_spill] sm:$0xff] %v4837_v25  ;;  %v9299_v10 = vunpack.c.l.bf16 %v4837_v25 }
  0xc0   :  { %v4819_v4 = vpop.xlane.xlu2 %504  ;;  %v4821_v3 = vpop.xlane.xlu1 %501 }
  0xc1   :  { %9553 = vst [vmem:[#allocation39_spill] sm:$0xff] %v4819_v4  ;;  %v4823_v44 = vpop.xlane.xlu0 %498  ;;  %v9298_v4 = vunpack.c.h.bf16 %v4837_v25 }
  0xc2   :  { %9554 = vst [vmem:[#allocation40_spill] sm:$0xff] %v4821_v3 }
  0xc3   :  { %9555 = vst [vmem:[#allocation41_spill] sm:$0xff] %v4823_v44  ;;  %v9300_v44 = vunpack.c.h.bf16 %v4809_v18  ;;  %v647_v39 = vsel %vm9512_vm0, %v9298_v4, 0.0 }
  0xc5   :  { %639 = vadd.xlane.f32.xlu2 %v638_v62  ;;  %636 = vadd.xlane.f32.xlu1 %v635_v11  ;;  %v644_v62 = vsel %vm9512_vm0, %v9299_v10, 0.0  ;;  %v641_v11 = vsel %vm9512_vm0, %v9300_v44, 0.0 }
  0xc6   :  { %633 = vadd.xlane.f32.xlu0 %v632_v33  ;;  %v4860_v33 = vld [vmem:[%s9211_s0 + $0x140] sm:$0xff]  }
  0xc7   :  { %9560 = vst [vmem:[#allocation46_spill] sm:$0xff] %v4860_v33  ;;  %v9301_v4 = vunpack.c.l.bf16 %v4860_v33 }
  0xc8   :  { %v4842_v3 = vpop.xlane.xlu2 %513  ;;  %v4844_v17 = vpop.xlane.xlu1 %510 }
  0xc9   :  { %9557 = vst [vmem:[#allocation43_spill] sm:$0xff] %v4842_v3  ;;  %v4846_v32 = vpop.xlane.xlu0 %507  ;;  %v656_v9 = vsel %vm9512_vm0, %v9301_v4, 0.0 }
  0xca   :  { %9558 = vst [vmem:[#allocation44_spill] sm:$0xff] %v4844_v17  ;;  %v4865_v17 = vld [vmem:[%s9211_s0 + $0x138] sm:$0xff]  }
  0xcb   :  { %9559 = vst [vmem:[#allocation45_spill] sm:$0xff] %v4846_v32  ;;  %v9302_v10 = vunpack.c.h.bf16 %v4865_v17  ;;  %v9303_v32 = vunpack.c.l.bf16 %v4865_v17 }
  0xcc   :  { %9561 = vst [vmem:[#allocation47_spill] sm:$0xff] %v4865_v17 }
  0xcd   :  { %648 = vadd.xlane.f32.xlu2 %v647_v39  ;;  %645 = vadd.xlane.f32.xlu1 %v644_v62  ;;  %v653_v39 = vsel %vm9512_vm0, %v9302_v10, 0.0  ;;  %v650_v62 = vsel %vm9512_vm0, %v9303_v32, 0.0 }
  0xce   :  { %642 = vadd.xlane.f32.xlu0 %v641_v11  ;;  %v4888_v11 = vld [vmem:[%s9211_s0 + $0x148] sm:$0xff]  }
  0xcf   :  { %9565 = vst [vmem:[#allocation51_spill] sm:$0xff] %v4888_v11  ;;  %v9305_v4 = vunpack.c.l.bf16 %v4888_v11 }
  0xd0   :  { %v4870_v44 = vpop.xlane.xlu2 %522  ;;  %v4872_v3 = vpop.xlane.xlu1 %519 }
  0xd1   :  { %9562 = vst [vmem:[#allocation48_spill] sm:$0xff] %v4870_v44  ;;  %v4874_v56 = vpop.xlane.xlu0 %516  ;;  %v9304_v44 = vunpack.c.h.bf16 %v4888_v11 }
  0xd2   :  { %9563 = vst [vmem:[#allocation49_spill] sm:$0xff] %v4872_v3  ;;  %v9306_v3 = vunpack.c.h.bf16 %v4860_v33 }
  0xd3   :  { %9564 = vst [vmem:[#allocation50_spill] sm:$0xff] %v4874_v56  ;;  %v665_v32 = vsel %vm9512_vm0, %v9304_v44, 0.0 }
  0xd5   :  { %657 = vadd.xlane.f32.xlu2 %v656_v9  ;;  %654 = vadd.xlane.f32.xlu1 %v653_v39  ;;  %v662_v9 = vsel %vm9512_vm0, %v9305_v4, 0.0  ;;  %v659_v39 = vsel %vm9512_vm0, %v9306_v3, 0.0 }
  0xd6   :  { %651 = vadd.xlane.f32.xlu0 %v650_v62  ;;  %v4911_v62 = vld [vmem:[%s9211_s0 + $0x158] sm:$0xff]  }
  0xd7   :  { %9569 = vst [vmem:[#allocation55_spill] sm:$0xff] %v4911_v62  ;;  %v9307_v44 = vunpack.c.l.bf16 %v4911_v62 }
  0xd8   :  { %v4893_v56 = vpop.xlane.xlu2 %531  ;;  %v4895_v10 = vpop.xlane.xlu1 %528 }
  0xd9   :  { %9566 = vst [vmem:[#allocation52_spill] sm:$0xff] %v4893_v56  ;;  %v4897_v24 = vpop.xlane.xlu0 %525  ;;  %v4916_v56 = vld [vmem:[%s9211_s0 + $0x150] sm:$0xff]   ;;  %v674_v47 = vsel %vm9512_vm0, %v9307_v44, 0.0 }
  0xda   :  { %9567 = vst [vmem:[#allocation53_spill] sm:$0xff] %v4895_v10  ;;  %v9308_v4 = vunpack.c.h.bf16 %v4916_v56  ;;  %v9309_v10 = vunpack.c.l.bf16 %v4916_v56 }
  0xdb   :  { %9568 = vst [vmem:[#allocation54_spill] sm:$0xff] %v4897_v24 }
  0xdc   :  { %9570 = vst [vmem:[#allocation56_spill] sm:$0xff] %v4916_v56 }
  0xdd   :  { %666 = vadd.xlane.f32.xlu2 %v665_v32  ;;  %663 = vadd.xlane.f32.xlu1 %v662_v9  ;;  %v671_v32 = vsel %vm9512_vm0, %v9308_v4, 0.0  ;;  %v668_v9 = vsel %vm9512_vm0, %v9309_v10, 0.0 }
  0xde   :  { %660 = vadd.xlane.f32.xlu0 %v659_v39  ;;  %v4939_v39 = vld [vmem:[%s9211_s0 + $0x160] sm:$0xff]  }
  0xdf   :  { %9574 = vst [vmem:[#allocation60_spill] sm:$0xff] %v4939_v39  ;;  %v9311_v44 = vunpack.c.l.bf16 %v4939_v39 }
  0xe0   :  { %v4921_v3 = vpop.xlane.xlu2 %540  ;;  %v4923_v24 = vpop.xlane.xlu1 %537 }
  0xe1   :  { %9571 = vst [vmem:[#allocation57_spill] sm:$0xff] %v4921_v3  ;;  %v4925_v34 = vpop.xlane.xlu0 %534  ;;  %v9310_v3 = vunpack.c.h.bf16 %v4939_v39 }
  0xe2   :  { %9572 = vst [vmem:[#allocation58_spill] sm:$0xff] %v4923_v24  ;;  %v9312_v24 = vunpack.c.h.bf16 %v4911_v62 }
  0xe3   :  { %9573 = vst [vmem:[#allocation59_spill] sm:$0xff] %v4925_v34  ;;  %v683_v10 = vsel %vm9512_vm0, %v9310_v3, 0.0 }
  0xe5   :  { %675 = vadd.xlane.f32.xlu2 %v674_v47  ;;  %672 = vadd.xlane.f32.xlu1 %v671_v32  ;;  %v680_v47 = vsel %vm9512_vm0, %v9311_v44, 0.0  ;;  %v677_v32 = vsel %vm9512_vm0, %v9312_v24, 0.0 }
  0xe6   :  { %669 = vadd.xlane.f32.xlu0 %v668_v9  ;;  %v4962_v9 = vld [vmem:[%s9211_s0 + $0x170] sm:$0xff]  }
  0xe7   :  { %9578 = vst [vmem:[#allocation64_spill] sm:$0xff] %v4962_v9  ;;  %v9313_v3 = vunpack.c.l.bf16 %v4962_v9 }
  0xe8   :  { %v4944_v34 = vpop.xlane.xlu2 %549  ;;  %v4946_v4 = vpop.xlane.xlu1 %546 }
  0xe9   :  { %9575 = vst [vmem:[#allocation61_spill] sm:$0xff] %v4944_v34  ;;  %v4948_v41 = vpop.xlane.xlu0 %543  ;;  %v4967_v34 = vld [vmem:[%s9211_s0 + $0x168] sm:$0xff]   ;;  %v692_v21 = vsel %vm9512_vm0, %v9313_v3, 0.0 }
  0xea   :  { %9576 = vst [vmem:[#allocation62_spill] sm:$0xff] %v4946_v4  ;;  %v9314_v44 = vunpack.c.h.bf16 %v4967_v34  ;;  %v9315_v4 = vunpack.c.l.bf16 %v4967_v34 }
  0xeb   :  { %9577 = vst [vmem:[#allocation63_spill] sm:$0xff] %v4948_v41 }
  0xec   :  { %9579 = vst [vmem:[#allocation65_spill] sm:$0xff] %v4967_v34 }
  0xed   :  { %684 = vadd.xlane.f32.xlu2 %v683_v10  ;;  %681 = vadd.xlane.f32.xlu1 %v680_v47  ;;  %v689_v10 = vsel %vm9512_vm0, %v9314_v44, 0.0  ;;  %v686_v47 = vsel %vm9512_vm0, %v9315_v4, 0.0 }
  0xee   :  { %678 = vadd.xlane.f32.xlu0 %v677_v32  ;;  %v4990_v32 = vld [vmem:[%s9211_s0 + $0x178] sm:$0xff]  }
  0xef   :  { %9583 = vst [vmem:[#allocation69_spill] sm:$0xff] %v4990_v32  ;;  %v9317_v3 = vunpack.c.l.bf16 %v4990_v32 }
  0xf0   :  { %v4972_v24 = vpop.xlane.xlu2 %558  ;;  %v4974_v41 = vpop.xlane.xlu1 %555 }
  0xf1   :  { %9580 = vst [vmem:[#allocation66_spill] sm:$0xff] %v4972_v24  ;;  %v4976_v55 = vpop.xlane.xlu0 %552  ;;  %v9316_v24 = vunpack.c.h.bf16 %v4990_v32 }
  0xf2   :  { %9581 = vst [vmem:[#allocation67_spill] sm:$0xff] %v4974_v41  ;;  %v9318_v41 = vunpack.c.h.bf16 %v4962_v9 }
  0xf3   :  { %9582 = vst [vmem:[#allocation68_spill] sm:$0xff] %v4976_v55  ;;  %v701_v4 = vsel %vm9512_vm0, %v9316_v24, 0.0 }
  0xf5   :  { %693 = vadd.xlane.f32.xlu2 %v692_v21  ;;  %690 = vadd.xlane.f32.xlu1 %v689_v10  ;;  %v698_v21 = vsel %vm9512_vm0, %v9317_v3, 0.0  ;;  %v695_v10 = vsel %vm9512_vm0, %v9318_v41, 0.0 }
  0xf6   :  { %687 = vadd.xlane.f32.xlu0 %v686_v47  ;;  %v5013_v47 = vld [vmem:[%s9211_s0 + $0x188] sm:$0xff]  }
  0xf7   :  { %v9319_v24 = vunpack.c.l.bf16 %v5013_v47 }
  0xf8   :  { %v4995_v55 = vpop.xlane.xlu2 %567  ;;  %v4997_v44 = vpop.xlane.xlu1 %564 }
  0xf9   :  { %9584 = vst [vmem:[#allocation70_spill] sm:$0xff] %v4995_v55  ;;  %v4999_v28 = vpop.xlane.xlu0 %561  ;;  %v5018_v55 = vld [vmem:[%s9211_s0 + $0x180] sm:$0xff]   ;;  %v710_v43 = vsel %vm9512_vm0, %v9319_v24, 0.0 }
  0xfa   :  { %9585 = vst [vmem:[#allocation71_spill] sm:$0xff] %v4997_v44  ;;  %v9320_v3 = vunpack.c.h.bf16 %v5018_v55 }
  0xfb   :  { %9586 = vst [vmem:[#allocation72_spill] sm:$0xff] %v4999_v28  ;;  %v9321_v28 = vunpack.c.l.bf16 %v5018_v55 }
  0xfd   :  { %702 = vadd.xlane.f32.xlu2 %v701_v4  ;;  %699 = vadd.xlane.f32.xlu1 %v698_v21  ;;  %v707_v4 = vsel %vm9512_vm0, %v9320_v3, 0.0  ;;  %v704_v21 = vsel %vm9512_vm0, %v9321_v28, 0.0 }
  0xfe   :  { %696 = vadd.xlane.f32.xlu0 %v695_v10  ;;  %v5041_v10 = vld [vmem:[%s9211_s0 + $0x190] sm:$0xff]  }
  0xff   :  { %v9323_v24 = vunpack.c.l.bf16 %v5041_v10 }
 0x100   :  { %v5023_v41 = vpop.xlane.xlu2 %576  ;;  %v5025_v44 = vpop.xlane.xlu1 %573 }
 0x101   :  { %9587 = vst [vmem:[#allocation73_spill] sm:$0xff] %v5023_v41  ;;  %v5027_v54 = vpop.xlane.xlu0 %570  ;;  %v9322_v41 = vunpack.c.h.bf16 %v5041_v10 }
 0x102   :  { %9588 = vst [vmem:[#allocation74_spill] sm:$0xff] %v5025_v44  ;;  %v9324_v44 = vunpack.c.h.bf16 %v5013_v47 }
 0x103   :  { %9589 = vst [vmem:[#allocation75_spill] sm:$0xff] %v5027_v54  ;;  %v719_v28 = vsel %vm9512_vm0, %v9322_v41, 0.0 }
 0x105   :  { %711 = vadd.xlane.f32.xlu2 %v710_v43  ;;  %708 = vadd.xlane.f32.xlu1 %v707_v4  ;;  %v716_v43 = vsel %vm9512_vm0, %v9323_v24, 0.0  ;;  %v713_v4 = vsel %vm9512_vm0, %v9324_v44, 0.0 }
 0x106   :  { %705 = vadd.xlane.f32.xlu0 %v704_v21  ;;  %v5064_v21 = vld [vmem:[%s9211_s0 + $0x1a0] sm:$0xff]  }
 0x107   :  { %v9325_v41 = vunpack.c.l.bf16 %v5064_v21 }
 0x108   :  { %v5046_v54 = vpop.xlane.xlu2 %585  ;;  %v5048_v3 = vpop.xlane.xlu1 %582 }
 0x109   :  { %9590 = vst [vmem:[#allocation76_spill] sm:$0xff] %v5046_v54  ;;  %v5050_v58 = vpop.xlane.xlu0 %579  ;;  %v5069_v54 = vld [vmem:[%s9211_s0 + $0x198] sm:$0xff]   ;;  %v728_v52 = vsel %vm9512_vm0, %v9325_v41, 0.0 }
 0x10a   :  { %9591 = vst [vmem:[#allocation77_spill] sm:$0xff] %v5048_v3  ;;  %v9326_v24 = vunpack.c.h.bf16 %v5069_v54  ;;  %v9327_v3 = vunpack.c.l.bf16 %v5069_v54 }
 0x10b   :  { %9592 = vst [vmem:[#allocation78_spill] sm:$0xff] %v5050_v58 }
 0x10d   :  { %720 = vadd.xlane.f32.xlu2 %v719_v28  ;;  %717 = vadd.xlane.f32.xlu1 %v716_v43  ;;  %v725_v28 = vsel %vm9512_vm0, %v9326_v24, 0.0  ;;  %v722_v43 = vsel %vm9512_vm0, %v9327_v3, 0.0 }
 0x10e   :  { %714 = vadd.xlane.f32.xlu0 %v713_v4  ;;  %v5092_v4 = vld [vmem:[%s9211_s0 + $0x1a8] sm:$0xff]  }
 0x10f   :  { %9596 = vst [vmem:[#allocation82_spill] sm:$0xff] %v5092_v4  ;;  %v9329_v41 = vunpack.c.l.bf16 %v5092_v4 }
 0x110   :  { %v5074_v44 = vpop.xlane.xlu2 %594  ;;  %v5076_v58 = vpop.xlane.xlu1 %591 }
 0x111   :  { %9593 = vst [vmem:[#allocation79_spill] sm:$0xff] %v5074_v44  ;;  %v5078_v8 = vpop.xlane.xlu0 %588  ;;  %v9328_v44 = vunpack.c.h.bf16 %v5092_v4 }
 0x112   :  { %9594 = vst [vmem:[#allocation80_spill] sm:$0xff] %v5076_v58  ;;  %v9330_v58 = vunpack.c.h.bf16 %v5064_v21 }
 0x113   :  { %9595 = vst [vmem:[#allocation81_spill] sm:$0xff] %v5078_v8  ;;  %v737_v3 = vsel %vm9512_vm0, %v9328_v44, 0.0 }
 0x115   :  { %729 = vadd.xlane.f32.xlu2 %v728_v52  ;;  %726 = vadd.xlane.f32.xlu1 %v725_v28  ;;  %v734_v52 = vsel %vm9512_vm0, %v9329_v41, 0.0  ;;  %v731_v28 = vsel %vm9512_vm0, %v9330_v58, 0.0 }
 0x116   :  { %723 = vadd.xlane.f32.xlu0 %v722_v43  ;;  %v5115_v43 = vld [vmem:[%s9211_s0 + $0x1b8] sm:$0xff]  }
 0x117   :  { %9600 = vst [vmem:[#allocation86_spill] sm:$0xff] %v5115_v43  ;;  %v9336_v44 = vunpack.c.l.bf16 %v5115_v43 }
 0x118   :  { %v5097_v8 = vpop.xlane.xlu2 %603  ;;  %v5099_v24 = vpop.xlane.xlu1 %600 }
 0x119   :  { %9597 = vst [vmem:[#allocation83_spill] sm:$0xff] %v5097_v8  ;;  %v5101_v6 = vpop.xlane.xlu0 %597  ;;  %v5120_v8 = vld [vmem:[%s9211_s0 + $0x1b0] sm:$0xff]   ;;  %v746_v17 = vsel %vm9512_vm0, %v9336_v44, 0.0 }
 0x11a   :  { %9598 = vst [vmem:[#allocation84_spill] sm:$0xff] %v5099_v24  ;;  %v9339_v41 = vunpack.c.h.bf16 %v5120_v8  ;;  %v9342_v24 = vunpack.c.l.bf16 %v5120_v8 }
 0x11b   :  { %9599 = vst [vmem:[#allocation85_spill] sm:$0xff] %v5101_v6 }
 0x11c   :  { %9601 = vst [vmem:[#allocation87_spill] sm:$0xff] %v5120_v8 }
 0x11d   :  { %738 = vadd.xlane.f32.xlu2 %v737_v3  ;;  %735 = vadd.xlane.f32.xlu1 %v734_v52  ;;  %v743_v3 = vsel %vm9512_vm0, %v9339_v41, 0.0  ;;  %v740_v52 = vsel %vm9512_vm0, %v9342_v24, 0.0 }
 0x11e   :  { %732 = vadd.xlane.f32.xlu0 %v731_v28  ;;  %v5143_v28 = vld [vmem:[%s9211_s0 + $0x1c0] sm:$0xff]  }
 0x11f   :  { %v9344_v44 = vunpack.c.l.bf16 %v5143_v28 }
 0x120   :  { %v5125_v58 = vpop.xlane.xlu2 %612  ;;  %v5127_v6 = vpop.xlane.xlu1 %609 }
 0x121   :  { %9602 = vst [vmem:[#allocation88_spill] sm:$0xff] %v5125_v58  ;;  %v5129_v32 = vpop.xlane.xlu0 %606 }
 0x122   :  { %9603 = vst [vmem:[#allocation89_spill] sm:$0xff] %v5127_v6  ;;  %v9345_v6 = vunpack.c.h.bf16 %v5115_v43 }
 0x123   :  { %9604 = vst [vmem:[#allocation90_spill] sm:$0xff] %v5129_v32  ;;  %v9343_v32 = vunpack.c.h.bf16 %v5143_v28 }
 0x125   :  { %747 = vadd.xlane.f32.xlu2 %v746_v17  ;;  %744 = vadd.xlane.f32.xlu1 %v743_v3  ;;  %v755_v24 = vsel %vm9512_vm0, %v9343_v32, 0.0  ;;  %v752_v17 = vsel %vm9512_vm0, %v9344_v44, 0.0  ;;  %v749_v3 = vsel %vm9512_vm0, %v9345_v6, 0.0 }
 0x126   :  { %741 = vadd.xlane.f32.xlu0 %v740_v52  ;;  %v5166_v52 = vld [vmem:[%s9211_s0 + $0x1d0] sm:$0xff]  }
 0x127   :  { %v9350_v32 = vunpack.c.l.bf16 %v5166_v52 }
 0x128   :  { %v5148_v58 = vpop.xlane.xlu2 %621  ;;  %v5150_v41 = vpop.xlane.xlu1 %618 }
 0x129   :  { %9605 = vst [vmem:[#allocation91_spill] sm:$0xff] %v5148_v58  ;;  %v5152_v9 = vpop.xlane.xlu0 %615  ;;  %v5171_v58 = vld [vmem:[%s9211_s0 + $0x1c8] sm:$0xff]   ;;  %v764_v34 = vsel %vm9512_vm0, %v9350_v32, 0.0 }
 0x12a   :  { %9606 = vst [vmem:[#allocation92_spill] sm:$0xff] %v5150_v41  ;;  %v9351_v44 = vunpack.c.h.bf16 %v5171_v58  ;;  %v9354_v41 = vunpack.c.l.bf16 %v5171_v58 }
 0x12b   :  { %9607 = vst [vmem:[#allocation93_spill] sm:$0xff] %v5152_v9 }
 0x12d   :  { %756 = vadd.xlane.f32.xlu2 %v755_v24  ;;  %753 = vadd.xlane.f32.xlu1 %v752_v17  ;;  %v761_v24 = vsel %vm9512_vm0, %v9351_v44, 0.0  ;;  %v758_v17 = vsel %vm9512_vm0, %v9354_v41, 0.0 }
 0x12e   :  { %750 = vadd.xlane.f32.xlu0 %v749_v3  ;;  %v5194_v3 = vld [vmem:[%s9211_s0 + $0x1d8] sm:$0xff]  }
 0x12f   :  { %v9356_v32 = vunpack.c.l.bf16 %v5194_v3 }
 0x130   :  { %v5176_v6 = vpop.xlane.xlu2 %630  ;;  %v5178_v9 = vpop.xlane.xlu1 %627 }
 0x131   :  { %9608 = vst [vmem:[#allocation94_spill] sm:$0xff] %v5176_v6  ;;  %v5180_v25 = vpop.xlane.xlu0 %624  ;;  %v9355_v6 = vunpack.c.h.bf16 %v5194_v3 }
 0x132   :  { %9609 = vst [vmem:[#allocation95_spill] sm:$0xff] %v5178_v9  ;;  %v9357_v9 = vunpack.c.h.bf16 %v5166_v52 }
 0x133   :  { %9610 = vst [vmem:[#allocation96_spill] sm:$0xff] %v5180_v25  ;;  %v773_v41 = vsel %vm9512_vm0, %v9355_v6, 0.0 }
 0x135   :  { %765 = vadd.xlane.f32.xlu2 %v764_v34  ;;  %762 = vadd.xlane.f32.xlu1 %v761_v24  ;;  %v770_v34 = vsel %vm9512_vm0, %v9356_v32, 0.0  ;;  %v767_v24 = vsel %vm9512_vm0, %v9357_v9, 0.0 }
 0x136   :  { %759 = vadd.xlane.f32.xlu0 %v758_v17  ;;  %v5217_v17 = vld [vmem:[%s9211_s0 + $0x1e8] sm:$0xff]  }
 0x137   :  { %9614 = vst [vmem:[#allocation100_spill] sm:$0xff] %v5217_v17  ;;  %v9362_v6 = vunpack.c.l.bf16 %v5217_v17 }
 0x138   :  { %v5199_v25 = vpop.xlane.xlu2 %639  ;;  %v5201_v44 = vpop.xlane.xlu1 %636 }
 0x139   :  { %9611 = vst [vmem:[#allocation97_spill] sm:$0xff] %v5199_v25  ;;  %v5203_v39 = vpop.xlane.xlu0 %633  ;;  %v5222_v25 = vld [vmem:[%s9211_s0 + $0x1e0] sm:$0xff]   ;;  %v782_v19 = vsel %vm9512_vm0, %v9362_v6, 0.0 }
 0x13a   :  { %9612 = vst [vmem:[#allocation98_spill] sm:$0xff] %v5201_v44  ;;  %v9364_v32 = vunpack.c.h.bf16 %v5222_v25  ;;  %v9367_v44 = vunpack.c.l.bf16 %v5222_v25 }
 0x13b   :  { %9613 = vst [vmem:[#allocation99_spill] sm:$0xff] %v5203_v39 }
 0x13d   :  { %774 = vadd.xlane.f32.xlu2 %v773_v41  ;;  %771 = vadd.xlane.f32.xlu1 %v770_v34  ;;  %v779_v41 = vsel %vm9512_vm0, %v9364_v32, 0.0  ;;  %v776_v34 = vsel %vm9512_vm0, %v9367_v44, 0.0 }
 0x13e   :  { %768 = vadd.xlane.f32.xlu0 %v767_v24  ;;  %v5245_v24 = vld [vmem:[%s9211_s0 + $0x1f0] sm:$0xff]  }
 0x13f   :  { %9618 = vst [vmem:[#allocation104_spill] sm:$0xff] %v5245_v24  ;;  %v9369_v6 = vunpack.c.l.bf16 %v5245_v24 }
 0x140   :  { %v5227_v9 = vpop.xlane.xlu2 %648  ;;  %v5229_v39 = vpop.xlane.xlu1 %645 }
 0x141   :  { %9615 = vst [vmem:[#allocation101_spill] sm:$0xff] %v5227_v9  ;;  %v5231_v18 = vpop.xlane.xlu0 %642 }
 0x142   :  { %9616 = vst [vmem:[#allocation102_spill] sm:$0xff] %v5229_v39  ;;  %v9368_v39 = vunpack.c.h.bf16 %v5245_v24 }
 0x143   :  { %9617 = vst [vmem:[#allocation103_spill] sm:$0xff] %v5231_v18  ;;  %v9370_v18 = vunpack.c.h.bf16 %v5217_v17 }
 0x144   :  { %v791_v44 = vsel %vm9512_vm0, %v9368_v39, 0.0 }
 0x145   :  { %783 = vadd.xlane.f32.xlu2 %v782_v19  ;;  %780 = vadd.xlane.f32.xlu1 %v779_v41  ;;  %v788_v19 = vsel %vm9512_vm0, %v9369_v6, 0.0  ;;  %v785_v41 = vsel %vm9512_vm0, %v9370_v18, 0.0 }
 0x146   :  { %777 = vadd.xlane.f32.xlu0 %v776_v34  ;;  %v5268_v34 = vld [vmem:[%s9211_s0 + $0x200] sm:$0xff]  }
 0x147   :  { %v9375_v39 = vunpack.c.l.bf16 %v5268_v34 }
 0x148   :  { %v5250_v9 = vpop.xlane.xlu2 %657  ;;  %v5252_v32 = vpop.xlane.xlu1 %654 }
 0x149   :  { %9619 = vst [vmem:[#allocation105_spill] sm:$0xff] %v5250_v9  ;;  %v5254_v62 = vpop.xlane.xlu0 %651  ;;  %v800_v43 = vsel %vm9512_vm0, %v9375_v39, 0.0 }
 0x14a   :  { %9620 = vst [vmem:[#allocation106_spill] sm:$0xff] %v5252_v32  ;;  %v5273_v32 = vld [vmem:[%s9211_s0 + $0x1f8] sm:$0xff]  }
 0x14b   :  { %9621 = vst [vmem:[#allocation107_spill] sm:$0xff] %v5254_v62  ;;  %v9376_v6 = vunpack.c.h.bf16 %v5273_v32  ;;  %v9379_v62 = vunpack.c.l.bf16 %v5273_v32 }
 0x14c   :  { %9622 = vst [vmem:[#allocation108_spill] sm:$0xff] %v5273_v32 }
 0x14d   :  { %792 = vadd.xlane.f32.xlu2 %v791_v44  ;;  %789 = vadd.xlane.f32.xlu1 %v788_v19  ;;  %v797_v44 = vsel %vm9512_vm0, %v9376_v6, 0.0  ;;  %v794_v19 = vsel %vm9512_vm0, %v9379_v62, 0.0 }
 0x14e   :  { %786 = vadd.xlane.f32.xlu0 %v785_v41  ;;  %v5296_v41 = vld [vmem:[%s9211_s0 + $0x208] sm:$0xff]  }
 0x14f   :  { %v9381_v39 = vunpack.c.l.bf16 %v5296_v41 }
 0x150   :  { %v5278_v18 = vpop.xlane.xlu2 %666  ;;  %v5280_v9 = vpop.xlane.xlu1 %663 }
 0x151   :  { %9623 = vst [vmem:[#allocation109_spill] sm:$0xff] %v5278_v18  ;;  %v5282_v35 = vpop.xlane.xlu0 %660  ;;  %v9380_v18 = vunpack.c.h.bf16 %v5296_v41 }
 0x152   :  { %9624 = vst [vmem:[#allocation110_spill] sm:$0xff] %v5280_v9  ;;  %v9382_v9 = vunpack.c.h.bf16 %v5268_v34 }
 0x153   :  { %9625 = vst [vmem:[#allocation111_spill] sm:$0xff] %v5282_v35  ;;  %v809_v62 = vsel %vm9512_vm0, %v9380_v18, 0.0 }
 0x155   :  { %801 = vadd.xlane.f32.xlu2 %v800_v43  ;;  %798 = vadd.xlane.f32.xlu1 %v797_v44  ;;  %v806_v43 = vsel %vm9512_vm0, %v9381_v39, 0.0  ;;  %v803_v44 = vsel %vm9512_vm0, %v9382_v9, 0.0 }
 0x156   :  { %795 = vadd.xlane.f32.xlu0 %v794_v19  ;;  %v5319_v19 = vld [vmem:[%s9211_s0 + $0x218] sm:$0xff]  }
 0x157   :  { %v9387_v18 = vunpack.c.l.bf16 %v5319_v19 }
 0x158   :  { %v5301_v35 = vpop.xlane.xlu2 %675  ;;  %v5303_v6 = vpop.xlane.xlu1 %672 }
 0x159   :  { %9626 = vst [vmem:[#allocation112_spill] sm:$0xff] %v5301_v35  ;;  %v5305_v32 = vpop.xlane.xlu0 %669  ;;  %v5324_v35 = vld [vmem:[%s9211_s0 + $0x210] sm:$0xff]   ;;  %v818_v63 = vsel %vm9512_vm0, %v9387_v18, 0.0 }
 0x15a   :  { %9627 = vst [vmem:[#allocation113_spill] sm:$0xff] %v5303_v6  ;;  %v9388_v39 = vunpack.c.h.bf16 %v5324_v35  ;;  %v9391_v6 = vunpack.c.l.bf16 %v5324_v35 }
 0x15b   :  { %9628 = vst [vmem:[#allocation114_spill] sm:$0xff] %v5305_v32 }
 0x15d   :  { %810 = vadd.xlane.f32.xlu2 %v809_v62  ;;  %807 = vadd.xlane.f32.xlu1 %v806_v43  ;;  %v815_v62 = vsel %vm9512_vm0, %v9388_v39, 0.0  ;;  %v812_v43 = vsel %vm9512_vm0, %v9391_v6, 0.0 }
 0x15e   :  { %804 = vadd.xlane.f32.xlu0 %v803_v44  ;;  %v5347_v44 = vld [vmem:[%s9211_s0 + $0x220] sm:$0xff]  }
 0x15f   :  { %v9393_v18 = vunpack.c.l.bf16 %v5347_v44 }
 0x160   :  { %v5329_v9 = vpop.xlane.xlu2 %684  ;;  %v5331_v32 = vpop.xlane.xlu1 %681 }
 0x161   :  { %9629 = vst [vmem:[#allocation115_spill] sm:$0xff] %v5329_v9  ;;  %v5333_v24 = vpop.xlane.xlu0 %678  ;;  %v9392_v9 = vunpack.c.h.bf16 %v5347_v44 }
 0x162   :  { %9630 = vst [vmem:[#allocation116_spill] sm:$0xff] %v5331_v32  ;;  %v9394_v32 = vunpack.c.h.bf16 %v5319_v19 }
 0x163   :  { %9631 = vst [vmem:[#allocation117_spill] sm:$0xff] %v5333_v24  ;;  %v827_v6 = vsel %vm9512_vm0, %v9392_v9, 0.0 }
 0x165   :  { %819 = vadd.xlane.f32.xlu2 %v818_v63  ;;  %816 = vadd.xlane.f32.xlu1 %v815_v62  ;;  %v824_v63 = vsel %vm9512_vm0, %v9393_v18, 0.0  ;;  %v821_v62 = vsel %vm9512_vm0, %v9394_v32, 0.0 }
 0x166   :  { %813 = vadd.xlane.f32.xlu0 %v812_v43  ;;  %v5370_v43 = vld [vmem:[%s9211_s0 + $0x230] sm:$0xff]  }
 0x167   :  { %v9399_v9 = vunpack.c.l.bf16 %v5370_v43 }
 0x168   :  { %v5352_v24 = vpop.xlane.xlu2 %693  ;;  %v5354_v39 = vpop.xlane.xlu1 %690 }
 0x169   :  { %9632 = vst [vmem:[#allocation118_spill] sm:$0xff] %v5352_v24  ;;  %v5356_v48 = vpop.xlane.xlu0 %687  ;;  %v5375_v24 = vld [vmem:[%s9211_s0 + $0x228] sm:$0xff]   ;;  %v836_v13 = vsel %vm9512_vm0, %v9399_v9, 0.0 }
 0x16a   :  { %9633 = vst [vmem:[#allocation119_spill] sm:$0xff] %v5354_v39  ;;  %v9400_v18 = vunpack.c.h.bf16 %v5375_v24  ;;  %v9403_v39 = vunpack.c.l.bf16 %v5375_v24 }
 0x16b   :  { %9634 = vst [vmem:[#allocation120_spill] sm:$0xff] %v5356_v48 }
 0x16d   :  { %828 = vadd.xlane.f32.xlu2 %v827_v6  ;;  %825 = vadd.xlane.f32.xlu1 %v824_v63  ;;  %v833_v6 = vsel %vm9512_vm0, %v9400_v18, 0.0  ;;  %v830_v63 = vsel %vm9512_vm0, %v9403_v39, 0.0 }
 0x16e   :  { %822 = vadd.xlane.f32.xlu0 %v821_v62  ;;  %v5398_v62 = vld [vmem:[%s9211_s0 + $0x238] sm:$0xff]  }
 0x16f   :  { %9638 = vst [vmem:[#allocation124_spill] sm:$0xff] %v5398_v62  ;;  %v9405_v9 = vunpack.c.l.bf16 %v5398_v62 }
 0x170   :  { %v5380_v32 = vpop.xlane.xlu2 %702  ;;  %v5382_v48 = vpop.xlane.xlu1 %699 }
 0x171   :  { %9635 = vst [vmem:[#allocation121_spill] sm:$0xff] %v5380_v32  ;;  %v5384_v56 = vpop.xlane.xlu0 %696  ;;  %v9404_v32 = vunpack.c.h.bf16 %v5398_v62 }
 0x172   :  { %9636 = vst [vmem:[#allocation122_spill] sm:$0xff] %v5382_v48  ;;  %v9406_v48 = vunpack.c.h.bf16 %v5370_v43 }
 0x173   :  { %9637 = vst [vmem:[#allocation123_spill] sm:$0xff] %v5384_v56  ;;  %v845_v39 = vsel %vm9512_vm0, %v9404_v32, 0.0 }
 0x175   :  { %837 = vadd.xlane.f32.xlu2 %v836_v13  ;;  %834 = vadd.xlane.f32.xlu1 %v833_v6  ;;  %v842_v13 = vsel %vm9512_vm0, %v9405_v9, 0.0  ;;  %v839_v6 = vsel %vm9512_vm0, %v9406_v48, 0.0 }
 0x176   :  { %831 = vadd.xlane.f32.xlu0 %v830_v63  ;;  %v5421_v63 = vld [vmem:[%s9211_s0 + $0x248] sm:$0xff]  }
 0x177   :  { %v9412_v32 = vunpack.c.l.bf16 %v5421_v63 }
 0x178   :  { %v5403_v56 = vpop.xlane.xlu2 %711  ;;  %v5405_v18 = vpop.xlane.xlu1 %708 }
 0x179   :  { %9639 = vst [vmem:[#allocation125_spill] sm:$0xff] %v5403_v56  ;;  %v5407_v8 = vpop.xlane.xlu0 %705  ;;  %v5426_v56 = vld [vmem:[%s9211_s0 + $0x240] sm:$0xff]   ;;  %v854_v62 = vsel %vm9512_vm0, %v9412_v32, 0.0 }
 0x17a   :  { %9640 = vst [vmem:[#allocation126_spill] sm:$0xff] %v5405_v18  ;;  %v9413_v9 = vunpack.c.h.bf16 %v5426_v56 }
 0x17b   :  { %9641 = vst [vmem:[#allocation127_spill] sm:$0xff] %v5407_v8  ;;  %v9416_v8 = vunpack.c.l.bf16 %v5426_v56 }
 0x17d   :  { %846 = vadd.xlane.f32.xlu2 %v845_v39  ;;  %843 = vadd.xlane.f32.xlu1 %v842_v13  ;;  %v851_v39 = vsel %vm9512_vm0, %v9413_v9, 0.0  ;;  %v848_v13 = vsel %vm9512_vm0, %v9416_v8, 0.0 }
 0x17e   :  { %840 = vadd.xlane.f32.xlu0 %v839_v6  ;;  %v5449_v6 = vld [vmem:[%s9211_s0 + $0x250] sm:$0xff]  }
 0x17f   :  { %v9418_v32 = vunpack.c.l.bf16 %v5449_v6 }
 0x180   :  { %v5431_v48 = vpop.xlane.xlu2 %720  ;;  %v5433_v18 = vpop.xlane.xlu1 %717 }
 0x181   :  { %9642 = vst [vmem:[#allocation128_spill] sm:$0xff] %v5431_v48  ;;  %v5435_v17 = vpop.xlane.xlu0 %714  ;;  %v9417_v48 = vunpack.c.h.bf16 %v5449_v6 }
 0x182   :  { %9643 = vst [vmem:[#allocation129_spill] sm:$0xff] %v5433_v18  ;;  %v9419_v18 = vunpack.c.h.bf16 %v5421_v63 }
 0x183   :  { %9644 = vst [vmem:[#allocation130_spill] sm:$0xff] %v5435_v17  ;;  %v863_v8 = vsel %vm9512_vm0, %v9417_v48, 0.0 }
 0x185   :  { %855 = vadd.xlane.f32.xlu2 %v854_v62  ;;  %852 = vadd.xlane.f32.xlu1 %v851_v39  ;;  %v860_v62 = vsel %vm9512_vm0, %v9418_v32, 0.0  ;;  %v857_v39 = vsel %vm9512_vm0, %v9419_v18, 0.0 }
 0x186   :  { %849 = vadd.xlane.f32.xlu0 %v848_v13  ;;  %v5472_v13 = vld [vmem:[%s9211_s0 + $0x260] sm:$0xff]  }
 0x187   :  { %v9425_v48 = vunpack.c.l.bf16 %v5472_v13 }
 0x188   :  { %v5454_v17 = vpop.xlane.xlu2 %729  ;;  %v5456_v9 = vpop.xlane.xlu1 %726 }
 0x189   :  { %9645 = vst [vmem:[#allocation131_spill] sm:$0xff] %v5454_v17  ;;  %v5458_v26 = vpop.xlane.xlu0 %723  ;;  %v5477_v17 = vld [vmem:[%s9211_s0 + $0x258] sm:$0xff]   ;;  %v872_v11 = vsel %vm9512_vm0, %v9425_v48, 0.0 }
 0x18a   :  { %9646 = vst [vmem:[#allocation132_spill] sm:$0xff] %v5456_v9  ;;  %v9426_v32 = vunpack.c.h.bf16 %v5477_v17  ;;  %v9429_v9 = vunpack.c.l.bf16 %v5477_v17 }
 0x18b   :  { %9647 = vst [vmem:[#allocation133_spill] sm:$0xff] %v5458_v26 }
 0x18d   :  { %864 = vadd.xlane.f32.xlu2 %v863_v8  ;;  %861 = vadd.xlane.f32.xlu1 %v860_v62  ;;  %v869_v8 = vsel %vm9512_vm0, %v9426_v32, 0.0  ;;  %v866_v62 = vsel %vm9512_vm0, %v9429_v9, 0.0 }
 0x18e   :  { %858 = vadd.xlane.f32.xlu0 %v857_v39  ;;  %v5500_v39 = vld [vmem:[%s9211_s0 + $0x268] sm:$0xff]  }
 0x18f   :  { %9651 = vst [vmem:[#allocation137_spill] sm:$0xff] %v5500_v39  ;;  %v9431_v48 = vunpack.c.l.bf16 %v5500_v39 }
 0x190   :  { %v5482_v18 = vpop.xlane.xlu2 %738  ;;  %v5484_v26 = vpop.xlane.xlu1 %735 }
 0x191   :  { %9648 = vst [vmem:[#allocation134_spill] sm:$0xff] %v5482_v18  ;;  %v5486_v40 = vpop.xlane.xlu0 %732  ;;  %v9430_v18 = vunpack.c.h.bf16 %v5500_v39 }
 0x192   :  { %9649 = vst [vmem:[#allocation135_spill] sm:$0xff] %v5484_v26  ;;  %v9432_v26 = vunpack.c.h.bf16 %v5472_v13 }
 0x193   :  { %9650 = vst [vmem:[#allocation136_spill] sm:$0xff] %v5486_v40  ;;  %v881_v9 = vsel %vm9512_vm0, %v9430_v18, 0.0 }
 0x195   :  { %873 = vadd.xlane.f32.xlu2 %v872_v11  ;;  %870 = vadd.xlane.f32.xlu1 %v869_v8  ;;  %v878_v11 = vsel %vm9512_vm0, %v9431_v48, 0.0  ;;  %v875_v8 = vsel %vm9512_vm0, %v9432_v26, 0.0 }
 0x196   :  { %867 = vadd.xlane.f32.xlu0 %v866_v62  ;;  %v5523_v62 = vld [vmem:[%s9211_s0 + $0x278] sm:$0xff]  }
 0x197   :  { %9655 = vst [vmem:[#allocation141_spill] sm:$0xff] %v5523_v62  ;;  %v9437_v18 = vunpack.c.l.bf16 %v5523_v62 }
 0x198   :  { %v5505_v40 = vpop.xlane.xlu2 %747  ;;  %v5507_v32 = vpop.xlane.xlu1 %744 }
 0x199   :  { %9652 = vst [vmem:[#allocation138_spill] sm:$0xff] %v5505_v40  ;;  %v5509_v20 = vpop.xlane.xlu0 %741  ;;  %v5528_v40 = vld [vmem:[%s9211_s0 + $0x270] sm:$0xff]   ;;  %v890_v39 = vsel %vm9512_vm0, %v9437_v18, 0.0 }
 0x19a   :  { %9653 = vst [vmem:[#allocation139_spill] sm:$0xff] %v5507_v32  ;;  %v9439_v48 = vunpack.c.h.bf16 %v5528_v40  ;;  %v9442_v32 = vunpack.c.l.bf16 %v5528_v40 }
 0x19b   :  { %9654 = vst [vmem:[#allocation140_spill] sm:$0xff] %v5509_v20 }
 0x19c   :  { %9656 = vst [vmem:[#allocation142_spill] sm:$0xff] %v5528_v40 }
 0x19d   :  { %882 = vadd.xlane.f32.xlu2 %v881_v9  ;;  %879 = vadd.xlane.f32.xlu1 %v878_v11  ;;  %v887_v9 = vsel %vm9512_vm0, %v9439_v48, 0.0  ;;  %v884_v11 = vsel %vm9512_vm0, %v9442_v32, 0.0 }
 0x19e   :  { %876 = vadd.xlane.f32.xlu0 %v875_v8  ;;  %v5551_v8 = vld [vmem:[%s9211_s0 + $0x280] sm:$0xff]  }
 0x19f   :  { %v9444_v18 = vunpack.c.l.bf16 %v5551_v8 }
 0x1a0   :  { %v5533_v26 = vpop.xlane.xlu2 %756  ;;  %v5535_v20 = vpop.xlane.xlu1 %753 }
 0x1a1   :  { %9657 = vst [vmem:[#allocation143_spill] sm:$0xff] %v5533_v26  ;;  %v5537_v33 = vpop.xlane.xlu0 %750 }
 0x1a2   :  { %9658 = vst [vmem:[#allocation144_spill] sm:$0xff] %v5535_v20  ;;  %v9445_v20 = vunpack.c.h.bf16 %v5523_v62 }
 0x1a3   :  { %9659 = vst [vmem:[#allocation145_spill] sm:$0xff] %v5537_v33  ;;  %v9443_v33 = vunpack.c.h.bf16 %v5551_v8 }
 0x1a5   :  { %891 = vadd.xlane.f32.xlu2 %v890_v39  ;;  %888 = vadd.xlane.f32.xlu1 %v887_v9  ;;  %v899_v32 = vsel %vm9512_vm0, %v9443_v33, 0.0  ;;  %v896_v39 = vsel %vm9512_vm0, %v9444_v18, 0.0  ;;  %v893_v9 = vsel %vm9512_vm0, %v9445_v20, 0.0 }
 0x1a6   :  { %885 = vadd.xlane.f32.xlu0 %v884_v11  ;;  %v5574_v11 = vld [vmem:[%s9211_s0 + $0x290] sm:$0xff]  }
 0x1a7   :  { %9663 = vst [vmem:[#allocation149_spill] sm:$0xff] %v5574_v11  ;;  %v9450_v33 = vunpack.c.l.bf16 %v5574_v11 }
 0x1a8   :  { %v5556_v26 = vpop.xlane.xlu2 %765  ;;  %v5558_v48 = vpop.xlane.xlu1 %762 }
 0x1a9   :  { %9660 = vst [vmem:[#allocation146_spill] sm:$0xff] %v5556_v26  ;;  %v5560_v40 = vpop.xlane.xlu0 %759  ;;  %v5579_v26 = vld [vmem:[%s9211_s0 + $0x288] sm:$0xff]   ;;  %v908_v4 = vsel %vm9512_vm0, %v9450_v33, 0.0 }
 0x1aa   :  { %9661 = vst [vmem:[#allocation147_spill] sm:$0xff] %v5558_v48  ;;  %v9451_v18 = vunpack.c.h.bf16 %v5579_v26  ;;  %v9454_v48 = vunpack.c.l.bf16 %v5579_v26 }
 0x1ab   :  { %9662 = vst [vmem:[#allocation148_spill] sm:$0xff] %v5560_v40 }
 0x1ac   :  { %9664 = vst [vmem:[#allocation150_spill] sm:$0xff] %v5579_v26 }
 0x1ad   :  { %900 = vadd.xlane.f32.xlu2 %v899_v32  ;;  %897 = vadd.xlane.f32.xlu1 %v896_v39  ;;  %v905_v32 = vsel %vm9512_vm0, %v9451_v18, 0.0  ;;  %v902_v39 = vsel %vm9512_vm0, %v9454_v48, 0.0 }
 0x1ae   :  { %894 = vadd.xlane.f32.xlu0 %v893_v9  ;;  %v5602_v9 = vld [vmem:[%s9211_s0 + $0x298] sm:$0xff]  }
 0x1af   :  { %9668 = vst [vmem:[#allocation154_spill] sm:$0xff] %v5602_v9  ;;  %v9456_v33 = vunpack.c.l.bf16 %v5602_v9 }
 0x1b0   :  { %v5584_v20 = vpop.xlane.xlu2 %774  ;;  %v5586_v40 = vpop.xlane.xlu1 %771 }
 0x1b1   :  { %9665 = vst [vmem:[#allocation151_spill] sm:$0xff] %v5584_v20  ;;  %v5588_v62 = vpop.xlane.xlu0 %768  ;;  %v9455_v20 = vunpack.c.h.bf16 %v5602_v9 }
 0x1b2   :  { %9666 = vst [vmem:[#allocation152_spill] sm:$0xff] %v5586_v40  ;;  %v9457_v40 = vunpack.c.h.bf16 %v5574_v11 }
 0x1b3   :  { %9667 = vst [vmem:[#allocation153_spill] sm:$0xff] %v5588_v62  ;;  %v917_v48 = vsel %vm9512_vm0, %v9455_v20, 0.0 }
 0x1b5   :  { %909 = vadd.xlane.f32.xlu2 %v908_v4  ;;  %906 = vadd.xlane.f32.xlu1 %v905_v32  ;;  %v914_v4 = vsel %vm9512_vm0, %v9456_v33, 0.0  ;;  %v911_v32 = vsel %vm9512_vm0, %v9457_v40, 0.0 }
 0x1b6   :  { %903 = vadd.xlane.f32.xlu0 %v902_v39  ;;  %v5625_v39 = vld [vmem:[%s9211_s0 + $0x2a8] sm:$0xff]  }
 0x1b7   :  { %9672 = vst [vmem:[#allocation158_spill] sm:$0xff] %v5625_v39  ;;  %v9462_v20 = vunpack.c.l.bf16 %v5625_v39 }
 0x1b8   :  { %v5607_v62 = vpop.xlane.xlu2 %783  ;;  %v5609_v18 = vpop.xlane.xlu1 %780 }
 0x1b9   :  { %9669 = vst [vmem:[#allocation155_spill] sm:$0xff] %v5607_v62  ;;  %v5611_v26 = vpop.xlane.xlu0 %777  ;;  %v5630_v62 = vld [vmem:[%s9211_s0 + $0x2a0] sm:$0xff]   ;;  %v926_v11 = vsel %vm9512_vm0, %v9462_v20, 0.0 }
 0x1ba   :  { %9670 = vst [vmem:[#allocation156_spill] sm:$0xff] %v5609_v18  ;;  %v9463_v33 = vunpack.c.h.bf16 %v5630_v62  ;;  %v9466_v18 = vunpack.c.l.bf16 %v5630_v62 }
 0x1bb   :  { %9671 = vst [vmem:[#allocation157_spill] sm:$0xff] %v5611_v26 }
 0x1bc   :  { %9673 = vst [vmem:[#allocation159_spill] sm:$0xff] %v5630_v62 }
 0x1bd   :  { %918 = vadd.xlane.f32.xlu2 %v917_v48  ;;  %915 = vadd.xlane.f32.xlu1 %v914_v4  ;;  %v923_v48 = vsel %vm9512_vm0, %v9463_v33, 0.0  ;;  %v920_v4 = vsel %vm9512_vm0, %v9466_v18, 0.0 }
 0x1be   :  { %912 = vadd.xlane.f32.xlu0 %v911_v32  ;;  %v5653_v32 = vld [vmem:[%s9211_s0 + $0x2b0] sm:$0xff]  }
 0x1bf   :  { %9677 = vst [vmem:[#allocation163_spill] sm:$0xff] %v5653_v32  ;;  %v9468_v20 = vunpack.c.l.bf16 %v5653_v32 }
 0x1c0   :  { %v5635_v40 = vpop.xlane.xlu2 %792  ;;  %v5637_v26 = vpop.xlane.xlu1 %789 }
 0x1c1   :  { %9674 = vst [vmem:[#allocation160_spill] sm:$0xff] %v5635_v40  ;;  %v5639_v9 = vpop.xlane.xlu0 %786  ;;  %v9467_v40 = vunpack.c.h.bf16 %v5653_v32 }
 0x1c2   :  { %9675 = vst [vmem:[#allocation161_spill] sm:$0xff] %v5637_v26  ;;  %v9469_v26 = vunpack.c.h.bf16 %v5625_v39 }
 0x1c3   :  { %9676 = vst [vmem:[#allocation162_spill] sm:$0xff] %v5639_v9  ;;  %v935_v18 = vsel %vm9512_vm0, %v9467_v40, 0.0 }
 0x1c5   :  { %927 = vadd.xlane.f32.xlu2 %v926_v11  ;;  %924 = vadd.xlane.f32.xlu1 %v923_v48  ;;  %v932_v11 = vsel %vm9512_vm0, %v9468_v20, 0.0  ;;  %v929_v48 = vsel %vm9512_vm0, %v9469_v26, 0.0 }
 0x1c6   :  { %921 = vadd.xlane.f32.xlu0 %v920_v4  ;;  %v5676_v4 = vld [vmem:[%s9211_s0 + $0x2c0] sm:$0xff]  }
 0x1c7   :  { %9681 = vst [vmem:[#allocation167_spill] sm:$0xff] %v5676_v4  ;;  %v9474_v40 = vunpack.c.l.bf16 %v5676_v4 }
 0x1c8   :  { %v5658_v9 = vpop.xlane.xlu2 %801  ;;  %v5660_v33 = vpop.xlane.xlu1 %798 }
 0x1c9   :  { %9678 = vst [vmem:[#allocation164_spill] sm:$0xff] %v5658_v9  ;;  %v5662_v62 = vpop.xlane.xlu0 %795  ;;  %v944_v39 = vsel %vm9512_vm0, %v9474_v40, 0.0 }
 0x1ca   :  { %9679 = vst [vmem:[#allocation165_spill] sm:$0xff] %v5660_v33  ;;  %v5681_v33 = vld [vmem:[%s9211_s0 + $0x2b8] sm:$0xff]  }
 0x1cb   :  { %9680 = vst [vmem:[#allocation166_spill] sm:$0xff] %v5662_v62  ;;  %v9475_v20 = vunpack.c.h.bf16 %v5681_v33  ;;  %v9478_v62 = vunpack.c.l.bf16 %v5681_v33 }
 0x1cc   :  { %9682 = vst [vmem:[#allocation168_spill] sm:$0xff] %v5681_v33 }
 0x1cd   :  { %936 = vadd.xlane.f32.xlu2 %v935_v18  ;;  %933 = vadd.xlane.f32.xlu1 %v932_v11  ;;  %v941_v18 = vsel %vm9512_vm0, %v9475_v20, 0.0  ;;  %v938_v11 = vsel %vm9512_vm0, %v9478_v62, 0.0 }
 0x1ce   :  { %930 = vadd.xlane.f32.xlu0 %v929_v48  ;;  %v5704_v48 = vld [vmem:[%s9211_s0 + $0x2c8] sm:$0xff]  }
 0x1cf   :  { %9686 = vst [vmem:[#allocation172_spill] sm:$0xff] %v5704_v48  ;;  %v9480_v40 = vunpack.c.l.bf16 %v5704_v48 }
 0x1d0   :  { %v5686_v26 = vpop.xlane.xlu2 %810  ;;  %v5688_v9 = vpop.xlane.xlu1 %807 }
 0x1d1   :  { %9683 = vst [vmem:[#allocation169_spill] sm:$0xff] %v5686_v26  ;;  %v5690_v32 = vpop.xlane.xlu0 %804  ;;  %v9479_v26 = vunpack.c.h.bf16 %v5704_v48 }
 0x1d2   :  { %9684 = vst [vmem:[#allocation170_spill] sm:$0xff] %v5688_v9  ;;  %v9481_v9 = vunpack.c.h.bf16 %v5676_v4 }
 0x1d3   :  { %9685 = vst [vmem:[#allocation171_spill] sm:$0xff] %v5690_v32  ;;  %v953_v62 = vsel %vm9512_vm0, %v9479_v26, 0.0 }
 0x1d5   :  { %945 = vadd.xlane.f32.xlu2 %v944_v39  ;;  %942 = vadd.xlane.f32.xlu1 %v941_v18  ;;  %v950_v39 = vsel %vm9512_vm0, %v9480_v40, 0.0  ;;  %v947_v18 = vsel %vm9512_vm0, %v9481_v9, 0.0 }
 0x1d6   :  { %939 = vadd.xlane.f32.xlu0 %v938_v11  ;;  %v5727_v11 = vld [vmem:[%s9211_s0 + $0x2d8] sm:$0xff]  }
 0x1d7   :  { %9690 = vst [vmem:[#allocation176_spill] sm:$0xff] %v5727_v11  ;;  %v9486_v26 = vunpack.c.l.bf16 %v5727_v11 }
 0x1d8   :  { %v5709_v32 = vpop.xlane.xlu2 %819  ;;  %v5711_v20 = vpop.xlane.xlu1 %816 }
 0x1d9   :  { %9687 = vst [vmem:[#allocation173_spill] sm:$0xff] %v5709_v32  ;;  %v5713_v33 = vpop.xlane.xlu0 %813  ;;  %v5732_v32 = vld [vmem:[%s9211_s0 + $0x2d0] sm:$0xff]   ;;  %v962_v4 = vsel %vm9512_vm0, %v9486_v26, 0.0 }
 0x1da   :  { %9688 = vst [vmem:[#allocation174_spill] sm:$0xff] %v5711_v20  ;;  %v9487_v40 = vunpack.c.h.bf16 %v5732_v32  ;;  %v9490_v20 = vunpack.c.l.bf16 %v5732_v32 }
 0x1db   :  { %9689 = vst [vmem:[#allocation175_spill] sm:$0xff] %v5713_v33 }
 0x1dc   :  { %9691 = vst [vmem:[#allocation177_spill] sm:$0xff] %v5732_v32 }
 0x1dd   :  { %954 = vadd.xlane.f32.xlu2 %v953_v62  ;;  %951 = vadd.xlane.f32.xlu1 %v950_v39  ;;  %v959_v62 = vsel %vm9512_vm0, %v9487_v40, 0.0  ;;  %v956_v39 = vsel %vm9512_vm0, %v9490_v20, 0.0 }
 0x1de   :  { %948 = vadd.xlane.f32.xlu0 %v947_v18  ;;  %v5755_v18 = vld [vmem:[%s9211_s0 + $0x2e0] sm:$0xff]  }
 0x1df   :  { %9695 = vst [vmem:[#allocation181_spill] sm:$0xff] %v5755_v18  ;;  %v9492_v26 = vunpack.c.l.bf16 %v5755_v18 }
 0x1e0   :  { %v5737_v9 = vpop.xlane.xlu2 %828  ;;  %v5739_v33 = vpop.xlane.xlu1 %825 }
 0x1e1   :  { %9692 = vst [vmem:[#allocation178_spill] sm:$0xff] %v5737_v9  ;;  %v5741_v48 = vpop.xlane.xlu0 %822  ;;  %v9491_v9 = vunpack.c.h.bf16 %v5755_v18 }
 0x1e2   :  { %9693 = vst [vmem:[#allocation179_spill] sm:$0xff] %v5739_v33  ;;  %v9493_v33 = vunpack.c.h.bf16 %v5727_v11 }
 0x1e3   :  { %9694 = vst [vmem:[#allocation180_spill] sm:$0xff] %v5741_v48  ;;  %v971_v20 = vsel %vm9512_vm0, %v9491_v9, 0.0 }
 0x1e5   :  { %963 = vadd.xlane.f32.xlu2 %v962_v4  ;;  %960 = vadd.xlane.f32.xlu1 %v959_v62  ;;  %v968_v4 = vsel %vm9512_vm0, %v9492_v26, 0.0  ;;  %v965_v62 = vsel %vm9512_vm0, %v9493_v33, 0.0 }
 0x1e6   :  { %957 = vadd.xlane.f32.xlu0 %v956_v39  ;;  %v5778_v39 = vld [vmem:[%s9211_s0 + $0x2f0] sm:$0xff]  }
 0x1e7   :  { %9699 = vst [vmem:[#allocation185_spill] sm:$0xff] %v5778_v39  ;;  %v9498_v9 = vunpack.c.l.bf16 %v5778_v39 }
 0x1e8   :  { %v5760_v48 = vpop.xlane.xlu2 %837  ;;  %v5762_v40 = vpop.xlane.xlu1 %834 }
 0x1e9   :  { %9696 = vst [vmem:[#allocation182_spill] sm:$0xff] %v5760_v48  ;;  %v5764_v32 = vpop.xlane.xlu0 %831  ;;  %v5783_v48 = vld [vmem:[%s9211_s0 + $0x2e8] sm:$0xff]   ;;  %v980_v11 = vsel %vm9512_vm0, %v9498_v9, 0.0 }
 0x1ea   :  { %9697 = vst [vmem:[#allocation183_spill] sm:$0xff] %v5762_v40  ;;  %v9499_v26 = vunpack.c.h.bf16 %v5783_v48  ;;  %v9502_v40 = vunpack.c.l.bf16 %v5783_v48 }
 0x1eb   :  { %9698 = vst [vmem:[#allocation184_spill] sm:$0xff] %v5764_v32 }
 0x1ec   :  { %9700 = vst [vmem:[#allocation186_spill] sm:$0xff] %v5783_v48 }
 0x1ed   :  { %972 = vadd.xlane.f32.xlu2 %v971_v20  ;;  %969 = vadd.xlane.f32.xlu1 %v968_v4  ;;  %v977_v20 = vsel %vm9512_vm0, %v9499_v26, 0.0  ;;  %v974_v4 = vsel %vm9512_vm0, %v9502_v40, 0.0 }
 0x1ee   :  { %966 = vadd.xlane.f32.xlu0 %v965_v62  ;;  %v5806_v62 = vld [vmem:[%s9211_s0 + $0x2f8] sm:$0xff]  }
 0x1ef   :  { %9704 = vst [vmem:[#allocation190_spill] sm:$0xff] %v5806_v62  ;;  %v9506_v9 = vunpack.c.l.bf16 %v5806_v62 }
 0x1f0   :  { %v5788_v33 = vpop.xlane.xlu2 %846  ;;  %v5790_v32 = vpop.xlane.xlu1 %843 }
 0x1f1   :  { %9701 = vst [vmem:[#allocation187_spill] sm:$0xff] %v5788_v33  ;;  %v5792_v18 = vpop.xlane.xlu0 %840  ;;  %v9503_v33 = vunpack.c.h.bf16 %v5806_v62  ;;  %v9712_v62 = vunpack.c.h.bf16 %v4297_v2 }
 0x1f2   :  { %9702 = vst [vmem:[#allocation188_spill] sm:$0xff] %v5790_v32  ;;  %v9509_v32 = vunpack.c.h.bf16 %v5778_v39  ;;  %v9713_v39 = vunpack.c.l.bf16 %v4297_v2  ;;  %v9719_v2 = vunpack.c.h.bf16 %v4292_v1 }
 0x1f3   :  { %9703 = vst [vmem:[#allocation189_spill] sm:$0xff] %v5792_v18  ;;  %v989_v40 = vsel %vm9512_vm0, %v9503_v33, 0.0 }
 0x1f5   :  { %981 = vadd.xlane.f32.xlu2 %v980_v11  ;;  %978 = vadd.xlane.f32.xlu1 %v977_v20  ;;  %v986_v11 = vsel %vm9512_vm0, %v9506_v9, 0.0  ;;  %v983_v20 = vsel %vm9512_vm0, %v9509_v32, 0.0  ;;  %v995_v9 = vsel %vm9512_vm0, %v9712_v62, -inf }
 0x1f6   :  { %975 = vadd.xlane.f32.xlu0 %v974_v4 }
 0x1f8   :  { %v5811_v18 = vpop.xlane.xlu2 %855  ;;  %v5813_v26 = vpop.xlane.xlu1 %852 }
 0x1f9   :  { %9705 = vst [vmem:[#allocation191_spill] sm:$0xff] %v5811_v18  ;;  %v5815_v48 = vpop.xlane.xlu0 %849 }
 0x1fa   :  { %9706 = vst [vmem:[#allocation192_spill] sm:$0xff] %v5813_v26  ;;  %v9711_v26 = vunpack.c.l.bf16 %v4292_v1  ;;  %v9725_v1 = vunpack.c.l.bf16 %v4331_v16 }
 0x1fb   :  { %9707 = vst [vmem:[#allocation193_spill] sm:$0xff] %v5815_v48 }
 0x1fc   :  { %v998_v33 = vsel %vm9512_vm0, %v9711_v26, -inf }
 0x1fd   :  { %990 = vadd.xlane.f32.xlu2 %v989_v40  ;;  %987 = vadd.xlane.f32.xlu1 %v986_v11  ;;  %v992_v40 = vsel %vm9512_vm0, %v9713_v39, -inf }
 0x1fe   :  { %984 = vadd.xlane.f32.xlu0 %v983_v20 }
 0x200   :  { %v5826_v4 = vpop.xlane.xlu2 %864  ;;  %v5828_v18 = vpop.xlane.xlu1 %861 }
 0x201   :  { %9708 = vst [vmem:[#allocation194_spill] sm:$0xff] %v5826_v4  ;;  %v5830_v48 = vpop.xlane.xlu0 %858  ;;  %v9717_v4 = vunpack.c.h.bf16 %v4287_v0 }
 0x202   :  { %9709 = vst [vmem:[#allocation195_spill] sm:$0xff] %v5828_v18  ;;  %v9718_v18 = vunpack.c.l.bf16 %v4287_v0  ;;  %v9724_v0 = vunpack.c.h.bf16 %v4331_v16  ;;  %v9731_v16 = vunpack.c.h.bf16 %v4326_v15 }
 0x203   :  { %9710 = vst [vmem:[#allocation196_spill] sm:$0xff] %v5830_v48  ;;  %v1007_v26 = vsel %vm9512_vm0, %v9717_v4, -inf  ;;  %v9852_v48 = vunpack.c.h.bf16 %v4656_v42 }
 0x204   :  { %v1004_v62 = vsel %vm9512_vm0, %v9718_v18, -inf  ;;  %v1013_v18 = vsel %vm9512_vm0, %v9724_v0, -inf }
 0x205   :  { %999 = vmax.xlane.f32.xlu2 %v998_v33  ;;  %996 = vmax.xlane.f32.xlu1 %v995_v9  ;;  %v1001_v33 = vsel %vm9512_vm0, %v9719_v2, -inf }
 0x206   :  { %993 = vmax.xlane.f32.xlu0 %v992_v40 }
 0x208   :  { %v5841_v11 = vpop.xlane.xlu2 %873  ;;  %v5843_v20 = vpop.xlane.xlu1 %870 }
 0x209   :  { %9714 = vst [vmem:[#allocation197_spill] sm:$0xff] %v5841_v11  ;;  %v5845_v32 = vpop.xlane.xlu0 %867  ;;  %v9723_v11 = vunpack.c.l.bf16 %v4326_v15  ;;  %v9737_v15 = vunpack.c.l.bf16 %v4370_v31 }
 0x20a   :  { %9715 = vst [vmem:[#allocation198_spill] sm:$0xff] %v5843_v20  ;;  %v9849_v20 = vunpack.c.l.bf16 %v5375_v24 }
 0x20b   :  { %9716 = vst [vmem:[#allocation199_spill] sm:$0xff] %v5845_v32  ;;  %v1016_v4 = vsel %vm9512_vm0, %v9723_v11, -inf  ;;  %v9851_v32 = vunpack.c.l.bf16 %v4735_v36 }
 0x20d   :  { %1008 = vmax.xlane.f32.xlu2 %v1007_v26  ;;  %1005 = vmax.xlane.f32.xlu1 %v1004_v62  ;;  %v1010_v26 = vsel %vm9512_vm0, %v9725_v1, -inf }
 0x20e   :  { %1002 = vmax.xlane.f32.xlu0 %v1001_v33 }
 0x210   :  { %v5856_v9 = vpop.xlane.xlu2 %882  ;;  %v5858_v39 = vpop.xlane.xlu1 %879 }
 0x211   :  { %9720 = vst [vmem:[#allocation200_spill] sm:$0xff] %v5856_v9  ;;  %v5860_v40 = vpop.xlane.xlu0 %876  ;;  %v9729_v9 = vunpack.c.h.bf16 %v4348_v23 }
 0x212   :  { %9721 = vst [vmem:[#allocation201_spill] sm:$0xff] %v5858_v39  ;;  %v9730_v39 = vunpack.c.l.bf16 %v4348_v23  ;;  %v9736_v23 = vunpack.c.h.bf16 %v4370_v31  ;;  %v9743_v31 = vunpack.c.h.bf16 %v4365_v30 }
 0x213   :  { %9722 = vst [vmem:[#allocation202_spill] sm:$0xff] %v5860_v40  ;;  %v1025_v11 = vsel %vm9512_vm0, %v9729_v9, -inf  ;;  %v9848_v40 = vunpack.c.l.bf16 %v5472_v13 }
 0x214   :  { %v1022_v0 = vsel %vm9512_vm0, %v9730_v39, -inf  ;;  %v1031_v39 = vsel %vm9512_vm0, %v9736_v23, -inf }
 0x215   :  { %1017 = vmax.xlane.f32.xlu2 %v1016_v4  ;;  %1014 = vmax.xlane.f32.xlu1 %v1013_v18  ;;  %v1019_v4 = vsel %vm9512_vm0, %v9731_v16, -inf }
 0x216   :  { %1011 = vmax.xlane.f32.xlu0 %v1010_v26 }
 0x218   :  { %v5871_v62 = vpop.xlane.xlu2 %891  ;;  %v5873_v2 = vpop.xlane.xlu1 %888 }
 0x219   :  { %9726 = vst [vmem:[#allocation203_spill] sm:$0xff] %v5871_v62  ;;  %v5875_v33 = vpop.xlane.xlu0 %885  ;;  %v9735_v62 = vunpack.c.l.bf16 %v4365_v30  ;;  %v9749_v30 = vunpack.c.l.bf16 %v4409_v46 }
 0x21a   :  { %9727 = vst [vmem:[#allocation204_spill] sm:$0xff] %v5873_v2  ;;  %v9844_v2 = vunpack.c.l.bf16 %v5194_v3 }
 0x21b   :  { %9728 = vst [vmem:[#allocation205_spill] sm:$0xff] %v5875_v33  ;;  %v1034_v9 = vsel %vm9512_vm0, %v9735_v62, -inf  ;;  %v9847_v33 = vunpack.c.h.bf16 %v4565_v59 }
 0x21d   :  { %1026 = vmax.xlane.f32.xlu2 %v1025_v11  ;;  %1023 = vmax.xlane.f32.xlu1 %v1022_v0  ;;  %v1028_v11 = vsel %vm9512_vm0, %v9737_v15, -inf }
 0x21e   :  { %1020 = vmax.xlane.f32.xlu0 %v1019_v4 }
 0x220   :  { %v5886_v18 = vpop.xlane.xlu2 %900  ;;  %v5888_v1 = vpop.xlane.xlu1 %897 }
 0x221   :  { %9732 = vst [vmem:[#allocation206_spill] sm:$0xff] %v5886_v18  ;;  %v5890_v26 = vpop.xlane.xlu0 %894  ;;  %v9742_v18 = vunpack.c.l.bf16 %v4387_v38 }
 0x222   :  { %9733 = vst [vmem:[#allocation207_spill] sm:$0xff] %v5888_v1  ;;  %v9741_v1 = vunpack.c.h.bf16 %v4387_v38  ;;  %v9748_v38 = vunpack.c.h.bf16 %v4409_v46  ;;  %v9755_v46 = vunpack.c.h.bf16 %v4404_v45 }
 0x223   :  { %9734 = vst [vmem:[#allocation208_spill] sm:$0xff] %v5890_v26  ;;  %v1040_v23 = vsel %vm9512_vm0, %v9742_v18, -inf  ;;  %v9840_v26 = vunpack.c.h.bf16 %v4661_v49 }
 0x224   :  { %v1043_v62 = vsel %vm9512_vm0, %v9741_v1, -inf  ;;  %v1049_v18 = vsel %vm9512_vm0, %v9748_v38, -inf }
 0x225   :  { %1035 = vmax.xlane.f32.xlu2 %v1034_v9  ;;  %1032 = vmax.xlane.f32.xlu1 %v1031_v39  ;;  %v1037_v9 = vsel %vm9512_vm0, %v9743_v31, -inf }
 0x226   :  { %1029 = vmax.xlane.f32.xlu0 %v1028_v11 }
 0x228   :  { %v5901_v0 = vpop.xlane.xlu2 %909  ;;  %v5903_v16 = vpop.xlane.xlu1 %906 }
 0x229   :  { %9738 = vst [vmem:[#allocation209_spill] sm:$0xff] %v5901_v0  ;;  %v5905_v4 = vpop.xlane.xlu0 %903  ;;  %v9747_v0 = vunpack.c.l.bf16 %v4404_v45  ;;  %v9761_v45 = vunpack.c.l.bf16 %v4448_v61 }
 0x22a   :  { %9739 = vst [vmem:[#allocation210_spill] sm:$0xff] %v5903_v16  ;;  %v9837_v16 = vunpack.c.l.bf16 %v5347_v44 }
 0x22b   :  { %9740 = vst [vmem:[#allocation211_spill] sm:$0xff] %v5905_v4  ;;  %v1052_v1 = vsel %vm9512_vm0, %v9747_v0, -inf  ;;  %v9839_v4 = vunpack.c.h.bf16 %v5069_v54 }
 0x22d   :  { %1044 = vmax.xlane.f32.xlu2 %v1043_v62  ;;  %1041 = vmax.xlane.f32.xlu1 %v1040_v23  ;;  %v1046_v62 = vsel %vm9512_vm0, %v9749_v30, -inf }
 0x22e   :  { %1038 = vmax.xlane.f32.xlu0 %v1037_v9 }
 0x230   :  { %v5916_v39 = vpop.xlane.xlu2 %918  ;;  %v5918_v15 = vpop.xlane.xlu1 %915 }
 0x231   :  { %9744 = vst [vmem:[#allocation212_spill] sm:$0xff] %v5916_v39  ;;  %v5920_v11 = vpop.xlane.xlu0 %912  ;;  %v9753_v39 = vunpack.c.h.bf16 %v4426_v53 }
 0x232   :  { %9745 = vst [vmem:[#allocation213_spill] sm:$0xff] %v5918_v15  ;;  %v9754_v15 = vunpack.c.l.bf16 %v4426_v53  ;;  %v9760_v53 = vunpack.c.h.bf16 %v4448_v61  ;;  %v9767_v61 = vunpack.c.l.bf16 %v4482_v29 }
 0x233   :  { %9746 = vst [vmem:[#allocation214_spill] sm:$0xff] %v5920_v11  ;;  %v1061_v0 = vsel %vm9512_vm0, %v9753_v39, -inf  ;;  %v9835_v11 = vunpack.c.h.bf16 %v4543_v7 }
 0x234   :  { %v1058_v38 = vsel %vm9512_vm0, %v9754_v15, -inf  ;;  %v1067_v15 = vsel %vm9512_vm0, %v9760_v53, -inf }
 0x235   :  { %1053 = vmax.xlane.f32.xlu2 %v1052_v1  ;;  %1050 = vmax.xlane.f32.xlu1 %v1049_v18  ;;  %v1055_v1 = vsel %vm9512_vm0, %v9755_v46, -inf }
 0x236   :  { %1047 = vmax.xlane.f32.xlu0 %v1046_v62 }
 0x238   :  { %v5931_v23 = vpop.xlane.xlu2 %927  ;;  %v5933_v31 = vpop.xlane.xlu1 %924 }
 0x239   :  { %9750 = vst [vmem:[#allocation215_spill] sm:$0xff] %v5931_v23  ;;  %v5935_v9 = vpop.xlane.xlu0 %921  ;;  %v9759_v23 = vunpack.c.l.bf16 %v4443_v60 }
 0x23a   :  { %9751 = vst [vmem:[#allocation216_spill] sm:$0xff] %v5933_v31  ;;  %v9778_v31 = vunpack.c.l.bf16 %v4610_v57 }
 0x23b   :  { %9752 = vst [vmem:[#allocation217_spill] sm:$0xff] %v5935_v9  ;;  %v1070_v39 = vsel %vm9512_vm0, %v9759_v23, -inf  ;;  %v9823_v9 = vunpack.c.l.bf16 %v5449_v6 }
 0x23d   :  { %1062 = vmax.xlane.f32.xlu2 %v1061_v0  ;;  %1059 = vmax.xlane.f32.xlu1 %v1058_v38  ;;  %v1064_v0 = vsel %vm9512_vm0, %v9761_v45, -inf }
 0x23e   :  { %1056 = vmax.xlane.f32.xlu0 %v1055_v1 }
 0x240   :  { %v5946_v18 = vpop.xlane.xlu2 %936  ;;  %v5948_v30 = vpop.xlane.xlu1 %933 }
 0x241   :  { %9756 = vst [vmem:[#allocation218_spill] sm:$0xff] %v5946_v18  ;;  %v5950_v62 = vpop.xlane.xlu0 %930  ;;  %v9765_v18 = vunpack.c.l.bf16 %v5268_v34 }
 0x242   :  { %9757 = vst [vmem:[#allocation219_spill] sm:$0xff] %v5948_v30  ;;  %v9766_v30 = vunpack.c.h.bf16 %v4482_v29  ;;  %v9773_v29 = vunpack.c.h.bf16 %v5268_v34  ;;  %v9779_v34 = vunpack.c.h.bf16 %v4504_v51 }
 0x243   :  { %9758 = vst [vmem:[#allocation220_spill] sm:$0xff] %v5950_v62  ;;  %v1376_v23 = vsel %vm9512_vm0, %v9765_v18, -inf  ;;  %v9777_v62 = vunpack.c.h.bf16 %v4610_v57  ;;  %v9784_v57 = vunpack.c.h.bf16 %v5018_v55 }
 0x244   :  { %v1091_v53 = vsel %vm9512_vm0, %v9766_v30, -inf }
 0x245   :  { %1071 = vmax.xlane.f32.xlu2 %v1070_v39  ;;  %1068 = vmax.xlane.f32.xlu1 %v1067_v15  ;;  %v1088_v39 = vsel %vm9512_vm0, %v9767_v61, -inf }
 0x246   :  { %1065 = vmax.xlane.f32.xlu0 %v1064_v0 }
 0x248   :  { %v5961_v38 = vpop.xlane.xlu2 %945  ;;  %v5963_v46 = vpop.xlane.xlu1 %942 }
 0x249   :  { %9762 = vst [vmem:[#allocation221_spill] sm:$0xff] %v5961_v38  ;;  %v5965_v1 = vpop.xlane.xlu0 %939  ;;  %v9832_v38 = vunpack.c.l.bf16 %v5166_v52 }
 0x24a   :  { %9763 = vst [vmem:[#allocation222_spill] sm:$0xff] %v5963_v46  ;;  %v9771_v46 = vunpack.c.l.bf16 %v5296_v41 }
 0x24b   :  { %9764 = vst [vmem:[#allocation223_spill] sm:$0xff] %v5965_v1  ;;  %v9772_v1 = vunpack.c.l.bf16 %v4504_v51  ;;  %v9785_v51 = vunpack.c.l.bf16 %v5018_v55  ;;  %v9791_v55 = vunpack.c.l.bf16 %v5426_v56 }
 0x24c   :  { %v1382_v18 = vsel %vm9512_vm0, %v9771_v46, -inf  ;;  %v1139_v46 = vsel %vm9512_vm0, %v9777_v62, -inf }
 0x24d   :  { %1377 = vmax.xlane.f32.xlu2 %v1376_v23  ;;  %1092 = vmax.xlane.f32.xlu1 %v1091_v53  ;;  %v1094_v30 = vsel %vm9512_vm0, %v9772_v1, -inf  ;;  %v1379_v23 = vsel %vm9512_vm0, %v9773_v29, -inf  ;;  %v1136_v1 = vsel %vm9512_vm0, %v9778_v31, -inf  ;;  %v1283_v31 = vsel %vm9512_vm0, %v9784_v57, -inf }
 0x24e   :  { %1089 = vmax.xlane.f32.xlu0 %v1088_v39 }
 0x250   :  { %v5976_v15 = vpop.xlane.xlu2 %954  ;;  %v5978_v45 = vpop.xlane.xlu1 %951 }
 0x251   :  { %9768 = vst [vmem:[#allocation224_spill] sm:$0xff] %v5976_v15  ;;  %v5980_v0 = vpop.xlane.xlu0 %948  ;;  %v9827_v15 = vunpack.c.h.bf16 %v5041_v10 }
 0x252   :  { %9769 = vst [vmem:[#allocation225_spill] sm:$0xff] %v5978_v45  ;;  %v9828_v45 = vunpack.c.h.bf16 %v4633_v27 }
 0x253   :  { %9770 = vst [vmem:[#allocation226_spill] sm:$0xff] %v5980_v0  ;;  %v9836_v0 = vunpack.c.l.bf16 %v5477_v17 }
 0x255   :  { %1383 = vmax.xlane.f32.xlu2 %v1382_v18  ;;  %1095 = vmax.xlane.f32.xlu1 %v1094_v30  ;;  %v1097_v18 = vsel %vm9512_vm0, %v9779_v34, -inf }
 0x256   :  { %1380 = vmax.xlane.f32.xlu0 %v1379_v23 }
 0x258   :  { %v5991_v53 = vpop.xlane.xlu2 %963  ;;  %v5993_v61 = vpop.xlane.xlu1 %960 }
 0x259   :  { %9774 = vst [vmem:[#allocation227_spill] sm:$0xff] %v5991_v53  ;;  %v5995_v39 = vpop.xlane.xlu0 %957  ;;  %v9783_v53 = vunpack.c.h.bf16 %v5296_v41  ;;  %v9789_v41 = vunpack.c.l.bf16 %v4526_v22 }
 0x25a   :  { %9775 = vst [vmem:[#allocation228_spill] sm:$0xff] %v5993_v61  ;;  %v9822_v61 = vunpack.c.h.bf16 %v4521_v12 }
 0x25b   :  { %9776 = vst [vmem:[#allocation229_spill] sm:$0xff] %v5995_v39  ;;  %v1385_v62 = vsel %vm9512_vm0, %v9783_v53, -inf  ;;  %v1100_v53 = vsel %vm9512_vm0, %v9789_v41, -inf  ;;  %v9824_v39 = vunpack.c.l.bf16 %v5319_v19 }
 0x25d   :  { %1140 = vmax.xlane.f32.xlu2 %v1139_v46  ;;  %1137 = vmax.xlane.f32.xlu1 %v1136_v1  ;;  %v1280_v46 = vsel %vm9512_vm0, %v9785_v51, -inf }
 0x25e   :  { %1098 = vmax.xlane.f32.xlu0 %v1097_v18 }
 0x260   :  { %v6006_v30 = vpop.xlane.xlu2 %972  ;;  %v6008_v29 = vpop.xlane.xlu1 %969 }
 0x261   :  { %9780 = vst [vmem:[#allocation230_spill] sm:$0xff] %v6006_v30  ;;  %v6010_v23 = vpop.xlane.xlu0 %966  ;;  %v9790_v30 = vunpack.c.h.bf16 %v5426_v56  ;;  %v9797_v56 = vunpack.c.l.bf16 %v4605_v14 }
 0x262   :  { %9781 = vst [vmem:[#allocation231_spill] sm:$0xff] %v6008_v29  ;;  %v9810_v29 = vunpack.c.l.bf16 %v4521_v12  ;;  %v9826_v12 = vunpack.c.h.bf16 %v5171_v58 }
 0x263   :  { %9782 = vst [vmem:[#allocation232_spill] sm:$0xff] %v6010_v23  ;;  %v1427_v57 = vsel %vm9512_vm0, %v9790_v30, -inf  ;;  %v9816_v23 = vunpack.c.l.bf16 %v5171_v58  ;;  %v9829_v58 = vunpack.c.l.bf16 %v4543_v7  ;;  %v9838_v7 = vunpack.c.h.bf16 %v5166_v52 }
 0x264   :  { %v9841_v52 = vunpack.c.l.bf16 %v4565_v59  ;;  %v9850_v59 = vunpack.c.h.bf16 %v4735_v36  ;;  %v9854_v36 = vunpack.c.h.bf16 %v5194_v3 }
 0x265   :  { %1386 = vmax.xlane.f32.xlu2 %v1385_v62  ;;  %1284 = vmax.xlane.f32.xlu1 %v1283_v31  ;;  %v1424_v62 = vsel %vm9512_vm0, %v9791_v55, -inf }
 0x266   :  { %1281 = vmax.xlane.f32.xlu0 %v1280_v46 }
 0x268   :  { %v6021_v1 = vpop.xlane.xlu2 %981  ;;  %v6023_v34 = vpop.xlane.xlu1 %978 }
 0x269   :  { %9786 = vst [vmem:[#allocation233_spill] sm:$0xff] %v6021_v1  ;;  %v6025_v18 = vpop.xlane.xlu0 %975  ;;  %v9795_v1 = vunpack.c.l.bf16 %v5324_v35 }
 0x26a   :  { %9787 = vst [vmem:[#allocation234_spill] sm:$0xff] %v6023_v34  ;;  %v9796_v34 = vunpack.c.l.bf16 %v5013_v47 }
 0x26b   :  { %9788 = vst [vmem:[#allocation235_spill] sm:$0xff] %v6025_v18  ;;  %v1388_v41 = vsel %vm9512_vm0, %v9795_v1, -inf  ;;  %v9806_v18 = vunpack.c.h.bf16 %v5013_v47  ;;  %v9812_v47 = vunpack.c.h.bf16 %v5324_v35  ;;  %v9818_v35 = vunpack.c.l.bf16 %v4633_v27 }
 0x26c   :  { %v1286_v30 = vsel %vm9512_vm0, %v9796_v34, -inf  ;;  %v9831_v27 = vunpack.c.h.bf16 %v5319_v19  ;;  %v9834_v19 = vunpack.c.l.bf16 %v4661_v49  ;;  %v9843_v49 = vunpack.c.h.bf16 %v5347_v44 }
 0x26d   :  { %1101 = vmax.xlane.f32.xlu2 %v1100_v53  ;;  %1428 = vmax.xlane.f32.xlu1 %v1427_v57  ;;  %v1142_v53 = vsel %vm9512_vm0, %v9797_v56, -inf  ;;  %v9846_v44 = vunpack.c.l.bf16 %v4656_v42  ;;  %v9855_v42 = vunpack.c.h.bf16 %v5064_v21 }
 0x26e   :  { %1425 = vmax.xlane.f32.xlu0 %v1424_v62 }
 0x270   :  { %v6036_v31 = vpop.xlane.xlu2 %990  ;;  %v6038_v51 = vpop.xlane.xlu1 %987 }
 0x271   :  { %9792 = vst [vmem:[#allocation236_spill] sm:$0xff] %v6036_v31  ;;  %v6040_v46 = vpop.xlane.xlu0 %984  ;;  %v9798_v31 = vunpack.c.h.bf16 %v4605_v14  ;;  %v9804_v14 = vunpack.c.h.bf16 %v5143_v28 }
 0x272   :  { %9793 = vst [vmem:[#allocation237_spill] sm:$0xff] %v6038_v51  ;;  %v9799_v51 = vunpack.c.h.bf16 %v4526_v22  ;;  %v9805_v22 = vunpack.c.l.bf16 %v5143_v28  ;;  %v9811_v28 = vunpack.c.h.bf16 %v5421_v63 }
 0x273   :  { %9794 = vst [vmem:[#allocation238_spill] sm:$0xff] %v6040_v46  ;;  %v1145_v1 = vsel %vm9512_vm0, %v9798_v31, -inf  ;;  %v9800_v46 = vunpack.c.l.bf16 %v5421_v63  ;;  %v1331_v31 = vsel %vm9512_vm0, %v9804_v14, -inf  ;;  %v1106_v14 = vsel %vm9512_vm0, %v9810_v29, -inf }
 0x274   :  { %v1103_v34 = vsel %vm9512_vm0, %v9799_v51, -inf  ;;  %v1328_v51 = vsel %vm9512_vm0, %v9805_v22, -inf  ;;  %v1433_v22 = vsel %vm9512_vm0, %v9811_v28, -inf  ;;  %v1334_v29 = vsel %vm9512_vm0, %v9816_v23, -inf }
 0x275   :  { %1389 = vmax.xlane.f32.xlu2 %v1388_v41  ;;  %1287 = vmax.xlane.f32.xlu1 %v1286_v30  ;;  %v1430_v41 = vsel %vm9512_vm0, %v9800_v46, -inf  ;;  %v1289_v46 = vsel %vm9512_vm0, %v9806_v18, -inf  ;;  %v1391_v18 = vsel %vm9512_vm0, %v9812_v47, -inf  ;;  %v9817_v63 = vunpack.c.l.bf16 %v5041_v10 }
 0x276   :  { %1143 = vmax.xlane.f32.xlu0 %v1142_v53  ;;  %v1109_v23 = vsel %vm9512_vm0, %v9822_v61, -inf  ;;  %v1337_v61 = vsel %vm9512_vm0, %v9826_v12, -inf  ;;  %v1112_v12 = vsel %vm9512_vm0, %v9829_v58, -inf  ;;  %v9830_v10 = vunpack.c.h.bf16 %v5449_v6 }
 0x277   :  { %v1292_v28 = vsel %vm9512_vm0, %v9817_v63, -inf  ;;  %v1436_v63 = vsel %vm9512_vm0, %v9823_v9, -inf  ;;  %v1295_v9 = vsel %vm9512_vm0, %v9827_v15, -inf  ;;  %v1340_v58 = vsel %vm9512_vm0, %v9832_v38, -inf }
 0x278   :  { %v6051_v57 = vpop.xlane.xlu2 %999  ;;  %v6053_v55 = vpop.xlane.xlu1 %996  ;;  %v1439_v15 = vsel %vm9512_vm0, %v9830_v10, -inf  ;;  %v9833_v6 = vunpack.c.l.bf16 %v5069_v54  ;;  %v1115_v38 = vsel %vm9512_vm0, %v9835_v11, -inf  ;;  %v1343_v11 = vsel %vm9512_vm0, %v9838_v7, -inf }
 0x279   :  { %v6055_v62 = vpop.xlane.xlu0 %993  ;;  %v1118_v7 = vsel %vm9512_vm0, %v9841_v52, -inf  ;;  %v9842_v54 = vunpack.c.h.bf16 %v5477_v17  ;;  %v1346_v52 = vsel %vm9512_vm0, %v9844_v2, -inf  ;;  %v9845_v17 = vunpack.c.l.bf16 %v5064_v21 }
 0x27a   :  { %v1298_v10 = vsel %vm9512_vm0, %v9833_v6, -inf  ;;  %v1442_v6 = vsel %vm9512_vm0, %v9836_v0, -inf  ;;  %v1301_v0 = vsel %vm9512_vm0, %v9839_v4, -inf  ;;  %v1121_v2 = vsel %vm9512_vm0, %v9847_v33, -inf }
 0x27b   :  { %v1445_v4 = vsel %vm9512_vm0, %v9842_v54, -inf  ;;  %v1304_v54 = vsel %vm9512_vm0, %v9845_v17, -inf  ;;  %v1448_v17 = vsel %vm9512_vm0, %v9848_v40, -inf  ;;  %v1187_v33 = vsel %vm9512_vm0, %v9850_v59, -inf }
 0x27c   :  { %v1184_v40 = vsel %vm9512_vm0, %v9851_v32, -inf  ;;  %v1349_v32 = vsel %vm9512_vm0, %v9854_v36, -inf  ;;  %v9858_v36 = vunpack.c.h.bf16 %v5472_v13  ;;  %v9859_v13 = vunpack.c.l.bf16 %v4763_v5 }
 0x27d   :  { %1146 = vmax.xlane.f32.xlu2 %v1145_v1  ;;  %1104 = vmax.xlane.f32.xlu1 %v1103_v34 }
 0x27e   :  { %1431 = vmax.xlane.f32.xlu0 %v1430_v41 }
 0x280   :  { %v6066_v30 = vpop.xlane.xlu2 %1008  ;;  %v6068_v56 = vpop.xlane.xlu1 %1005 }
 0x281   :  { %9801 = vst [vmem:[#allocation239_spill] sm:$0xff] %v6066_v30  ;;  %v6070_v53 = vpop.xlane.xlu0 %1002 }
 0x282   :  { %9802 = vst [vmem:[#allocation240_spill] sm:$0xff] %v6068_v56 }
 0x283   :  { %9803 = vst [vmem:[#allocation241_spill] sm:$0xff] %v6070_v53 }
 0x285   :  { %1332 = vmax.xlane.f32.xlu2 %v1331_v31  ;;  %1329 = vmax.xlane.f32.xlu1 %v1328_v51 }
 0x286   :  { %1290 = vmax.xlane.f32.xlu0 %v1289_v46 }
 0x288   :  { %v6081_v1 = vpop.xlane.xlu2 %1017  ;;  %v6083_v34 = vpop.xlane.xlu1 %1014 }
 0x289   :  { %9807 = vst [vmem:[#allocation242_spill] sm:$0xff] %v6081_v1  ;;  %v6085_v41 = vpop.xlane.xlu0 %1011 }
 0x28a   :  { %9808 = vst [vmem:[#allocation243_spill] sm:$0xff] %v6083_v34 }
 0x28b   :  { %9809 = vst [vmem:[#allocation244_spill] sm:$0xff] %v6085_v41  ;;  %v9865_v41 = vld [vmem:[#allocation82_spill] sm:$0xff] }
 0x28c   :  { %v9866_v30 = vunpack.c.l.bf16 %v9865_v41 }
 0x28d   :  { %1107 = vmax.xlane.f32.xlu2 %v1106_v14  ;;  %1434 = vmax.xlane.f32.xlu1 %v1433_v22  ;;  %v1148_v14 = vsel %vm9512_vm0, %v9818_v35, -inf }
 0x28e   :  { %1392 = vmax.xlane.f32.xlu0 %v1391_v18 }
 0x290   :  { %v6096_v31 = vpop.xlane.xlu2 %1026  ;;  %v6098_v51 = vpop.xlane.xlu1 %1023 }
 0x291   :  { %9813 = vst [vmem:[#allocation245_spill] sm:$0xff] %v6096_v31  ;;  %v6100_v46 = vpop.xlane.xlu0 %1020 }
 0x292   :  { %9814 = vst [vmem:[#allocation246_spill] sm:$0xff] %v6098_v51  ;;  %v9864_v51 = vunpack.c.l.bf16 %v5222_v25 }
 0x293   :  { %9815 = vst [vmem:[#allocation247_spill] sm:$0xff] %v6100_v46 }
 0x294   :  { %v1352_v46 = vsel %vm9512_vm0, %v9864_v51, -inf }
 0x295   :  { %1335 = vmax.xlane.f32.xlu2 %v1334_v29  ;;  %1293 = vmax.xlane.f32.xlu1 %v1292_v28  ;;  %v1394_v29 = vsel %vm9512_vm0, %v9824_v39, -inf  ;;  %v1151_v39 = vsel %vm9512_vm0, %v9828_v45, -inf  ;;  %v1397_v45 = vsel %vm9512_vm0, %v9831_v27, -inf }
 0x296   :  { %1149 = vmax.xlane.f32.xlu0 %v1148_v14 }
 0x298   :  { %v6111_v22 = vpop.xlane.xlu2 %1035  ;;  %v6113_v47 = vpop.xlane.xlu1 %1032 }
 0x299   :  { %9819 = vst [vmem:[#allocation248_spill] sm:$0xff] %v6111_v22  ;;  %v6115_v18 = vpop.xlane.xlu0 %1029 }
 0x29a   :  { %9820 = vst [vmem:[#allocation249_spill] sm:$0xff] %v6113_v47 }
 0x29b   :  { %9821 = vst [vmem:[#allocation250_spill] sm:$0xff] %v6115_v18 }
 0x29d   :  { %1110 = vmax.xlane.f32.xlu2 %v1109_v23  ;;  %1437 = vmax.xlane.f32.xlu1 %v1436_v63 }
 0x29e   :  { %1395 = vmax.xlane.f32.xlu0 %v1394_v29 }
 0x2a0   :  { %v6126_v28 = vpop.xlane.xlu2 %1044  ;;  %v6128_v35 = vpop.xlane.xlu1 %1041 }
 0x2a1   :  { %v6130_v14 = vpop.xlane.xlu0 %1038 }
 0x2a2   :  { %9825 = vst [vmem:[#allocation251_spill] sm:$0xff] %v6130_v14  ;;  %v9853_v14 = vunpack.c.h.bf16 %v5375_v24  ;;  %v9856_v24 = vunpack.c.h.bf16 %v5551_v8 }
 0x2a4   :  { %v1409_v59 = vsel %vm9512_vm0, %v9853_v14, -inf  ;;  %v1475_v3 = vsel %vm9512_vm0, %v9856_v24, -inf  ;;  %v9857_v14 = vunpack.c.l.bf16 %v5551_v8 }
 0x2a5   :  { %1338 = vmax.xlane.f32.xlu2 %v1337_v61  ;;  %1296 = vmax.xlane.f32.xlu1 %v1295_v9 }
 0x2a6   :  { %1152 = vmax.xlane.f32.xlu0 %v1151_v39  ;;  %v1472_v21 = vsel %vm9512_vm0, %v9857_v14, -inf  ;;  %v1190_v14 = vsel %vm9512_vm0, %v9859_v13, -inf }
 0x2a8   :  { %v6141_v23 = vpop.xlane.xlu2 %1053  ;;  %v6143_v63 = vpop.xlane.xlu1 %1050 }
 0x2a9   :  { %v6145_v29 = vpop.xlane.xlu0 %1047 }
 0x2ad   :  { %1113 = vmax.xlane.f32.xlu2 %v1112_v12  ;;  %1440 = vmax.xlane.f32.xlu1 %v1439_v15  ;;  %v1154_v12 = vsel %vm9512_vm0, %v9834_v19, -inf }
 0x2ae   :  { %1398 = vmax.xlane.f32.xlu0 %v1397_v45 }
 0x2b0   :  { %v6156_v61 = vpop.xlane.xlu2 %1062  ;;  %v6158_v9 = vpop.xlane.xlu1 %1059 }
 0x2b1   :  { %v6160_v39 = vpop.xlane.xlu0 %1056 }
 0x2b5   :  { %1341 = vmax.xlane.f32.xlu2 %v1340_v58  ;;  %1299 = vmax.xlane.f32.xlu1 %v1298_v10  ;;  %v1400_v58 = vsel %vm9512_vm0, %v9837_v16, -inf  ;;  %v1157_v16 = vsel %vm9512_vm0, %v9840_v26, -inf  ;;  %v1403_v26 = vsel %vm9512_vm0, %v9843_v49, -inf }
 0x2b6   :  { %1155 = vmax.xlane.f32.xlu0 %v1154_v12 }
 0x2b8   :  { %v6171_v15 = vpop.xlane.xlu2 %1071  ;;  %v6173_v27 = vpop.xlane.xlu1 %1068 }
 0x2b9   :  { %v6175_v45 = vpop.xlane.xlu0 %1065 }
 0x2bd   :  { %1116 = vmax.xlane.f32.xlu2 %v1115_v38  ;;  %1443 = vmax.xlane.f32.xlu1 %v1442_v6 }
 0x2be   :  { %1401 = vmax.xlane.f32.xlu0 %v1400_v58 }
 0x2c0   :  { %v6186_v10 = vpop.xlane.xlu2 %1377  ;;  %v6188_v19 = vpop.xlane.xlu1 %1092 }
 0x2c1   :  { %v6190_v12 = vpop.xlane.xlu0 %1089 }
 0x2c5   :  { %1344 = vmax.xlane.f32.xlu2 %v1343_v11  ;;  %1302 = vmax.xlane.f32.xlu1 %v1301_v0 }
 0x2c6   :  { %1158 = vmax.xlane.f32.xlu0 %v1157_v16 }
 0x2c8   :  { %v6201_v38 = vpop.xlane.xlu2 %1383  ;;  %v6203_v6 = vpop.xlane.xlu1 %1095 }
 0x2c9   :  { %v6205_v58 = vpop.xlane.xlu0 %1380 }
 0x2cd   :  { %1119 = vmax.xlane.f32.xlu2 %v1118_v7  ;;  %1446 = vmax.xlane.f32.xlu1 %v1445_v4  ;;  %v1160_v7 = vsel %vm9512_vm0, %v9846_v44, -inf }
 0x2ce   :  { %1404 = vmax.xlane.f32.xlu0 %v1403_v26 }
 0x2d0   :  { %v6216_v11 = vpop.xlane.xlu2 %1140  ;;  %v6218_v0 = vpop.xlane.xlu1 %1137 }
 0x2d1   :  { %v6220_v16 = vpop.xlane.xlu0 %1098 }
 0x2d5   :  { %1347 = vmax.xlane.f32.xlu2 %v1346_v52  ;;  %1305 = vmax.xlane.f32.xlu1 %v1304_v54  ;;  %v1406_v52 = vsel %vm9512_vm0, %v9849_v20, -inf  ;;  %v1163_v20 = vsel %vm9512_vm0, %v9852_v48, -inf  ;;  %v1307_v48 = vsel %vm9512_vm0, %v9855_v42, -inf }
 0x2d6   :  { %1161 = vmax.xlane.f32.xlu0 %v1160_v7 }
 0x2d8   :  { %v6231_v4 = vpop.xlane.xlu2 %1386  ;;  %v6233_v49 = vpop.xlane.xlu1 %1284 }
 0x2d9   :  { %v6235_v26 = vpop.xlane.xlu0 %1281 }
 0x2dd   :  { %1122 = vmax.xlane.f32.xlu2 %v1121_v2  ;;  %1449 = vmax.xlane.f32.xlu1 %v1448_v17 }
 0x2de   :  { %1407 = vmax.xlane.f32.xlu0 %v1406_v52 }
 0x2e0   :  { %v6246_v54 = vpop.xlane.xlu2 %1101  ;;  %v6248_v44 = vpop.xlane.xlu1 %1428 }
 0x2e1   :  { %v6250_v7 = vpop.xlane.xlu0 %1425 }
 0x2e5   :  { %1188 = vmax.xlane.f32.xlu2 %v1187_v33  ;;  %1185 = vmax.xlane.f32.xlu1 %v1184_v40 }
 0x2e6   :  { %1164 = vmax.xlane.f32.xlu0 %v1163_v20  ;;  %v2144_v20 = vlaneseq }
 0x2e8   :  { %v6261_v2 = vpop.xlane.xlu2 %1389  ;;  %v6263_v17 = vpop.xlane.xlu1 %1287 }
 0x2e9   :  { %v6265_v52 = vpop.xlane.xlu0 %1143 }
 0x2ed   :  { %1410 = vmax.xlane.f32.xlu2 %v1409_v59  ;;  %1350 = vmax.xlane.f32.xlu1 %v1349_v32  ;;  %v1451_v59 = vsel %vm9512_vm0, %v9858_v36, -inf  ;;  %v6291_v32 = vand.u32 127, %v2144_v20  ;;  %v9860_v20 = vunpack.c.l.bf16 %v4684_v37  ;;  %v9861_v36 = vunpack.c.l.bf16 %v4560_v50 }
 0x2ee   :  { %1308 = vmax.xlane.f32.xlu0 %v1307_v48 }
 0x2ef   :  { %v6294_v42 = vadd.s32 4294967288, %v6291_v32  ;;  %v6316_v13 = vadd.s32 4294967280, %v6291_v32  ;;  %v2362_v51 = vperm.slane %v6235_v26, %v6291_v32 }
 0x2f0   :  { %v6276_v33 = vpop.xlane.xlu2 %1146  ;;  %v6278_v40 = vpop.xlane.xlu1 %1104 }
 0x2f1   :  { %v6280_v22 = vpop.xlane.xlu0 %1431  ;;  %9862 = vst [vmem:[#allocation252_spill] sm:$0xff] %v6316_v13  ;;  %v2425_v1 = vperm.slane %v6205_v58, %v6294_v42  ;;  %v2270_v34 = vperm.slane %v6216_v11, %v6294_v42  ;;  %v6350_v58 = vadd.s32 4294967248, %v6291_v32  ;;  %v2424_v11 = vperm.slane %v6186_v10, %v6291_v32 }
 0x2f2   :  { %v2241_v26 = vperm.slane %v6203_v6, %v6316_v13 }
 0x2f3   :  { %v2426_v10 = vsel %vm2149_vm1, %v2425_v1, %v2424_v11 }
 0x2f5   :  { %1476 = vmax.xlane.f32.xlu2 %v1475_v3  ;;  %1473 = vmax.xlane.f32.xlu1 %v1472_v21  ;;  %v1166_v3 = vsel %vm9512_vm0, %v9860_v20, -inf  ;;  %v6319_v20 = vadd.s32 4294967256, %v6291_v32 }
 0x2f6   :  { %1452 = vmax.xlane.f32.xlu0 %v1451_v59  ;;  %v1124_v59 = vsel %vm9512_vm0, %v9861_v36, -inf  ;;  %v9863_v36 = vunpack.c.l.bf16 %v5370_v43 }
 0x2f8   :  { %v1333_v48 = vpop.xlane.xlu2 %1332  ;;  %v1330_v47 = vpop.xlane.xlu1 %1329 }
 0x2f9   :  { %v2394_v24 = vperm.slane %v1333_v48, %v6294_v42  ;;  %v2393_v8 = vperm.slane %v1330_v47, %v6291_v32  ;;  %v1291_v18 = vpop.xlane.xlu0 %1290  ;;  %v6309_v47 = vadd.s32 4294967264, %v6291_v32 }
 0x2fb   :  { %v2395_v21 = vsel %vm2149_vm1, %v2394_v24, %v2393_v8  ;;  %v6322_v24 = vadd.s32 4294967272, %v6291_v32  ;;  %v2245_v6 = vperm.slane %v6246_v54, %v6309_v47  ;;  %v9867_v54 = vunpack.c.h.bf16 %v4560_v50 }
 0x2fc   :  { %v2431_v50 = vperm.slane %v6261_v2, %v6309_v47 }
 0x2fd   :  { %1191 = vmax.xlane.f32.xlu2 %v1190_v14  ;;  %1167 = vmax.xlane.f32.xlu1 %v1166_v3  ;;  %v2239_v14 = vperm.slane %v6188_v19, %v6294_v42  ;;  %v2238_v3 = vperm.slane %v6190_v12, %v6291_v32  ;;  %v2269_v19 = vperm.slane %v6218_v0, %v6291_v32  ;;  %v1310_v12 = vsel %vm9512_vm0, %v9866_v30, -inf }
 0x2fe   :  { %1125 = vmax.xlane.f32.xlu0 %v1124_v59  ;;  %v1412_v59 = vsel %vm9512_vm0, %v9863_v36, -inf  ;;  %v2363_v36 = vperm.slane %v6233_v49, %v6294_v42  ;;  %v2365_v0 = vperm.slane %v6263_v17, %v6316_v13  ;;  %v2272_v30 = vperm.slane %v6265_v52, %v6316_v13 }
 0x2ff   :  { %v2240_v56 = vsel %vm2149_vm1, %v2239_v14, %v2238_v3  ;;  %v2427_v49 = vperm.slane %v6201_v38, %v6316_v13  ;;  %v2367_v53 = vperm.slane %v1291_v18, %v6322_v24  ;;  %v2271_v17 = vsel %vm2149_vm1, %v2270_v34, %v2269_v19 }
 0x300   :  { %v6311_v48 = vpop.xlane.xlu2 %1107  ;;  %v6313_v31 = vpop.xlane.xlu1 %1434  ;;  %v2243_v52 = vperm.slane %v6220_v16, %v6322_v24  ;;  %v2429_v14 = vperm.slane %v6231_v4, %v6322_v24  ;;  %v2364_v38 = vsel %vm2149_vm1, %v2363_v36, %v2362_v51  ;;  %v2456_v18 = vperm.slane %v6248_v44, %v6294_v42  ;;  %v9868_v44 = vld [vmem:[#allocation150_spill] sm:$0xff] }
 0x301   :  { %v6324_v8 = vpop.xlane.xlu0 %1392  ;;  %v2366_v34 = vsel %vm2153_vm2, %v2365_v0, %v2364_v38  ;;  %v2273_v16 = vsel %vm2153_vm2, %v2272_v30, %v2271_v17  ;;  %v1127_v36 = vsel %vm9512_vm0, %v9867_v54, -inf  ;;  %v9869_v51 = vunpack.c.l.bf16 %v9868_v44  ;;  %v9870_v38 = vld [vmem:[#allocation137_spill] sm:$0xff] }
 0x302   :  { %v2368_v4 = vsel %vm9511_vm3, %v2367_v53, %v2366_v34  ;;  %v2247_v34 = vperm.slane %v6278_v40, %v6319_v20  ;;  %v2428_v2 = vsel %vm2153_vm2, %v2427_v49, %v2426_v10  ;;  %v2249_v40 = vperm.slane %v6311_v48, %v6350_v58 }
 0x303   :  { %v1478_v11 = vsel %vm9512_vm0, %v9869_v51, -inf }
 0x305   :  { %1413 = vmax.xlane.f32.xlu2 %v1412_v59  ;;  %1353 = vmax.xlane.f32.xlu1 %v1352_v46  ;;  %v2274_v46 = vperm.slane %v6276_v33, %v6322_v24 }
 0x306   :  { %1311 = vmax.xlane.f32.xlu0 %v1310_v12 }
 0x307   :  { %v2275_v0 = vsel %vm9511_vm3, %v2274_v46, %v2273_v16  ;;  %v6403_v46 = vadd.s32 4294967240, %v6291_v32  ;;  %v2458_v16 = vperm.slane %v6280_v22, %v6316_v13  ;;  %v2433_v22 = vperm.slane %v6324_v8, %v6319_v20 }
 0x308   :  { %v1336_v1 = vpop.xlane.xlu2 %1335  ;;  %v1294_v3 = vpop.xlane.xlu1 %1293 }
 0x309   :  { %v2396_v59 = vperm.slane %v1336_v1, %v6316_v13  ;;  %v2369_v33 = vperm.slane %v1294_v3, %v6309_v47  ;;  %v1150_v19 = vpop.xlane.xlu0 %1149  ;;  %v9871_v1 = vunpack.c.l.bf16 %v9870_v38  ;;  %v2455_v3 = vperm.slane %v6250_v7, %v6291_v32 }
 0x30a   :  { %v2276_v12 = vperm.slane %v1150_v19, %v6309_v47 }
 0x30b   :  { %v2397_v30 = vsel %vm2153_vm2, %v2396_v59, %v2395_v21  ;;  %v2370_v17 = vsel %vm2161_vm4, %v2369_v33, %v2368_v4  ;;  %v1454_v53 = vsel %vm9512_vm0, %v9871_v1, -inf  ;;  %v2242_v21 = vsel %vm2153_vm2, %v2241_v26, %v2240_v56 }
 0x30c   :  { %v2277_v19 = vsel %vm2161_vm4, %v2276_v12, %v2275_v0  ;;  %v2244_v7 = vsel %vm9511_vm3, %v2243_v52, %v2242_v21  ;;  %v2460_v59 = vperm.slane %v6313_v31, %v6322_v24  ;;  %v2430_v33 = vsel %vm9511_vm3, %v2429_v14, %v2428_v2 }
 0x30d   :  { %1128 = vmax.xlane.f32.xlu2 %v1127_v36  ;;  %1479 = vmax.xlane.f32.xlu1 %v1478_v11  ;;  %v2246_v56 = vsel %vm2161_vm4, %v2245_v6, %v2244_v7  ;;  %v2457_v26 = vsel %vm2149_vm1, %v2456_v18, %v2455_v3  ;;  %v2432_v49 = vsel %vm2161_vm4, %v2431_v50, %v2430_v33  ;;  %v9872_v6 = vld [vmem:[#allocation46_spill] sm:$0xff]  ;;  %v9874_v11 = vunpack.c.h.bf16 %v4763_v5 }
 0x30e   :  { %1455 = vmax.xlane.f32.xlu0 %v1454_v53  ;;  %v2248_v10 = vsel %vm2165_vm5, %v2247_v34, %v2246_v56  ;;  %v2459_v31 = vsel %vm2153_vm2, %v2458_v16, %v2457_v26  ;;  %v9873_v54 = vunpack.c.l.bf16 %v9872_v6  ;;  %v2434_v1 = vsel %vm2165_vm5, %v2433_v22, %v2432_v49 }
 0x30f   :  { %v2250_v36 = vsel %vm2169_vm6, %v2249_v40, %v2248_v10  ;;  %v2461_v18 = vsel %vm9511_vm3, %v2460_v59, %v2459_v31  ;;  %v1193_v0 = vsel %vm9512_vm0, %v9874_v11, -inf  ;;  %v9875_v50 = vunpack.c.h.bf16 %v4684_v37 }
 0x310   :  { %v1111_v48 = vpop.xlane.xlu2 %1110  ;;  %v1438_v52 = vpop.xlane.xlu1 %1437  ;;  %v1232_v8 = vsel %vm9512_vm0, %v9873_v54, -inf  ;;  %v9876_v33 = vunpack.c.h.bf16 %v5222_v25  ;;  %v9877_v56 = vunpack.c.h.bf16 %v9865_v41  ;;  %v9878_v10 = vunpack.c.h.bf16 %v9872_v6 }
 0x311   :  { %v2251_v4 = vperm.slane %v1111_v48, %v6403_v46  ;;  %v2462_v14 = vperm.slane %v1438_v52, %v6309_v47  ;;  %v1396_v12 = vpop.xlane.xlu0 %1395  ;;  %v1169_v34 = vsel %vm9512_vm0, %v9875_v50, -inf  ;;  %v6456_v25 = vadd.s32 4294967232, %v6291_v32 }
 0x312   :  { %v2435_v51 = vperm.slane %v1396_v12, %v6350_v58  ;;  %v1355_v37 = vsel %vm9512_vm0, %v9876_v33, -inf  ;;  %v1313_v22 = vsel %vm9512_vm0, %v9877_v56, -inf  ;;  %v1235_v48 = vsel %vm9512_vm0, %v9878_v10, -inf }
 0x313   :  { %v2252_v53 = vsel %vm9510_vm7, %v2251_v4, %v2250_v36  ;;  %v2463_v3 = vsel %vm2161_vm4, %v2462_v14, %v2461_v18  ;;  %v9879_v12 = vunpack.c.h.bf16 %v9868_v44  ;;  %v9880_v6 = vunpack.c.h.bf16 %v9870_v38 }
 0x314   :  { %v2436_v21 = vsel %vm2169_vm6, %v2435_v51, %v2434_v1  ;;  %v9881_v18 = vunpack.c.h.bf16 %v5370_v43 }
 0x315   :  { %1233 = vmax.xlane.f32.xlu2 %v1232_v8  ;;  %1194 = vmax.xlane.f32.xlu1 %v1193_v0  ;;  %v1457_v54 = vsel %vm9512_vm0, %v9880_v6, -inf }
 0x316   :  { %1170 = vmax.xlane.f32.xlu0 %v1169_v34  ;;  %v1415_v51 = vsel %vm9512_vm0, %v9881_v18, -inf  ;;  %v9882_v34 = vld [vmem:[#allocation5_spill] sm:$0xff] }
 0x318   :  { %v1339_v16 = vpop.xlane.xlu2 %1338  ;;  %v1297_v7 = vpop.xlane.xlu1 %1296 }
 0x319   :  { %v2398_v5 = vperm.slane %v1339_v16, %v6322_v24  ;;  %v2371_v2 = vperm.slane %v1297_v7, %v6319_v20  ;;  %v1153_v40 = vpop.xlane.xlu0 %1152  ;;  %v9884_v16 = vld [vmem:[#allocation167_spill] sm:$0xff] }
 0x31a   :  { %v2278_v59 = vperm.slane %v1153_v40, %v6319_v20  ;;  %v9885_v7 = vunpack.c.h.bf16 %v9884_v16  ;;  %v9886_v40 = vunpack.c.l.bf16 %v9884_v16 }
 0x31b   :  { %v2399_v26 = vsel %vm9511_vm3, %v2398_v5, %v2397_v30  ;;  %v2372_v49 = vsel %vm2165_vm5, %v2371_v2, %v2370_v17 }
 0x31c   :  { %v2279_v52 = vsel %vm2165_vm5, %v2278_v59, %v2277_v19  ;;  %v1481_v19 = vsel %vm9512_vm0, %v9879_v12, -inf  ;;  %v1520_v59 = vsel %vm9512_vm0, %v9886_v40, -inf }
 0x31d   :  { %1356 = vmax.xlane.f32.xlu2 %v1355_v37  ;;  %1314 = vmax.xlane.f32.xlu1 %v1313_v22  ;;  %v6489_v37 = vadd.s32 4294967224, %v6291_v32 }
 0x31e   :  { %1236 = vmax.xlane.f32.xlu0 %v1235_v48 }
 0x320   :  { %v1114_v31 = vpop.xlane.xlu2 %1113  ;;  %v1441_v41 = vpop.xlane.xlu1 %1440 }
 0x321   :  { %v2253_v4 = vperm.slane %v1114_v31, %v6456_v25  ;;  %v2464_v30 = vperm.slane %v1441_v41, %v6319_v20  ;;  %v1399_v14 = vpop.xlane.xlu0 %1398  ;;  %v9887_v31 = vld [vmem:[#allocation51_spill] sm:$0xff] }
 0x322   :  { %v2437_v17 = vperm.slane %v1399_v14, %v6403_v46  ;;  %v9888_v41 = vunpack.c.l.bf16 %v9887_v31 }
 0x323   :  { %v2254_v8 = vsel %vm2177_vm8, %v2253_v4, %v2252_v53  ;;  %v2465_v36 = vsel %vm2165_vm5, %v2464_v30, %v2463_v3  ;;  %v9883_v3 = vunpack.c.l.bf16 %v9882_v34  ;;  %v9889_v4 = vld [vmem:[#allocation29_spill] sm:$0xff] }
 0x324   :  { %v2438_v11 = vsel %vm9510_vm7, %v2437_v17, %v2436_v21  ;;  %v1523_v21 = vsel %vm9512_vm0, %v9885_v7, -inf  ;;  %v9890_v30 = vunpack.c.l.bf16 %v9889_v4 }
 0x325   :  { %1482 = vmax.xlane.f32.xlu2 %v1481_v19  ;;  %1458 = vmax.xlane.f32.xlu1 %v1457_v54  ;;  %v1130_v43 = vsel %vm9512_vm0, %v9883_v3, -inf  ;;  %v9891_v19 = vld [vmem:[#allocation22_spill] sm:$0xff]  ;;  %v9895_v3 = vld [vmem:[#allocation100_spill] sm:$0xff] }
 0x326   :  { %1416 = vmax.xlane.f32.xlu0 %v1415_v51  ;;  %v1196_v14 = vsel %vm9512_vm0, %v9890_v30, -inf  ;;  %v9892_v6 = vunpack.c.l.bf16 %v9891_v19  ;;  %v9901_v30 = vld [vmem:[#allocation149_spill] sm:$0xff] }
 0x328   :  { %v1342_v44 = vpop.xlane.xlu2 %1341  ;;  %v1300_v0 = vpop.xlane.xlu1 %1299  ;;  %v1172_v54 = vsel %vm9512_vm0, %v9892_v6, -inf }
 0x329   :  { %v2400_v1 = vperm.slane %v1342_v44, %v6309_v47  ;;  %v2373_v38 = vperm.slane %v1300_v0, %v6350_v58  ;;  %v1156_v50 = vpop.xlane.xlu0 %1155 }
 0x32a   :  { %v2280_v53 = vperm.slane %v1156_v50, %v6350_v58  ;;  %v9893_v50 = vld [vmem:[#allocation124_spill] sm:$0xff] }
 0x32b   :  { %v2401_v5 = vsel %vm2161_vm4, %v2400_v1, %v2399_v26  ;;  %v2374_v2 = vsel %vm2169_vm6, %v2373_v38, %v2372_v49 }
 0x32c   :  { %v2281_v33 = vsel %vm2169_vm6, %v2280_v53, %v2279_v52  ;;  %v1238_v52 = vsel %vm9512_vm0, %v9888_v41, -inf  ;;  %v9899_v41 = vld [vmem:[#allocation172_spill] sm:$0xff] }
 0x32d   :  { %1131 = vmax.xlane.f32.xlu2 %v1130_v43  ;;  %1524 = vmax.xlane.f32.xlu1 %v1523_v21  ;;  %v9896_v43 = vunpack.c.l.bf16 %v9895_v3  ;;  %v9897_v21 = vld [vmem:[#allocation87_spill] sm:$0xff] }
 0x32e   :  { %1521 = vmax.xlane.f32.xlu0 %v1520_v59  ;;  %v9898_v40 = vunpack.c.l.bf16 %v9897_v21 }
 0x330   :  { %v1117_v56 = vpop.xlane.xlu2 %1116  ;;  %v1444_v22 = vpop.xlane.xlu1 %1443  ;;  %v1316_v59 = vsel %vm9512_vm0, %v9898_v40, -inf }
 0x331   :  { %v2255_v10 = vperm.slane %v1117_v56, %v6489_v37  ;;  %v2466_v26 = vperm.slane %v1444_v22, %v6350_v58  ;;  %v1402_v48 = vpop.xlane.xlu0 %1401  ;;  %v6522_v22 = vadd.s32 4294967216, %v6291_v32 }
 0x332   :  { %v2439_v49 = vperm.slane %v1402_v48, %v6456_v25 }
 0x333   :  { %v2256_v17 = vsel %vm2181_vm9, %v2255_v10, %v2254_v8  ;;  %v2467_v12 = vsel %vm2169_vm6, %v2466_v26, %v2465_v36  ;;  %v9894_v36 = vunpack.c.l.bf16 %v9893_v50 }
 0x334   :  { %v2440_v18 = vsel %vm2177_vm8, %v2439_v49, %v2438_v11  ;;  %v1358_v11 = vsel %vm9512_vm0, %v9896_v43, -inf }
 0x335   :  { %1239 = vmax.xlane.f32.xlu2 %v1238_v52  ;;  %1197 = vmax.xlane.f32.xlu1 %v1196_v14  ;;  %v1418_v53 = vsel %vm9512_vm0, %v9894_v36, -inf  ;;  %v9900_v52 = vunpack.c.l.bf16 %v9899_v41  ;;  %v9902_v14 = vunpack.c.l.bf16 %v9901_v30 }
 0x336   :  { %1173 = vmax.xlane.f32.xlu0 %v1172_v54 }
 0x337   :  { %v1484_v6 = vsel %vm9512_vm0, %v9902_v14, -inf  ;;  %v9909_v14 = vunpack.c.h.bf16 %v9887_v31 }
 0x338   :  { %v1345_v51 = vpop.xlane.xlu2 %1344  ;;  %v1303_v44 = vpop.xlane.xlu1 %1302 }
 0x339   :  { %v2402_v0 = vperm.slane %v1345_v51, %v6319_v20  ;;  %v2375_v1 = vperm.slane %v1303_v44, %v6403_v46  ;;  %v1159_v38 = vpop.xlane.xlu0 %1158  ;;  %v9903_v44 = vld [vmem:[#allocation142_spill] sm:$0xff] }
 0x33a   :  { %v2282_v8 = vperm.slane %v1159_v38, %v6403_v46 }
 0x33b   :  { %v2403_v16 = vsel %vm2165_vm5, %v2402_v0, %v2401_v5  ;;  %v2376_v7 = vsel %vm9510_vm7, %v2375_v1, %v2374_v2  ;;  %v9904_v0 = vunpack.c.l.bf16 %v9903_v44 }
 0x33c   :  { %v2283_v56 = vsel %vm9510_vm7, %v2282_v8, %v2281_v33  ;;  %v1526_v33 = vsel %vm9512_vm0, %v9900_v52, -inf }
 0x33d   :  { %1419 = vmax.xlane.f32.xlu2 %v1418_v53  ;;  %1359 = vmax.xlane.f32.xlu1 %v1358_v11  ;;  %v1460_v1 = vsel %vm9512_vm0, %v9904_v0, -inf }
 0x33e   :  { %1317 = vmax.xlane.f32.xlu0 %v1316_v59  ;;  %v9906_v59 = vunpack.c.h.bf16 %v9882_v34 }
 0x340   :  { %v1120_v10 = vpop.xlane.xlu2 %1119  ;;  %v1447_v26 = vpop.xlane.xlu1 %1446 }
 0x341   :  { %v2257_v48 = vperm.slane %v1120_v10, %v6522_v22  ;;  %v2468_v5 = vperm.slane %v1447_v26, %v6403_v46  ;;  %v1405_v49 = vpop.xlane.xlu0 %1404 }
 0x342   :  { %v2441_v2 = vperm.slane %v1405_v49, %v6489_v37 }
 0x343   :  { %v2258_v54 = vsel %vm2185_vm10, %v2257_v48, %v2256_v17  ;;  %v2469_v51 = vsel %vm9510_vm7, %v2468_v5, %v2467_v12  ;;  %v9905_v12 = vunpack.c.h.bf16 %v9891_v19  ;;  %v9907_v48 = vunpack.c.h.bf16 %v4443_v60 }
 0x344   :  { %v2442_v38 = vsel %vm2181_vm9, %v2441_v2, %v2440_v18  ;;  %v1133_v18 = vsel %vm9512_vm0, %v9906_v59, -inf  ;;  %v6555_v19 = vadd.s32 4294967208, %v6291_v32  ;;  %v9913_v59 = vunpack.c.h.bf16 %v9895_v3 }
 0x345   :  { %1527 = vmax.xlane.f32.xlu2 %v1526_v33  ;;  %1485 = vmax.xlane.f32.xlu1 %v1484_v6  ;;  %v1175_v40 = vsel %vm9512_vm0, %v9905_v12, -inf  ;;  %v1073_v5 = vsel %vm9512_vm0, %v9907_v48, -inf  ;;  %v1241_v6 = vsel %vm9512_vm0, %v9909_v14, -inf  ;;  %v9912_v12 = vunpack.c.h.bf16 %v9893_v50 }
 0x346   :  { %1461 = vmax.xlane.f32.xlu0 %v1460_v1  ;;  %v9917_v14 = vunpack.c.h.bf16 %v9901_v30 }
 0x348   :  { %v1348_v8 = vpop.xlane.xlu2 %1347  ;;  %v1306_v36 = vpop.xlane.xlu1 %1305 }
 0x349   :  { %v2404_v53 = vperm.slane %v1348_v8, %v6350_v58  ;;  %v2377_v43 = vperm.slane %v1306_v36, %v6456_v25  ;;  %v1162_v11 = vpop.xlane.xlu0 %1161  ;;  %v9910_v8 = vunpack.c.h.bf16 %v9889_v4 }
 0x34a   :  { %v2284_v17 = vperm.slane %v1162_v11, %v6456_v25 }
 0x34b   :  { %v2405_v10 = vsel %vm2169_vm6, %v2404_v53, %v2403_v16  ;;  %v2378_v26 = vsel %vm2177_vm8, %v2377_v43, %v2376_v7  ;;  %v9908_v7 = vunpack.c.h.bf16 %v9897_v21  ;;  %v1199_v36 = vsel %vm9512_vm0, %v9910_v8, -inf }
 0x34c   :  { %v2285_v49 = vsel %vm2177_vm8, %v2284_v17, %v2283_v56 }
 0x34d   :  { %1176 = vmax.xlane.f32.xlu2 %v1175_v40  ;;  %1134 = vmax.xlane.f32.xlu1 %v1133_v18  ;;  %v1319_v56 = vsel %vm9512_vm0, %v9908_v7, -inf  ;;  %v1361_v18 = vsel %vm9512_vm0, %v9913_v59, -inf }
 0x34e   :  { %1074 = vmax.xlane.f32.xlu0 %v1073_v5 }
 0x350   :  { %v1123_v2 = vpop.xlane.xlu2 %1122  ;;  %v1450_v34 = vpop.xlane.xlu1 %1449 }
 0x351   :  { %v2259_v52 = vperm.slane %v1123_v2, %v6555_v19  ;;  %v2470_v16 = vperm.slane %v1450_v34, %v6456_v25  ;;  %v1408_v33 = vpop.xlane.xlu0 %1407 }
 0x352   :  { %v2443_v60 = vperm.slane %v1408_v33, %v6522_v22 }
 0x353   :  { %v6567_v0 = vsel %vm2189_vm11, %v2259_v52, %v2258_v54  ;;  %v2471_v1 = vsel %vm2177_vm8, %v2470_v16, %v2469_v51  ;;  %v9911_v51 = vunpack.c.h.bf16 %v9903_v44  ;;  %v9914_v16 = vld [vmem:[#allocation3_spill] sm:$0xff] }
 0x354   :  { %v2444_v53 = vsel %vm2185_vm10, %v2443_v60, %v2442_v38  ;;  %v1421_v38 = vsel %vm9512_vm0, %v9912_v12, -inf  ;;  %v9915_v33 = vunpack.c.l.bf16 %v9914_v16  ;;  %v9916_v60 = vunpack.c.h.bf16 %v9899_v41 }
 0x355   :  { %1320 = vmax.xlane.f32.xlu2 %v1319_v56  ;;  %1242 = vmax.xlane.f32.xlu1 %v1241_v6  ;;  %v1463_v4 = vsel %vm9512_vm0, %v9911_v51, -inf  ;;  %v1487_v6 = vsel %vm9512_vm0, %v9917_v14, -inf }
 0x356   :  { %1200 = vmax.xlane.f32.xlu0 %v1199_v36  ;;  %v1076_v3 = vsel %vm9512_vm0, %v9915_v33, -inf  ;;  %v9924_v33 = vld [vmem:[#allocation141_spill] sm:$0xff] }
 0x358   :  { %v1189_v21 = vpop.xlane.xlu2 %1188  ;;  %v1186_v43 = vpop.xlane.xlu1 %1185 }
 0x359   :  { %v2301_v31 = vperm.slane %v1189_v21, %v6294_v42  ;;  %v2300_v11 = vperm.slane %v1186_v43, %v6291_v32  ;;  %v1165_v17 = vpop.xlane.xlu0 %1164 }
 0x35a   :  { %v2286_v54 = vperm.slane %v1165_v17, %v6489_v37  ;;  %v9920_v17 = vld [vmem:[#allocation33_spill] sm:$0xff] }
 0x35b   :  { %v2302_v40 = vsel %vm2149_vm1, %v2301_v31, %v2300_v11  ;;  %v9918_v11 = vld [vmem:[#allocation56_spill] sm:$0xff] }
 0x35c   :  { %v2287_v48 = vsel %vm2181_vm9, %v2286_v54, %v2285_v49  ;;  %v1529_v49 = vsel %vm9512_vm0, %v9916_v60, -inf  ;;  %v9921_v54 = vunpack.c.l.bf16 %v9920_v17 }
 0x35d   :  { %1464 = vmax.xlane.f32.xlu2 %v1463_v4  ;;  %1422 = vmax.xlane.f32.xlu1 %v1421_v38  ;;  %v9922_v4 = vld [vmem:[#allocation21_spill] sm:$0xff] }
 0x35e   :  { %1362 = vmax.xlane.f32.xlu0 %v1361_v18  ;;  %v9923_v12 = vunpack.c.l.bf16 %v9922_v4  ;;  %v6618_v18 = vadd.s32 4294967200, %v6291_v32 }
 0x360   :  { %v1411_v5 = vpop.xlane.xlu2 %1410  ;;  %v1351_v2 = vpop.xlane.xlu1 %1350  ;;  %v1178_v38 = vsel %vm9512_vm0, %v9923_v12, -inf }
 0x361   :  { %v2445_v44 = vperm.slane %v1411_v5, %v6555_v19  ;;  %v2406_v34 = vperm.slane %v1351_v2, %v6403_v46  ;;  %v1309_v50 = vpop.xlane.xlu0 %1308 }
 0x362   :  { %v2379_v52 = vperm.slane %v1309_v50, %v6489_v37 }
 0x363   :  { %v2446_v7 = vsel %vm2189_vm11, %v2445_v44, %v2444_v53  ;;  %v2407_v56 = vsel %vm9510_vm7, %v2406_v34, %v2405_v10  ;;  %v9919_v10 = vunpack.c.l.bf16 %v9918_v11 }
 0x364   :  { %v2380_v8 = vsel %vm2181_vm9, %v2379_v52, %v2378_v26  ;;  %v1202_v26 = vsel %vm9512_vm0, %v9921_v54, -inf }
 0x365   :  { %1077 = vmax.xlane.f32.xlu2 %v1076_v3  ;;  %1530 = vmax.xlane.f32.xlu1 %v1529_v49  ;;  %v1244_v30 = vsel %vm9512_vm0, %v9919_v10, -inf  ;;  %v9925_v3 = vunpack.c.l.bf16 %v9924_v33 }
 0x366   :  { %1488 = vmax.xlane.f32.xlu0 %v1487_v6 }
 0x367   :  { %v1466_v60 = vsel %vm9512_vm0, %v9925_v3, -inf }
 0x368   :  { %v1477_v36 = vpop.xlane.xlu2 %1476  ;;  %v1474_v21 = vpop.xlane.xlu1 %1473 }
 0x369   :  { %v2487_v43 = vperm.slane %v1477_v36, %v6294_v42  ;;  %v2486_v41 = vperm.slane %v1474_v21, %v6291_v32  ;;  %v1453_v31 = vpop.xlane.xlu0 %1452  ;;  %v9928_v21 = vld [vmem:[#allocation86_spill] sm:$0xff] }
 0x36a   :  { %v2472_v53 = vperm.slane %v1453_v31, %v6489_v37 }
 0x36b   :  { %v2488_v51 = vsel %vm2149_vm1, %v2487_v43, %v2486_v41  ;;  %v9929_v43 = vunpack.c.l.bf16 %v9928_v21 }
 0x36c   :  { %v2473_v59 = vsel %vm2181_vm9, %v2472_v53, %v2471_v1  ;;  %v9926_v1 = vld [vmem:[#allocation104_spill] sm:$0xff] }
 0x36d   :  { %1245 = vmax.xlane.f32.xlu2 %v1244_v30  ;;  %1203 = vmax.xlane.f32.xlu1 %v1202_v26  ;;  %v9927_v49 = vunpack.c.l.bf16 %v9926_v1  ;;  %v1322_v41 = vsel %vm9512_vm0, %v9929_v43, -inf }
 0x36e   :  { %1179 = vmax.xlane.f32.xlu0 %v1178_v38  ;;  %v9931_v38 = vld [vmem:[#allocation177_spill] sm:$0xff] }
 0x36f   :  { %v1364_v14 = vsel %vm9512_vm0, %v9927_v49, -inf }
 0x370   :  { %v1192_v5 = vpop.xlane.xlu2 %1191  ;;  %v1168_v2 = vpop.xlane.xlu1 %1167 }
 0x371   :  { %v2303_v44 = vperm.slane %v1192_v5, %v6316_v13  ;;  %v2288_v34 = vperm.slane %v1168_v2, %v6522_v22  ;;  %v1126_v50 = vpop.xlane.xlu0 %1125  ;;  %v9932_v5 = vunpack.c.l.bf16 %v9931_v38 }
 0x372   :  { %v2261_v52 = vperm.slane %v1126_v50, %v6618_v18 }
 0x373   :  { %v2304_v6 = vsel %vm2153_vm2, %v2303_v44, %v2302_v40  ;;  %v2289_v36 = vsel %vm2185_vm10, %v2288_v34, %v2287_v48  ;;  %v9930_v48 = vunpack.c.h.bf16 %v9914_v16  ;;  %v9933_v34 = vld [vmem:[#allocation154_spill] sm:$0xff]  ;;  %v6654_v16 = vadd.s32 4294967192, %v6291_v32 }
 0x374   :  { %v2262_v31 = vsel %vm2193_vm12, %v2261_v52, %v6567_v0  ;;  %v1532_v0 = vsel %vm9512_vm0, %v9932_v5, -inf  ;;  %v9934_v50 = vunpack.c.l.bf16 %v9933_v34 }
 0x375   :  { %1467 = vmax.xlane.f32.xlu2 %v1466_v60  ;;  %1365 = vmax.xlane.f32.xlu1 %v1364_v14  ;;  %v1079_v12 = vsel %vm9512_vm0, %v9930_v48, -inf }
 0x376   :  { %1323 = vmax.xlane.f32.xlu0 %v1322_v41  ;;  %v1490_v52 = vsel %vm9512_vm0, %v9934_v50, -inf  ;;  %v9935_v41 = vunpack.c.h.bf16 %v9918_v11 }
 0x378   :  { %v1414_v53 = vpop.xlane.xlu2 %1413  ;;  %v1354_v10 = vpop.xlane.xlu1 %1353 }
 0x379   :  { %v2447_v30 = vperm.slane %v1414_v53, %v6618_v18  ;;  %v2408_v54 = vperm.slane %v1354_v10, %v6456_v25  ;;  %v1312_v26 = vpop.xlane.xlu0 %1311  ;;  %v9936_v53 = vunpack.c.h.bf16 %v9920_v17 }
 0x37a   :  { %v2381_v40 = vperm.slane %v1312_v26, %v6522_v22  ;;  %v9937_v26 = vunpack.c.h.bf16 %v9922_v4  ;;  %v9939_v4 = vunpack.c.h.bf16 %v9926_v1 }
 0x37b   :  { %v6646_v2 = vsel %vm2193_vm12, %v2447_v30, %v2446_v7  ;;  %v2409_v44 = vsel %vm2177_vm8, %v2408_v54, %v2407_v56  ;;  %v1205_v10 = vsel %vm9512_vm0, %v9936_v53, -inf }
 0x37c   :  { %v2382_v3 = vsel %vm2185_vm10, %v2381_v40, %v2380_v8  ;;  %v1247_v8 = vsel %vm9512_vm0, %v9935_v41, -inf  ;;  %v1181_v40 = vsel %vm9512_vm0, %v9937_v26, -inf  ;;  %v1367_v50 = vsel %vm9512_vm0, %v9939_v4, -inf }
 0x37d   :  { %1080 = vmax.xlane.f32.xlu2 %v1079_v12  ;;  %1533 = vmax.xlane.f32.xlu1 %v1532_v0 }
 0x37e   :  { %1491 = vmax.xlane.f32.xlu0 %v1490_v52  ;;  %v9940_v52 = vunpack.c.h.bf16 %v9928_v21  ;;  %v9941_v21 = vld [vmem:[#allocation4_spill] sm:$0xff] }
 0x37f   :  { %v9942_v41 = vunpack.c.l.bf16 %v9941_v21 }
 0x380   :  { %v1129_v60 = vpop.xlane.xlu2 %1128  ;;  %v1480_v49 = vpop.xlane.xlu1 %1479 }
 0x381   :  { %v2263_v14 = vperm.slane %v1129_v60, %v6654_v16  ;;  %v2489_v7 = vperm.slane %v1480_v49, %v6316_v13  ;;  %v1456_v43 = vpop.xlane.xlu0 %1455  ;;  %v1325_v60 = vsel %vm9512_vm0, %v9940_v52, -inf }
 0x382   :  { %v2474_v56 = vperm.slane %v1456_v43, %v6522_v22 }
 0x383   :  { %v6666_v30 = vsel %vm2197_vm13, %v2263_v14, %v2262_v31  ;;  %v2490_v54 = vsel %vm2153_vm2, %v2489_v7, %v2488_v51  ;;  %v9938_v31 = vunpack.c.h.bf16 %v9924_v33 }
 0x384   :  { %v2475_v48 = vsel %vm2185_vm10, %v2474_v56, %v2473_v59 }
 0x385   :  { %1248 = vmax.xlane.f32.xlu2 %v1247_v8  ;;  %1206 = vmax.xlane.f32.xlu1 %v1205_v10  ;;  %v1469_v51 = vsel %vm9512_vm0, %v9938_v31, -inf  ;;  %v1082_v8 = vsel %vm9512_vm0, %v9942_v41, -inf  ;;  %v9945_v31 = vld [vmem:[#allocation108_spill] sm:$0xff] }
 0x386   :  { %1182 = vmax.xlane.f32.xlu0 %v1181_v40  ;;  %v9944_v40 = vunpack.c.h.bf16 %v9933_v34 }
 0x388   :  { %v1234_v11 = vpop.xlane.xlu2 %1233  ;;  %v1195_v12 = vpop.xlane.xlu1 %1194 }
 0x389   :  { %v2305_v17 = vperm.slane %v1195_v12, %v6322_v24  ;;  %v1171_v5 = vpop.xlane.xlu0 %1170 }
 0x38a   :  { %v2290_v0 = vperm.slane %v1171_v5, %v6555_v19 }
 0x38b   :  { %v6682_v59 = vsel %vm9511_vm3, %v2305_v17, %v2304_v6  ;;  %v2331_v6 = vperm.slane %v1234_v11, %v6291_v32  ;;  %v1493_v11 = vsel %vm9512_vm0, %v9944_v40, -inf }
 0x38c   :  { %v6688_v49 = vsel %vm2189_vm11, %v2290_v0, %v2289_v36  ;;  %v9943_v36 = vunpack.c.h.bf16 %v9931_v38  ;;  %v1854_v38 = vld [vmem:[%s9212_s2 + $0x2f0] sm:$0xff] }
 0x38d   :  { %1470 = vmax.xlane.f32.xlu2 %v1469_v51  ;;  %1368 = vmax.xlane.f32.xlu1 %v1367_v50  ;;  %v9946_v51 = vunpack.c.l.bf16 %v9945_v31  ;;  %v9947_v50 = vld [vmem:[#allocation55_spill] sm:$0xff] }
 0x38e   :  { %1326 = vmax.xlane.f32.xlu0 %v1325_v60  ;;  %v1535_v53 = vsel %vm9512_vm0, %v9943_v36, -inf  ;;  %2601 = vmatpush.msra.mxu2 %v1854_v38  ;;  %v9948_v52 = vunpack.c.l.bf16 %v9947_v50 }
 0x38f   :  { %v1370_v4 = vsel %vm9512_vm0, %v9946_v51, -inf }
 0x390   :  { %v1357_v33 = vpop.xlane.xlu2 %1356  ;;  %v1315_v14 = vpop.xlane.xlu1 %1314  ;;  %v1250_v60 = vsel %vm9512_vm0, %v9948_v52, -inf }
 0x391   :  { %v2410_v7 = vperm.slane %v1357_v33, %v6489_v37  ;;  %v2383_v1 = vperm.slane %v1315_v14, %v6555_v19  ;;  %v1237_v43 = vpop.xlane.xlu0 %1236  ;;  %v1850_v33 = vld [vmem:[%s9212_s2 + $0x2d0] sm:$0xff] }
 0x392   :  { %v2332_v56 = vperm.slane %v1237_v43, %v6294_v42 }
 0x393   :  { %v6701_v10 = vsel %vm2181_vm9, %v2410_v7, %v2409_v44  ;;  %v6704_v26 = vsel %vm2189_vm11, %v2383_v1, %v2382_v3  ;;  %v1852_v44 = vld [vmem:[%s9212_s2 + $0x2e0] sm:$0xff] }
 0x394   :  { %v2333_v12 = vsel %vm2149_vm1, %v2332_v56, %v2331_v6  ;;  %2602 = vmatpush.msra.mxu2 %v1852_v44  ;;  %v9949_v1 = vld [vmem:[#allocation38_spill] sm:$0xff]  ;;  %v9952_v44 = vld [vmem:[#allocation176_spill] sm:$0xff] }
 0x395   :  { %1083 = vmax.xlane.f32.xlu2 %v1082_v8  ;;  %1536 = vmax.xlane.f32.xlu1 %v1535_v53  ;;  %v9950_v43 = vunpack.c.l.bf16 %v9949_v1  ;;  %v1848_v56 = vld [vmem:[%s9212_s2 + $0x2c0] sm:$0xff] }
 0x396   :  { %1494 = vmax.xlane.f32.xlu0 %v1493_v11  ;;  %2603 = vmatpush.msra.mxu2 %v1850_v33  ;;  %v9951_v11 = vunpack.c.h.bf16 %v9941_v21  ;;  %v1840_v21 = vld [vmem:[%s9212_s2 + $0x280] sm:$0xff] }
 0x397   :  { %v1208_v6 = vsel %vm9512_vm0, %v9950_v43, -inf  ;;  %v1836_v33 = vld [vmem:[%s9212_s2 + $0x260] sm:$0xff] }
 0x398   :  { %v1483_v3 = vpop.xlane.xlu2 %1482  ;;  %v1459_v17 = vpop.xlane.xlu1 %1458  ;;  %2604 = vmatpush.msra.mxu2 %v1848_v56  ;;  %v1085_v38 = vsel %vm9512_vm0, %v9951_v11, -inf }
 0x399   :  { %v2491_v34 = vperm.slane %v1483_v3, %v6322_v24  ;;  %v2476_v5 = vperm.slane %v1459_v17, %v6555_v19  ;;  %v6718_v0 = vpop.xlane.xlu0 %1416  ;;  %v9953_v3 = vunpack.c.l.bf16 %v9952_v44 }
 0x39b   :  { %v6730_v14 = vsel %vm9511_vm3, %v2491_v34, %v2490_v54  ;;  %v6733_v7 = vsel %vm2189_vm11, %v2476_v5, %v2475_v48  ;;  %v1846_v54 = vld [vmem:[%s9212_s2 + $0x2b0] sm:$0xff]  ;;  %v1844_v48 = vld [vmem:[%s9212_s2 + $0x2a0] sm:$0xff]  ;;  %v1538_v17 = vsel %vm9512_vm0, %v9953_v3, -inf }
 0x39c   :  { %2605 = vmatpush.msra.mxu2 %v1846_v54  ;;  %v1842_v34 = vld [vmem:[%s9212_s2 + $0x290] sm:$0xff]  ;;  %v9954_v5 = vld [vmem:[#allocation159_spill] sm:$0xff] }
 0x39d   :  { %1371 = vmax.xlane.f32.xlu2 %v1370_v4  ;;  %1251 = vmax.xlane.f32.xlu1 %v1250_v60  ;;  %v9955_v51 = vunpack.c.l.bf16 %v9954_v5  ;;  %v1838_v60 = vld [vmem:[%s9212_s2 + $0x270] sm:$0xff] }
 0x39e   :  { %1209 = vmax.xlane.f32.xlu0 %v1208_v6  ;;  %2606 = vmatpush.msra.mxu2 %v1844_v48 }
 0x39f   :  { %v1496_v4 = vsel %vm9512_vm0, %v9955_v51, -inf  ;;  %v1832_v51 = vld [vmem:[%s9212_s2 + $0x240] sm:$0xff] }
 0x3a0   :  { %v6747_v41 = vpop.xlane.xlu2 %1131  ;;  %v1525_v8 = vpop.xlane.xlu1 %1524  ;;  %2607 = vmatpush.msra.mxu2 %v1842_v34 }
 0x3a1   :  { %v2518_v36 = vperm.slane %v1525_v8, %v6294_v42  ;;  %v1522_v53 = vpop.xlane.xlu0 %1521 }
 0x3a2   :  { %v2517_v40 = vperm.slane %v1522_v53, %v6291_v32  ;;  %2608 = vmatpush.msra.mxu2 %v1840_v21 }
 0x3a4   :  { %v2519_v52 = vsel %vm2149_vm1, %v2518_v36, %v2517_v40  ;;  %2609 = vmatpush.msra.mxu2 %v1838_v60  ;;  %v9956_v36 = vunpack.c.h.bf16 %v9945_v31  ;;  %v9957_v40 = vunpack.c.h.bf16 %v9947_v50  ;;  %v9958_v31 = vunpack.c.h.bf16 %v9949_v1 }
 0x3a5   :  { %1086 = vmax.xlane.f32.xlu2 %v1085_v38  ;;  %1539 = vmax.xlane.f32.xlu1 %v1538_v17  ;;  %v1834_v38 = vld [vmem:[%s9212_s2 + $0x250] sm:$0xff] }
 0x3a6   :  { %1497 = vmax.xlane.f32.xlu0 %v1496_v4  ;;  %v1373_v53 = vsel %vm9512_vm0, %v9956_v36, -inf  ;;  %v1253_v11 = vsel %vm9512_vm0, %v9957_v40, -inf  ;;  %2610 = vmatpush.msra.mxu2 %v1836_v33  ;;  %v1211_v34 = vsel %vm9512_vm0, %v9958_v31, -inf  ;;  %v9959_v33 = vld [vmem:[#allocation37_spill] sm:$0xff]  ;;  %v9962_v36 = vunpack.c.h.bf16 %v9954_v5 }
 0x3a8   :  { %v1240_v43 = vpop.xlane.xlu2 %1239  ;;  %v1198_v6 = vpop.xlane.xlu1 %1197  ;;  %2611 = vmatpush.msra.mxu2 %v1834_v38 }
 0x3a9   :  { %v2334_v56 = vperm.slane %v1240_v43, %v6316_v13  ;;  %v2307_v54 = vperm.slane %v1198_v6, %v6309_v47  ;;  %v1174_v48 = vpop.xlane.xlu0 %1173  ;;  %v9960_v43 = vunpack.c.l.bf16 %v9959_v33 }
 0x3aa   :  { %v2292_v8 = vperm.slane %v1174_v48, %v6618_v18  ;;  %2612 = vmatpush.msra.mxu2 %v1832_v51  ;;  %v1826_v48 = vld [vmem:[%s9212_s2 + $0x210] sm:$0xff] }
 0x3ab   :  { %v6786_v3 = vsel %vm2153_vm2, %v2334_v56, %v2333_v12  ;;  %v6790_v17 = vsel %vm2161_vm4, %v2307_v54, %v6682_v59  ;;  %v1830_v59 = vld [vmem:[%s9212_s2 + $0x230] sm:$0xff]  ;;  %v1828_v12 = vld [vmem:[%s9212_s2 + $0x220] sm:$0xff]  ;;  %v1214_v6 = vsel %vm9512_vm0, %v9960_v43, -inf  ;;  %v9961_v56 = vunpack.c.h.bf16 %v9952_v44 }
 0x3ac   :  { %v6797_v50 = vsel %vm2193_vm12, %v2292_v8, %v6688_v49  ;;  %2613 = vmatpush.msra.mxu2 %v1830_v59  ;;  %v1824_v44 = vld [vmem:[%s9212_s2 + $0x200] sm:$0xff]  ;;  %v9967_v43 = vld [vmem:[#allocation60_spill] sm:$0xff] }
 0x3ad   :  { %1374 = vmax.xlane.f32.xlu2 %v1373_v53  ;;  %1254 = vmax.xlane.f32.xlu1 %v1253_v11  ;;  %v1541_v54 = vsel %vm9512_vm0, %v9961_v56, -inf  ;;  %v1499_v53 = vsel %vm9512_vm0, %v9962_v36, -inf }
 0x3ae   :  { %1212 = vmax.xlane.f32.xlu0 %v1211_v34  ;;  %2614 = vmatpush.msra.mxu2 %v1828_v12  ;;  %v9965_v12 = vld [vmem:[#allocation158_spill] sm:$0xff] }
 0x3b0   :  { %v6808_v1 = vpop.xlane.xlu2 %1419  ;;  %v1360_v49 = vpop.xlane.xlu1 %1359  ;;  %2615 = vmatpush.msra.mxu2 %v1826_v48  ;;  %v2208_v48 = vperm.slane %v6126_v28, %v6294_v42  ;;  %v9969_v28 = vunpack.c.h.bf16 %v9965_v12 }
 0x3b1   :  { %v2412_v4 = vperm.slane %v1360_v49, %v6522_v22  ;;  %v1318_v21 = vpop.xlane.xlu0 %1317  ;;  %v9966_v49 = vunpack.c.l.bf16 %v9965_v12  ;;  %v1788_v12 = vld [vmem:[%s9212_s2 + $0xe0] sm:$0xff] }
 0x3b2   :  { %v2385_v60 = vperm.slane %v1318_v21, %v6618_v18  ;;  %2616 = vmatpush.msra.mxu2 %v1824_v44 }
 0x3b3   :  { %v6823_v8 = vsel %vm2185_vm10, %v2412_v4, %v6701_v10  ;;  %v1502_v4 = vsel %vm9512_vm0, %v9966_v49, -inf  ;;  %v1789_v49 = vld [vmem:[%s9212_s2 + $0xe8] sm:$0xff] }
 0x3b4   :  { %v6830_v40 = vsel %vm2193_vm12, %v2385_v60, %v6704_v26  ;;  %v9963_v26 = vld [vmem:[#allocation181_spill] sm:$0xff] }
 0x3b5   :  { %1215 = vmax.xlane.f32.xlu2 %v1214_v6  ;;  %1542 = vmax.xlane.f32.xlu1 %v1541_v54  ;;  %v9964_v51 = vunpack.c.l.bf16 %v9963_v26  ;;  %v9968_v6 = vunpack.c.l.bf16 %v9967_v43 }
 0x3b6   :  { %1500 = vmax.xlane.f32.xlu0 %v1499_v53 }
 0x3b7   :  { %v1544_v59 = vsel %vm9512_vm0, %v9964_v51, -inf  ;;  %v1256_v56 = vsel %vm9512_vm0, %v9968_v6, -inf  ;;  %v2216_v51 = vperm.slane %v6160_v39, %v6319_v20  ;;  %v1884_v39 = vld [vmem:[%s9212_s2 + $0x3e0] sm:$0xff]  ;;  %v2218_v6 = vperm.slane %v6158_v9, %v6350_v58  ;;  %v1786_v9 = vld [vmem:[%s9212_s2 + $0xd0] sm:$0xff] }
 0x3b8   :  { %v1528_v11 = vpop.xlane.xlu2 %1527  ;;  %v1486_v10 = vpop.xlane.xlu1 %1485 }
 0x3b9   :  { %v2520_v38 = vperm.slane %v1528_v11, %v6316_v13  ;;  %v2493_v5 = vperm.slane %v1486_v10, %v6309_v47  ;;  %v1462_v31 = vpop.xlane.xlu0 %1461  ;;  %v2212_v11 = vperm.slane %v6143_v63, %v6322_v24  ;;  %v1505_v10 = vsel %vm9512_vm0, %v9969_v28, -inf }
 0x3ba   :  { %v2478_v34 = vperm.slane %v1462_v31, %v6618_v18 }
 0x3bb   :  { %v6845_v21 = vsel %vm2153_vm2, %v2520_v38, %v2519_v52  ;;  %v6849_v60 = vsel %vm2161_vm4, %v2493_v5, %v6730_v14  ;;  %v2207_v52 = vperm.slane %v6128_v35, %v6291_v32  ;;  %v2210_v14 = vperm.slane %v6145_v29, %v6316_v13 }
 0x3bc   :  { %v6856_v54 = vsel %vm2193_vm12, %v2478_v34, %v6733_v7  ;;  %v9970_v35 = vunpack.c.h.bf16 %v9967_v43  ;;  %v9971_v5 = vunpack.c.h.bf16 %v9959_v33  ;;  %v2214_v34 = vperm.slane %v6141_v23, %v6309_v47  ;;  %v1886_v33 = vld [vmem:[%s9212_s2 + $0x3f0] sm:$0xff]  ;;  %v1791_v23 = vld [vmem:[%s9212_s2 + $0xf8] sm:$0xff] }
 0x3bd   :  { %1545 = vmax.xlane.f32.xlu2 %v1544_v59  ;;  %1503 = vmax.xlane.f32.xlu1 %v1502_v4  ;;  %v2209_v7 = vsel %vm2149_vm1, %v2208_v48, %v2207_v52  ;;  %v1790_v59 = vld [vmem:[%s9212_s2 + $0xf0] sm:$0xff] }
 0x3be   :  { %1257 = vmax.xlane.f32.xlu0 %v1256_v56  ;;  %v1259_v38 = vsel %vm9512_vm0, %v9970_v35, -inf  ;;  %v2211_v29 = vsel %vm2153_vm2, %v2210_v14, %v2209_v7  ;;  %v1217_v31 = vsel %vm9512_vm0, %v9971_v5, -inf  ;;  %2561 = vmatpush.msra.mxu0 %v1790_v59  ;;  %v9974_v35 = vld [vmem:[#allocation42_spill] sm:$0xff]  ;;  %v1882_v5 = vld [vmem:[%s9212_s2 + $0x3d0] sm:$0xff] }
 0x3bf   :  { %v2213_v63 = vsel %vm9511_vm3, %v2212_v11, %v2211_v29  ;;  %2621 = vmatpush.msra.mxu3 %v1886_v33  ;;  %2681 = vmatpush.msrb.mxu2 %v1791_v23  ;;  %v9972_v11 = vld [vmem:[#allocation65_spill] sm:$0xff]  ;;  %v1784_v33 = vld [vmem:[%s9212_s2 + $0xc0] sm:$0xff]  ;;  %v2220_v23 = vperm.slane %v6156_v61, %v6403_v46  ;;  %v2449_v61 = vperm.slane %v6718_v0, %v6654_v16 }
 0x3c0   :  { %v6864_v36 = vpop.xlane.xlu2 %1176  ;;  %v6866_v53 = vpop.xlane.xlu1 %1134  ;;  %v2215_v56 = vsel %vm2161_vm4, %v2214_v34, %v2213_v63  ;;  %2562 = vmatpush.msra.mxu0 %v1788_v12  ;;  %v9973_v28 = vunpack.c.l.bf16 %v9972_v11  ;;  %v6930_v34 = vadd.s32 4294967184, %v6291_v32  ;;  %v1783_v0 = vld [vmem:[%s9212_s2 + $0xb8] sm:$0xff] }
 0x3c1   :  { %v6868_v44 = vpop.xlane.xlu0 %1074  ;;  %2622 = vmatpush.msra.mxu3 %v1884_v39  ;;  %v2217_v14 = vsel %vm2165_vm5, %v2216_v51, %v2215_v56  ;;  %2682 = vmatpush.msrb.mxu2 %v1789_v49  ;;  %v9976_v51 = vunpack.c.h.bf16 %v9963_v26  ;;  %v1785_v26 = vld [vmem:[%s9212_s2 + $0xc8] sm:$0xff]  ;;  %v6955_v39 = vadd.s32 4294967176, %v6291_v32  ;;  %v1782_v56 = vld [vmem:[%s9212_s2 + $0xb0] sm:$0xff] }
 0x3c2   :  { %2563 = vmatpush.msra.mxu0 %v1786_v9  ;;  %v2219_v49 = vsel %vm2169_vm6, %v2218_v6, %v2217_v14  ;;  %v1878_v6 = vld [vmem:[%s9212_s2 + $0x3b0] sm:$0xff] }
 0x3c3   :  { %v1547_v59 = vsel %vm9512_vm0, %v9976_v51, -inf  ;;  %2623 = vmatpush.msra.mxu3 %v1882_v5  ;;  %v2221_v14 = vsel %vm9510_vm7, %v2220_v23, %v2219_v49  ;;  %vm2548_vm7 = vcmask 1041409   ;;  %v9977_v5 = vunpack.c.h.bf16 %v9974_v35  ;;  %v9978_v51 = vld [vmem:[#allocation186_spill] sm:$0xff] }
 0x3c4   :  { %2564 = vmatpush.msra.mxu0 %v1784_v33 }
 0x3c5   :  { %1506 = vmax.xlane.f32.xlu2 %v1505_v10  ;;  %1260 = vmax.xlane.f32.xlu1 %v1259_v38  ;;  %v1262_v10 = vsel %vm9512_vm0, %v9973_v28, -inf  ;;  %v9975_v38 = vunpack.c.l.bf16 %v9974_v35 }
 0x3c6   :  { %1218 = vmax.xlane.f32.xlu0 %v1217_v31  ;;  %v1787_v31 = vld [vmem:[%s9212_s2 + $0xd8] sm:$0xff]  ;;  %2565 = vmatpush.msra.mxu0 %v1782_v56  ;;  %v1874_v56 = vld [vmem:[%s9212_s2 + $0x390] sm:$0xff] }
 0x3c7   :  { %v1220_v29 = vsel %vm9512_vm0, %v9975_v38, -inf  ;;  %2683 = vmatpush.msrb.mxu2 %v1787_v31  ;;  %v1223_v31 = vsel %vm9512_vm0, %v9977_v5, -inf }
 0x3c8   :  { %v6906_v4 = vpop.xlane.xlu2 %1320  ;;  %v1243_v43 = vpop.xlane.xlu1 %1242 }
 0x3c9   :  { %v2336_v48 = vperm.slane %v1243_v43, %v6322_v24  ;;  %v1201_v52 = vpop.xlane.xlu0 %1200  ;;  %v2451_v43 = vperm.slane %v6808_v1, %v6930_v34  ;;  %v2267_v1 = vperm.slane %v6866_v53, %v6955_v39  ;;  %2684 = vmatpush.msrb.mxu2 %v1785_v26  ;;  %v1781_v53 = vld [vmem:[%s9212_s2 + $0xa8] sm:$0xff] }
 0x3ca   :  { %v2309_v7 = vperm.slane %v1201_v52, %v6319_v20  ;;  %v2224_v52 = vperm.slane %v6173_v27, %v6489_v37 }
 0x3cb   :  { %v6934_v63 = vsel %vm9511_vm3, %v2336_v48, %v6786_v3  ;;  %v1880_v3 = vld [vmem:[%s9212_s2 + $0x3c0] sm:$0xff]  ;;  %2685 = vmatpush.msrb.mxu2 %v1783_v0  ;;  %v2226_v0 = vperm.slane %v6171_v15, %v6522_v22  ;;  %v1777_v15 = vld [vmem:[%s9212_s2 + $0x88] sm:$0xff] }
 0x3cc   :  { %v6946_v12 = vsel %vm2165_vm5, %v2309_v7, %v6790_v17  ;;  %v2265_v17 = vperm.slane %v6747_v41, %v6930_v34  ;;  %v2222_v41 = vperm.slane %v6175_v45, %v6456_v25  ;;  %2624 = vmatpush.msra.mxu3 %v1880_v3  ;;  %v1780_v48 = vld [vmem:[%s9212_s2 + $0xa0] sm:$0xff] }
 0x3cd   :  { %1263 = vmax.xlane.f32.xlu2 %v1262_v10  ;;  %1221 = vmax.xlane.f32.xlu1 %v1220_v29  ;;  %v1876_v45 = vld [vmem:[%s9212_s2 + $0x3a0] sm:$0xff]  ;;  %v2450_v10 = vsel %vm2197_vm13, %v2449_v61, %v6646_v2 }
 0x3ce   :  { %1548 = vmax.xlane.f32.xlu0 %v1547_v59  ;;  %v2266_v29 = vsel %vm2201_vm14, %v2265_v17, %v6666_v30  ;;  %2625 = vmatpush.msra.mxu3 %v1878_v6  ;;  %v9979_v59 = vunpack.c.l.bf16 %v9978_v51  ;;  %v2452_v2 = vsel %vm2201_vm14, %v2451_v43, %v2450_v10  ;;  %v1778_v30 = vld [vmem:[%s9212_s2 + $0x90] sm:$0xff]  ;;  %v2223_v23 = vsel %vm2177_vm8, %v2222_v41, %v2221_v14  ;;  %v9980_v3 = vld [vmem:[#allocation163_spill] sm:$0xff]  ;;  %v1779_v6 = vld [vmem:[%s9212_s2 + $0x98] sm:$0xff] }
 0x3cf   :  { %2566 = vmatpush.msra.mxu0 %v1780_v48  ;;  %v9981_v26 = vunpack.c.l.bf16 %v9980_v3  ;;  %v2268_v35 = vsel %vm2205_vm15, %v2267_v1, %v2266_v29  ;;  %2686 = vmatpush.msrb.mxu2 %v1781_v53  ;;  %v2225_v41 = vsel %vm2181_vm9, %v2224_v52, %v2223_v23  ;;  %v2228_v1 = vperm.slane %v6868_v44, %v6555_v19  ;;  %v1872_v48 = vld [vmem:[%s9212_s2 + $0x380] sm:$0xff]  ;;  %v1774_v52 = vld [vmem:[%s9212_s2 + $0x70] sm:$0xff] }
 0x3d0   :  { %v6983_v7 = vpop.xlane.xlu2 %1464  ;;  %v1423_v28 = vpop.xlane.xlu1 %1422  ;;  %v1550_v33 = vsel %vm9512_vm0, %v9979_v59, -inf  ;;  %2626 = vmatpush.msra.mxu3 %v1876_v45  ;;  %v1870_v44 = vld [vmem:[%s9212_s2 + $0x370] sm:$0xff]  ;;  %v1775_v45 = vld [vmem:[%s9212_s2 + $0x78] sm:$0xff]  ;;  %v2227_v53 = vsel %vm2185_vm10, %v2226_v0, %v2225_v41  ;;  %v1772_v29 = vld [vmem:[%s9212_s2 + $0x60] sm:$0xff] }
 0x3d1   :  { %v2453_v27 = vperm.slane %v1423_v28, %v6955_v39  ;;  %v1363_v38 = vpop.xlane.xlu0 %1362  ;;  %v1508_v49 = vsel %vm9512_vm0, %v9981_v26, -inf  ;;  %2567 = vmatpush.msra.mxu0 %v1778_v30  ;;  %2687 = vmatpush.msrb.mxu2 %v1779_v6  ;;  %v9985_v26 = vunpack.c.h.bf16 %v9972_v11  ;;  %v1770_v11 = vld [vmem:[%s9212_s2 + $0x50] sm:$0xff]  ;;  %v1768_v6 = vld [vmem:[%s9212_s2 + $0x40] sm:$0xff] }
 0x3d2   :  { %v2414_v9 = vperm.slane %v1363_v38, %v6555_v19  ;;  %2627 = vmatpush.msra.mxu3 %v1874_v56  ;;  %v1771_v56 = vld [vmem:[%s9212_s2 + $0x58] sm:$0xff]  ;;  %v1864_v0 = vld [vmem:[%s9212_s2 + $0x340] sm:$0xff]  ;;  %v1766_v41 = vld [vmem:[%s9212_s2 + $0x30] sm:$0xff] }
 0x3d3   :  { %v2454_v61 = vsel %vm2205_vm15, %v2453_v27, %v2452_v2  ;;  %2688 = vmatpush.msrb.mxu2 %v1777_v15 }
 0x3d4   :  { %v7015_v17 = vsel %vm2189_vm11, %v2414_v9, %v6823_v8  ;;  %v7018_v43 = vsel %vm2548_vm7, %v2454_v61, %v2268_v35  ;;  %v1776_v8 = vld [vmem:[%s9212_s2 + $0x80] sm:$0xff]  ;;  %2628 = vmatpush.msra.mxu3 %v1872_v48  ;;  %v2229_v9 = vsel %vm2189_vm11, %v2228_v1, %v2227_v53  ;;  %v1866_v35 = vld [vmem:[%s9212_s2 + $0x350] sm:$0xff]  ;;  %v2148_v61 = vperm.slane %v6053_v55, %v6294_v42 }
 0x3d5   :  { %9982 = vst [vmem:[#allocation82_spill] sm:$0xff] %v7018_v43  ;;  %1224 = vmax.xlane.f32.xlu2 %v1223_v31  ;;  %1551 = vmax.xlane.f32.xlu1 %v1550_v33  ;;  %v9983_v31 = vunpack.c.h.bf16 %v9978_v51  ;;  %v9984_v33 = vunpack.c.h.bf16 %v9980_v3  ;;  %v1868_v51 = vld [vmem:[%s9212_s2 + $0x360] sm:$0xff] }
 0x3d6   :  { %1509 = vmax.xlane.f32.xlu0 %v1508_v49  ;;  %2617 = vmatmul.f32.vlgmr.msra.gmra.mxu2 %v7018_v43  ;;  %v1265_v49 = vsel %vm9512_vm0, %v9985_v26, -inf  ;;  %v1765_v26 = vld [vmem:[%s9212_s2 + $0x28] sm:$0xff] }
 0x3d7   :  { %2568 = vmatpush.msra.mxu0 %v1776_v8  ;;  %v1553_v59 = vsel %vm9512_vm0, %v9983_v31, -inf  ;;  %v1511_v2 = vsel %vm9512_vm0, %v9984_v33, -inf  ;;  %2629 = vmatpush.msra.mxu3 %v1870_v44  ;;  %v9986_v44 = vld [vmem:[#allocation168_spill] sm:$0xff]  ;;  %v9991_v31 = vld [vmem:[#allocation47_spill] sm:$0xff] }
 0x3d8   :  { %v1078_v14 = vpop.xlane.xlu2 %1077  ;;  %v1531_v28 = vpop.xlane.xlu1 %1530  ;;  %2689 = vmatpush.msrb.mxu2 %v1775_v45  ;;  %v9987_v45 = vunpack.c.l.bf16 %v9986_v44 }
 0x3d9   :  { %v2230_v10 = vperm.slane %v1078_v14, %v6618_v18  ;;  %v2522_v27 = vperm.slane %v1531_v28, %v6322_v24  ;;  %v1489_v38 = vpop.xlane.xlu0 %1488  ;;  %2569 = vmatpush.msra.mxu0 %v1774_v52  ;;  %2630 = vmatpush.msra.mxu3 %v1868_v51  ;;  %v1862_v52 = vld [vmem:[%s9212_s2 + $0x330] sm:$0xff]  ;;  %v2152_v14 = vperm.slane %v6051_v57, %v6316_v13 }
 0x3da   :  { %v2495_v5 = vperm.slane %v1489_v38, %v6319_v20  ;;  %v1514_v53 = vsel %vm9512_vm0, %v9987_v45, -inf  ;;  %v9995_v45 = vld [vmem:[#allocation244_spill] sm:$0xff] }
 0x3db   :  { %v7065_v30 = vsel %vm2193_vm12, %v2230_v10, %v2229_v9  ;;  %v7069_v23 = vsel %vm9511_vm3, %v2522_v27, %v6845_v21  ;;  %2570 = vmatpush.msra.mxu0 %v1772_v29  ;;  %v1773_v21 = vld [vmem:[%s9212_s2 + $0x68] sm:$0xff]  ;;  %2631 = vmatpush.msra.mxu3 %v1866_v35  ;;  %v9990_v29 = vld [vmem:[#allocation241_spill] sm:$0xff] }
 0x3dc   :  { %v7079_v3 = vsel %vm2165_vm5, %v2495_v5, %v6849_v60  ;;  %v2146_v60 = vperm.slane %v6055_v62, %v6291_v32  ;;  %2690 = vmatpush.msrb.mxu2 %v1773_v21  ;;  %v1769_v62 = vld [vmem:[%s9212_s2 + $0x48] sm:$0xff]  ;;  %v2156_v9 = vperm.slane %v9990_v29, %v6322_v24  ;;  %v1858_v35 = vld [vmem:[%s9212_s2 + $0x310] sm:$0xff]  ;;  %v9997_v29 = vunpack.c.h.bf16 %v9991_v31 }
 0x3dd   :  { %1554 = vmax.xlane.f32.xlu2 %v1553_v59  ;;  %1512 = vmax.xlane.f32.xlu1 %v1511_v2  ;;  %v9988_v10 = vld [vmem:[#allocation64_spill] sm:$0xff]  ;;  %v9992_v59 = vunpack.c.l.bf16 %v9991_v31  ;;  %v1767_v2 = vld [vmem:[%s9212_s2 + $0x38] sm:$0xff]  ;;  %v10000_v31 = vld [vmem:[#allocation243_spill] sm:$0xff] }
 0x3de   :  { %1266 = vmax.xlane.f32.xlu0 %v1265_v49  ;;  %2571 = vmatpush.msra.mxu0 %v1770_v11  ;;  %v2150_v28 = vsel %vm2149_vm1, %v2148_v61, %v2146_v60  ;;  %v9989_v27 = vunpack.c.l.bf16 %v9988_v10  ;;  %v9993_v49 = vld [vmem:[#allocation240_spill] sm:$0xff] }
 0x3df   :  { %2691 = vmatpush.msrb.mxu2 %v1771_v56  ;;  %2632 = vmatpush.msra.mxu3 %v1864_v0  ;;  %v1226_v33 = vsel %vm9512_vm0, %v9992_v59, -inf  ;;  %v2160_v51 = vperm.slane %v9993_v49, %v6309_v47  ;;  %v2154_v21 = vsel %vm2153_vm2, %v2152_v14, %v2150_v28  ;;  %v1762_v11 = vld [vmem:[%s9212_s2 + $0x10] sm:$0xff]  ;;  %v1763_v56 = vld [vmem:[%s9212_s2 + $0x18] sm:$0xff] }
 0x3e0   :  { %v1246_v55 = vpop.xlane.xlu2 %1245  ;;  %v1204_v8 = vpop.xlane.xlu1 %1203  ;;  %2572 = vmatpush.msra.mxu0 %v1768_v6  ;;  %v1268_v38 = vsel %vm9512_vm0, %v9989_v27, -inf  ;;  %v1822_v61 = vld [vmem:[%s9212_s2 + $0x1f0] sm:$0xff]  ;;  %v2158_v60 = vsel %vm9511_vm3, %v2156_v9, %v2154_v21  ;;  %v1820_v6 = vld [vmem:[%s9212_s2 + $0x1e0] sm:$0xff]  ;;  %v1823_v14 = vld [vmem:[%s9212_s2 + $0x1f8] sm:$0xff]  ;;  %v9996_v27 = vunpack.c.h.bf16 %v9988_v10  ;;  %v1229_v9 = vsel %vm9512_vm0, %v9997_v29, -inf }
 0x3e1   :  { %v2338_v1 = vperm.slane %v1246_v55, %v6309_v47  ;;  %v2311_v48 = vperm.slane %v1204_v8, %v6350_v58  ;;  %v7111_v15 = vpop.xlane.xlu0 %1179  ;;  %2692 = vmatpush.msrb.mxu2 %v1769_v62  ;;  %2633 = vmatpush.msra.mxu3 %v1862_v52  ;;  %v1760_v8 = vld [vmem:[%s9212_s2] sm:$0xff]  ;;  %v1761_v52 = vld [vmem:[%s9212_s2 + $0x8] sm:$0xff]  ;;  %v2162_v28 = vsel %vm2161_vm4, %v2160_v51, %v2158_v60  ;;  %v9998_v59 = vld [vmem:[#allocation185_spill] sm:$0xff]  ;;  %vm10002_vm3 = vcmask 523712  }
 0x3e2   :  { %2573 = vmatpush.msra.mxu0 %v1766_v41  ;;  %v1856_v62 = vld [vmem:[%s9212_s2 + $0x300] sm:$0xff]  ;;  %2581 = vmatpush.msra.mxu1 %v1822_v61  ;;  %v1818_v10 = vld [vmem:[%s9212_s2 + $0x1d0] sm:$0xff]  ;;  %v1819_v49 = vld [vmem:[%s9212_s2 + $0x1d8] sm:$0xff] }
 0x3e3   :  { %v7129_v5 = vsel %vm2161_vm4, %v2338_v1, %v6934_v63  ;;  %v7133_v57 = vsel %vm2169_vm6, %v2311_v48, %v6946_v12  ;;  %v1764_v63 = vld [vmem:[%s9212_s2 + $0x20] sm:$0xff]  ;;  %2693 = vmatpush.msrb.mxu2 %v1767_v2  ;;  %v1814_v60 = vld [vmem:[%s9212_s2 + $0x1b0] sm:$0xff] }
 0x3e4   :  { %v1860_v12 = vld [vmem:[%s9212_s2 + $0x320] sm:$0xff]  ;;  %2574 = vmatpush.msra.mxu0 %v1764_v63  ;;  %2582 = vmatpush.msra.mxu1 %v1820_v6  ;;  %v1821_v63 = vld [vmem:[%s9212_s2 + $0x1e8] sm:$0xff] }
 0x3e5   :  { %1515 = vmax.xlane.f32.xlu2 %v1514_v53  ;;  %1269 = vmax.xlane.f32.xlu1 %v1268_v38  ;;  %v9994_v41 = vld [vmem:[#allocation239_spill] sm:$0xff]  ;;  %v2168_v53 = vperm.slane %v9995_v45, %v6350_v58  ;;  %v1271_v38 = vsel %vm9512_vm0, %v9996_v27, -inf  ;;  %v10004_v45 = vld [vmem:[#allocation69_spill] sm:$0xff] }
 0x3e6   :  { %1227 = vmax.xlane.f32.xlu0 %v1226_v33  ;;  %2634 = vmatpush.msra.mxu3 %v1860_v12  ;;  %v2164_v1 = vperm.slane %v9994_v41, %v6319_v20  ;;  %v9999_v33 = vunpack.c.l.bf16 %v9998_v59  ;;  %v2172_v12 = vperm.slane %v10000_v31, %v6403_v46  ;;  %v1816_v21 = vld [vmem:[%s9212_s2 + $0x1c0] sm:$0xff] }
 0x3e7   :  { %2694 = vmatpush.msrb.mxu2 %v1765_v26  ;;  %2575 = vmatpush.msra.mxu0 %v1762_v11  ;;  %v1817_v11 = vld [vmem:[%s9212_s2 + $0x1c8] sm:$0xff] }
 0x3e8   :  { %v7169_v0 = vpop.xlane.xlu2 %1467  ;;  %v7171_v55 = vpop.xlane.xlu1 %1365  ;;  %2635 = vmatpush.msra.mxu3 %v1858_v35  ;;  %v1556_v2 = vsel %vm9512_vm0, %v9999_v33, -inf  ;;  %v2166_v26 = vsel %vm2165_vm5, %v2164_v1, %v2162_v28  ;;  %2583 = vmatpush.msra.mxu1 %v1818_v10  ;;  %v1815_v1 = vld [vmem:[%s9212_s2 + $0x1b8] sm:$0xff]  ;;  %v10007_v33 = vunpack.c.h.bf16 %v9986_v44 }
 0x3e9   :  { %v7181_v48 = vpop.xlane.xlu0 %1323  ;;  %2695 = vmatpush.msrb.mxu2 %v1763_v56  ;;  %2576 = vmatpush.msra.mxu0 %v1760_v8  ;;  %v2170_v51 = vsel %vm2169_vm6, %v2168_v53, %v2166_v26  ;;  %v10001_v56 = vld [vmem:[#allocation242_spill] sm:$0xff]  ;;  %v10005_v53 = vunpack.c.l.bf16 %v10004_v45 }
 0x3ea   :  { %2636 = vmatpush.msra.mxu3 %v1856_v62  ;;  %v2176_v6 = vperm.slane %v10001_v56, %v6456_v25  ;;  %v2174_v8 = vsel %vm10002_vm3, %v2172_v12, %v2170_v51  ;;  %2584 = vmatpush.msra.mxu1 %v1816_v21  ;;  %v1810_v12 = vld [vmem:[%s9212_s2 + $0x190] sm:$0xff] }
 0x3eb   :  { %2696 = vmatpush.msrb.mxu2 %v1761_v52  ;;  %v10003_v52 = vld [vmem:[#allocation247_spill] sm:$0xff]  ;;  %v1274_v27 = vsel %vm9512_vm0, %v10005_v53, -inf  ;;  %v10009_v51 = vld [vmem:[#allocation245_spill] sm:$0xff]  ;;  %v10012_v53 = vld [vmem:[#allocation190_spill] sm:$0xff] }
 0x3ec   :  { %2701 = vmatpush.msrb.mxu3 %v1823_v14  ;;  %v2180_v14 = vperm.slane %v10003_v52, %v6489_v37  ;;  %2585 = vmatpush.msra.mxu1 %v1814_v60  ;;  %v2178_v44 = vsel %vm2177_vm8, %v2176_v6, %v2174_v8  ;;  %v2188_v21 = vperm.slane %v10009_v51, %v6555_v19  ;;  %v1809_v60 = vld [vmem:[%s9212_s2 + $0x188] sm:$0xff]  ;;  %v10010_v6 = vld [vmem:[#allocation250_spill] sm:$0xff]  ;;  %v1806_v52 = vld [vmem:[%s9212_s2 + $0x170] sm:$0xff] }
 0x3ed   :  { %1272 = vmax.xlane.f32.xlu2 %v1271_v38  ;;  %1230 = vmax.xlane.f32.xlu1 %v1229_v9  ;;  %v10006_v38 = vunpack.c.h.bf16 %v9998_v59  ;;  %v1813_v59 = vld [vmem:[%s9212_s2 + $0x1a8] sm:$0xff]  ;;  %v2192_v8 = vperm.slane %v10010_v6, %v6618_v18  ;;  %v2482_v51 = vperm.slane %v7169_v0, %v6930_v34 }
 0x3ee   :  { %1557 = vmax.xlane.f32.xlu0 %v1556_v2  ;;  %2702 = vmatpush.msrb.mxu3 %v1821_v63  ;;  %v1517_v2 = vsel %vm9512_vm0, %v10007_v33, -inf  ;;  %v1812_v63 = vld [vmem:[%s9212_s2 + $0x1a0] sm:$0xff]  ;;  %v2182_v26 = vsel %vm2181_vm9, %v2180_v14, %v2178_v44  ;;  %v10011_v14 = vunpack.c.h.bf16 %v10004_v45  ;;  %v1807_v45 = vld [vmem:[%s9212_s2 + $0x178] sm:$0xff]  ;;  %v2294_v44 = vperm.slane %v6864_v36, %v6654_v16  ;;  %v1802_v36 = vld [vmem:[%s9212_s2 + $0x150] sm:$0xff] }
 0x3ef   :  { %v1559_v29 = vsel %vm9512_vm0, %v10006_v38, -inf  ;;  %2586 = vmatpush.msra.mxu1 %v1812_v63  ;;  %v10017_v0 = vld [vmem:[#allocation251_spill] sm:$0xff] }
 0x3f0   :  { %v7220_v35 = vpop.xlane.xlu2 %1080  ;;  %v1534_v61 = vpop.xlane.xlu1 %1533  ;;  %2703 = vmatpush.msrb.mxu3 %v1819_v49  ;;  %v1808_v49 = vld [vmem:[%s9212_s2 + $0x180] sm:$0xff] }
 0x3f1   :  { %v2524_v62 = vperm.slane %v1534_v61, %v6309_v47  ;;  %v1492_v41 = vpop.xlane.xlu0 %1491  ;;  %2587 = vmatpush.msra.mxu1 %v1810_v12  ;;  %v2480_v12 = vperm.slane %v6983_v7, %v6654_v16  ;;  %v10016_v7 = vld [vmem:[#allocation248_spill] sm:$0xff] }
 0x3f2   :  { %v2497_v28 = vperm.slane %v1492_v41, %v6350_v58  ;;  %2704 = vmatpush.msrb.mxu3 %v1817_v11 }
 0x3f3   :  { %v7243_v9 = vsel %vm2161_vm4, %v2524_v62, %v7069_v23  ;;  %v10008_v23 = vld [vmem:[#allocation246_spill] sm:$0xff]  ;;  %2588 = vmatpush.msra.mxu1 %v1808_v49  ;;  %v2296_v49 = vperm.slane %v7111_v15, %v6930_v34 }
 0x3f4   :  { %v7253_v10 = vsel %vm2169_vm6, %v2497_v28, %v7079_v3  ;;  %2705 = vmatpush.msrb.mxu3 %v1815_v1  ;;  %v2184_v31 = vperm.slane %v10008_v23, %v6522_v22  ;;  %v1811_v3 = vld [vmem:[%s9212_s2 + $0x198] sm:$0xff]  ;;  %v1277_v28 = vsel %vm9512_vm0, %v10011_v14, -inf }
 0x3f5   :  { %1275 = vmax.xlane.f32.xlu2 %v1274_v27  ;;  %1560 = vmax.xlane.f32.xlu1 %v1559_v29  ;;  %v10013_v27 = vunpack.c.h.bf16 %v10012_v53  ;;  %v1803_v15 = vld [vmem:[%s9212_s2 + $0x158] sm:$0xff] }
 0x3f6   :  { %1518 = vmax.xlane.f32.xlu0 %v1517_v2  ;;  %2706 = vmatpush.msrb.mxu3 %v1813_v59  ;;  %v2186_v56 = vsel %vm2185_vm10, %v2184_v31, %v2182_v26  ;;  %v10014_v2 = vunpack.c.l.bf16 %v10012_v53  ;;  %v10015_v59 = vld [vmem:[#allocation249_spill] sm:$0xff]  ;;  %v1805_v26 = vld [vmem:[%s9212_s2 + $0x168] sm:$0xff] }
 0x3f7   :  { %v1565_v38 = vsel %vm9512_vm0, %v10013_v27, -inf  ;;  %v2196_v23 = vperm.slane %v10015_v59, %v6654_v16  ;;  %v2190_v31 = vsel %vm2189_vm11, %v2188_v21, %v2186_v56  ;;  %2589 = vmatpush.msra.mxu1 %v1806_v52  ;;  %v2200_v21 = vperm.slane %v10016_v7, %v6930_v34  ;;  %v1801_v52 = vld [vmem:[%s9212_s2 + $0x148] sm:$0xff] }
 0x3f8   :  { %v1249_v11 = vpop.xlane.xlu2 %1248  ;;  %v1207_v61 = vpop.xlane.xlu1 %1206  ;;  %2707 = vmatpush.msrb.mxu3 %v1811_v3  ;;  %v1562_v63 = vsel %vm9512_vm0, %v10014_v2, -inf  ;;  %v2387_v3 = vperm.slane %v6906_v4, %v6654_v16 }
 0x3f9   :  { %v2340_v62 = vperm.slane %v1249_v11, %v6319_v20  ;;  %v2313_v41 = vperm.slane %v1207_v61, %v6403_v46  ;;  %v1183_v1 = vpop.xlane.xlu0 %1182  ;;  %v2389_v11 = vperm.slane %v7181_v48, %v6930_v34  ;;  %v2204_v61 = vperm.slane %v10017_v0, %v6955_v39  ;;  %v1800_v48 = vld [vmem:[%s9212_s2 + $0x140] sm:$0xff]  ;;  %v1919_v0 = vld [vmem:[%s9212_s2 + $0x4f8] sm:$0xff] }
 0x3fa   :  { %2708 = vmatpush.msrb.mxu3 %v1809_v60  ;;  %v2298_v4 = vperm.slane %v1183_v1, %v6955_v39  ;;  %v2388_v14 = vsel %vm2197_vm13, %v2387_v3, %v6830_v40  ;;  %v1795_v3 = vld [vmem:[%s9212_s2 + $0x118] sm:$0xff]  ;;  %2761 = vmatpush.msra.mxu2 %v1919_v0 }
 0x3fb   :  { %v7292_v29 = vsel %vm2165_vm5, %v2340_v62, %v7129_v5  ;;  %v7296_v33 = vsel %vm10002_vm3, %v2313_v41, %v7133_v57  ;;  %v1804_v5 = vld [vmem:[%s9212_s2 + $0x160] sm:$0xff]  ;;  %v2194_v57 = vsel %vm2193_vm12, %v2192_v8, %v2190_v31  ;;  %v2295_v8 = vsel %vm2197_vm13, %v2294_v44, %v6797_v50  ;;  %v1794_v44 = vld [vmem:[%s9212_s2 + $0x110] sm:$0xff]  ;;  %v1907_v0 = vld [vmem:[%s9212_s2 + $0x498] sm:$0xff] }
 0x3fc   :  { %2709 = vmatpush.msrb.mxu3 %v1807_v45  ;;  %2590 = vmatpush.msra.mxu1 %v1804_v5  ;;  %v2198_v6 = vsel %vm2197_vm13, %v2196_v23, %v2194_v57  ;;  %v2481_v62 = vsel %vm2197_vm13, %v2480_v12, %v6856_v54  ;;  %v2297_v53 = vsel %vm2201_vm14, %v2296_v49, %v2295_v8  ;;  %v1798_v54 = vld [vmem:[%s9212_s2 + $0x130] sm:$0xff]  ;;  %v1799_v23 = vld [vmem:[%s9212_s2 + $0x138] sm:$0xff]  ;;  %v1796_v31 = vld [vmem:[%s9212_s2 + $0x120] sm:$0xff] }
 0x3fd   :  { %1278 = vmax.xlane.f32.xlu1 %v1277_v28  ;;  %1566 = vmax.xlane.f32.xlu2 %v1565_v38  ;;  %v2483_v50 = vsel %vm2201_vm14, %v2482_v51, %v2481_v62  ;;  %v2202_v27 = vsel %vm2201_vm14, %v2200_v21, %v2198_v6  ;;  %v2390_v38 = vsel %vm2201_vm14, %v2389_v11, %v2388_v14  ;;  %v1797_v57 = vld [vmem:[%s9212_s2 + $0x128] sm:$0xff]  ;;  %v1792_v49 = vld [vmem:[%s9212_s2 + $0x100] sm:$0xff] }
 0x3fe   :  { %1563 = vmax.xlane.f32.xlu0 %v1562_v63  ;;  %2710 = vmatpush.msrb.mxu3 %v1805_v26  ;;  %v2299_v2 = vsel %vm2205_vm15, %v2298_v4, %v2297_v53  ;;  %v2206_v40 = vsel %vm2205_vm15, %v2204_v61, %v2202_v27  ;;  %v1793_v21 = vld [vmem:[%s9212_s2 + $0x108] sm:$0xff]  ;;  %v1912_v14 = vld [vmem:[%s9212_s2 + $0x4c0] sm:$0xff]  ;;  %v1911_v53 = vld [vmem:[%s9212_s2 + $0x4b8] sm:$0xff] }
 0x3ff   :  { %2591 = vmatpush.msra.mxu1 %v1802_v36  ;;  %v10020_v27 = vld [vmem:[#allocation8_spill] sm:$0xff] }
 0x400   :  { %v1471_v60 = vpop.xlane.xlu2 %1470  ;;  %v7337_v56 = vpop.xlane.xlu1 %1368  ;;  %2711 = vmatpush.msrb.mxu3 %v1803_v15  ;;  %v1918_v15 = vld [vmem:[%s9212_s2 + $0x4f0] sm:$0xff] }
 0x401   :  { %v2484_v41 = vperm.slane %v1471_v60, %v6955_v39  ;;  %v1327_v1 = vpop.xlane.xlu0 %1326  ;;  %2592 = vmatpush.msra.mxu1 %v1800_v48  ;;  %2641 = vmatpush.msrb.mxu0 %v1918_v15  ;;  %v1917_v48 = vld [vmem:[%s9212_s2 + $0x4e8] sm:$0xff]  ;;  %v1906_v15 = vld [vmem:[%s9212_s2 + $0x490] sm:$0xff] }
 0x402   :  { %v2391_v28 = vperm.slane %v1327_v1, %v6955_v39  ;;  %2712 = vmatpush.msrb.mxu3 %v1801_v52  ;;  %2762 = vmatpush.msra.mxu2 %v1917_v48  ;;  %v1915_v1 = vld [vmem:[%s9212_s2 + $0x4d8] sm:$0xff] }
 0x403   :  { %v2485_v63 = vsel %vm2205_vm15, %v2484_v41, %v2483_v50  ;;  %2593 = vmatpush.msra.mxu1 %v1798_v54  ;;  %v1914_v41 = vld [vmem:[%s9212_s2 + $0x4d0] sm:$0xff]  ;;  %v10019_v50 = vld [vmem:[#allocation11_spill] sm:$0xff] }
 0x404   :  { %v2392_v45 = vsel %vm2205_vm15, %v2391_v28, %v2390_v38  ;;  %v7366_v59 = vsel %vm2548_vm7, %v2485_v63, %v2299_v2  ;;  %2713 = vmatpush.msrb.mxu3 %v1799_v23  ;;  %2763 = vmatpush.msra.mxu2 %v1915_v1  ;;  %v1910_v28 = vld [vmem:[%s9212_s2 + $0x4b0] sm:$0xff]  ;;  %v2994_v54 = vperm.slane %v10019_v50, %v6294_v42 }
 0x405   :  { %10018 = vst [vmem:[#allocation150_spill] sm:$0xff] %v7366_v59  ;;  %v2549_v5 = vsel %vm2548_vm7, %v2392_v45, %v2206_v40  ;;  %2637 = vmatmul.f32.vlgmr.msra.gmra.mxu3 %v7366_v59  ;;  %2594 = vmatpush.msra.mxu1 %v1796_v31  ;;  %v2993_v38 = vperm.slane %v10020_v27, %v6291_v32  ;;  %v1951_v40 = vld [vmem:[%s9212_s2 + $0x5f8] sm:$0xff]  ;;  %v1908_v31 = vld [vmem:[%s9212_s2 + $0x4a0] sm:$0xff] }
 0x406   :  { %2577 = vmatmul.f32.vlgmr.msra.gmra.mxu0 %v2549_v5  ;;  %2697 = vmatmul.f32.vlgmr.msrb.gmra.mxu2 %v2549_v5  ;;  %v1909_v5 = vld [vmem:[%s9212_s2 + $0x4a8] sm:$0xff] }
 0x407   :  { %2714 = vmatpush.msrb.mxu3 %v1797_v57  ;;  %2595 = vmatpush.msra.mxu1 %v1794_v44  ;;  %v2995_v57 = vsel %vm2149_vm1, %v2994_v54, %v2993_v38 }
 0x408   :  { %v7382_v12 = vpop.xlane.xlu2 %1083  ;;  %v1537_v26 = vpop.xlane.xlu1 %1536 }
 0x409   :  { %v2526_v51 = vperm.slane %v1537_v26, %v6319_v20  ;;  %v1495_v36 = vpop.xlane.xlu0 %1494  ;;  %2715 = vmatpush.msrb.mxu3 %v1795_v3  ;;  %2596 = vmatpush.msra.mxu1 %v1792_v49  ;;  %v1948_v26 = vld [vmem:[%s9212_s2 + $0x5e0] sm:$0xff]  ;;  %v1949_v3 = vld [vmem:[%s9212_s2 + $0x5e8] sm:$0xff]  ;;  %v2234_v1 = vperm.slane %v7382_v12, %v6930_v34 }
 0x40a   :  { %v2499_v7 = vperm.slane %v1495_v36, %v6403_v46  ;;  %v10021_v49 = vld [vmem:[#allocation7_spill] sm:$0xff]  ;;  %v10022_v36 = vld [vmem:[#allocation10_spill] sm:$0xff] }
 0x40b   :  { %v2527_v11 = vsel %vm2165_vm5, %v2526_v51, %v7243_v9  ;;  %2716 = vmatpush.msrb.mxu3 %v1793_v21  ;;  %v2996_v51 = vperm.slane %v10021_v49, %v6316_v13 }
 0x40c   :  { %v2500_v4 = vsel %vm10002_vm3, %v2499_v7, %v7253_v10  ;;  %v1916_v10 = vld [vmem:[%s9212_s2 + $0x4e0] sm:$0xff]  ;;  %v2998_v7 = vperm.slane %v10022_v36, %v6322_v24  ;;  %vm10024_vm3 = vcmask 261312   ;;  %v1898_v36 = vld [vmem:[%s9212_s2 + $0x450] sm:$0xff] }
 0x40d   :  { %2642 = vmatpush.msrb.mxu0 %v1916_v10  ;;  %2781 = vmatpush.msra.mxu3 %v1951_v40  ;;  %v1947_v10 = vld [vmem:[%s9212_s2 + $0x5d8] sm:$0xff]  ;;  %v2997_v48 = vsel %vm2153_vm2, %v2996_v51, %v2995_v57 }
 0x40f   :  { %2643 = vmatpush.msrb.mxu0 %v1914_v41  ;;  %2782 = vmatpush.msra.mxu3 %v1949_v3  ;;  %v1945_v41 = vld [vmem:[%s9212_s2 + $0x5c8] sm:$0xff] }
 0x410   :  { %v7405_v61 = vpop.xlane.xlu2 %1371  ;;  %v1252_v60 = vpop.xlane.xlu1 %1251 }
 0x411   :  { %v2342_v9 = vperm.slane %v1252_v60, %v6350_v58  ;;  %v1210_v6 = vpop.xlane.xlu0 %1209  ;;  %2644 = vmatpush.msrb.mxu0 %v1912_v14  ;;  %v2416_v60 = vperm.slane %v7171_v55, %v6618_v18  ;;  %v1904_v55 = vld [vmem:[%s9212_s2 + $0x480] sm:$0xff]  ;;  %2783 = vmatpush.msra.mxu3 %v1947_v10  ;;  %v1902_v14 = vld [vmem:[%s9212_s2 + $0x470] sm:$0xff] }
 0x412   :  { %v2315_v8 = vperm.slane %v1210_v6, %v6456_v25 }
 0x413   :  { %v7417_v62 = vsel %vm2169_vm6, %v2342_v9, %v7292_v29  ;;  %v1913_v29 = vld [vmem:[%s9212_s2 + $0x4c8] sm:$0xff]  ;;  %2645 = vmatpush.msrb.mxu0 %v1910_v28  ;;  %v2232_v9 = vperm.slane %v7220_v35, %v6654_v16  ;;  %v2418_v35 = vperm.slane %v7337_v56, %v6654_v16  ;;  %v2420_v56 = vperm.slane %v7405_v61, %v6930_v34  ;;  %v1942_v28 = vld [vmem:[%s9212_s2 + $0x5b0] sm:$0xff] }
 0x414   :  { %v7427_v52 = vsel %vm2177_vm8, %v2315_v8, %v7296_v33  ;;  %v1950_v33 = vld [vmem:[%s9212_s2 + $0x5f0] sm:$0xff]  ;;  %2764 = vmatpush.msra.mxu2 %v1913_v29  ;;  %v1944_v8 = vld [vmem:[%s9212_s2 + $0x5c0] sm:$0xff]  ;;  %v1903_v29 = vld [vmem:[%s9212_s2 + $0x478] sm:$0xff]  ;;  %2784 = vmatpush.msra.mxu3 %v1945_v41  ;;  %v2417_v50 = vsel %vm2193_vm12, %v2416_v60, %v7015_v17 }
 0x415   :  { %2661 = vmatpush.msrb.mxu1 %v1950_v33  ;;  %2646 = vmatpush.msrb.mxu0 %v1908_v31  ;;  %v2999_v33 = vsel %vm10024_vm3, %v2998_v7, %v2997_v48  ;;  %v2233_v54 = vsel %vm2197_vm13, %v2232_v9, %v7065_v30  ;;  %v1900_v17 = vld [vmem:[%s9212_s2 + $0x460] sm:$0xff]  ;;  %v1901_v30 = vld [vmem:[%s9212_s2 + $0x468] sm:$0xff]  ;;  %vm10025_vm3 = vcmask 523712   ;;  %v1899_v7 = vld [vmem:[%s9212_s2 + $0x458] sm:$0xff] }
 0x416   :  { %2765 = vmatpush.msra.mxu2 %v1911_v53  ;;  %v10023_v53 = vld [vmem:[#allocation6_spill] sm:$0xff]  ;;  %v1894_v41 = vld [vmem:[%s9212_s2 + $0x430] sm:$0xff]  ;;  %vm10031_vm0 = vmmov %vm10025_vm3 }
 0x417   :  { %2662 = vmatpush.msrb.mxu1 %v1948_v26  ;;  %2647 = vmatpush.msrb.mxu0 %v1906_v15  ;;  %v3000_v12 = vperm.slane %v10023_v53, %v6309_v47  ;;  %v1941_v26 = vld [vmem:[%s9212_s2 + $0x5a8] sm:$0xff]  ;;  %v1939_v60 = vld [vmem:[%s9212_s2 + $0x598] sm:$0xff]  ;;  %v1896_v9 = vld [vmem:[%s9212_s2 + $0x440] sm:$0xff] }
 0x418   :  { %v7448_v2 = vpop.xlane.xlu2 %1086  ;;  %v1540_v63 = vpop.xlane.xlu1 %1539  ;;  %2766 = vmatpush.msra.mxu2 %v1909_v5  ;;  %v2235_v5 = vsel %vm2201_vm14, %v2234_v1, %v2233_v54  ;;  %v1936_v48 = vld [vmem:[%s9212_s2 + $0x580] sm:$0xff]  ;;  %v1895_v1 = vld [vmem:[%s9212_s2 + $0x438] sm:$0xff] }
 0x419   :  { %v2528_v45 = vperm.slane %v1540_v63, %v6350_v58  ;;  %v1498_v23 = vpop.xlane.xlu0 %1497  ;;  %2648 = vmatpush.msrb.mxu0 %v1904_v55  ;;  %v2236_v61 = vperm.slane %v7448_v2, %v6955_v39  ;;  %v1943_v63 = vld [vmem:[%s9212_s2 + $0x5b8] sm:$0xff]  ;;  %v2419_v2 = vsel %vm2197_vm13, %v2418_v35, %v2417_v50  ;;  %v1897_v55 = vld [vmem:[%s9212_s2 + $0x448] sm:$0xff] }
 0x41a   :  { %v2501_v44 = vperm.slane %v1498_v23, %v6456_v25  ;;  %2767 = vmatpush.msra.mxu2 %v1907_v0  ;;  %2785 = vmatpush.msra.mxu3 %v1943_v63  ;;  %v2421_v57 = vsel %vm2201_vm14, %v2420_v56, %v2419_v2  ;;  %v1938_v0 = vld [vmem:[%s9212_s2 + $0x590] sm:$0xff]  ;;  %v1937_v35 = vld [vmem:[%s9212_s2 + $0x588] sm:$0xff]  ;;  %v1932_v63 = vld [vmem:[%s9212_s2 + $0x560] sm:$0xff] }
 0x41b   :  { %v7473_v21 = vsel %vm2169_vm6, %v2528_v45, %v2527_v11  ;;  %v1946_v11 = vld [vmem:[%s9212_s2 + $0x5d0] sm:$0xff]  ;;  %2649 = vmatpush.msrb.mxu0 %v1902_v14  ;;  %v2237_v49 = vsel %vm2205_vm15, %v2236_v61, %v2235_v5  ;;  %v1935_v61 = vld [vmem:[%s9212_s2 + $0x578] sm:$0xff]  ;;  %v1933_v2 = vld [vmem:[%s9212_s2 + $0x568] sm:$0xff] }
 0x41c   :  { %v7486_v6 = vsel %vm2177_vm8, %v2501_v44, %v2500_v4  ;;  %2663 = vmatpush.msrb.mxu1 %v1946_v11  ;;  %v1905_v4 = vld [vmem:[%s9212_s2 + $0x488] sm:$0xff]  ;;  %v1940_v44 = vld [vmem:[%s9212_s2 + $0x5a0] sm:$0xff]  ;;  %2786 = vmatpush.msra.mxu3 %v1941_v26  ;;  %v3001_v11 = vsel %vm2161_vm4, %v3000_v12, %v2999_v33  ;;  %v1934_v56 = vld [vmem:[%s9212_s2 + $0x570] sm:$0xff] }
 0x41d   :  { %2768 = vmatpush.msra.mxu2 %v1905_v4  ;;  %2650 = vmatpush.msrb.mxu0 %v1900_v17  ;;  %v10027_v4 = vld [vmem:[#allocation9_spill] sm:$0xff]  ;;  %v1888_v26 = vld [vmem:[%s9212_s2 + $0x400] sm:$0xff] }
 0x41e   :  { %2664 = vmatpush.msrb.mxu1 %v1944_v8  ;;  %v3002_v8 = vperm.slane %v10027_v4, %v6319_v20  ;;  %2787 = vmatpush.msra.mxu3 %v1939_v60  ;;  %v10028_v14 = vld [vmem:[#allocation13_spill] sm:$0xff] }
 0x41f   :  { %2769 = vmatpush.msra.mxu2 %v1903_v29  ;;  %2651 = vmatpush.msrb.mxu0 %v1898_v36  ;;  %v3006_v29 = vperm.slane %v10028_v14, %v6403_v46  ;;  %v1890_v17 = vld [vmem:[%s9212_s2 + $0x410] sm:$0xff]  ;;  %v1855_v36 = vld [vmem:[%s9212_s2 + $0x2f8] sm:$0xff] }
 0x420   :  { %v1375_v27 = vpop.xlane.xlu2 %1374  ;;  %v1255_v38 = vpop.xlane.xlu1 %1254  ;;  %2665 = vmatpush.msrb.mxu1 %v1942_v28  ;;  %v3003_v28 = vsel %vm2165_vm5, %v3002_v8, %v3001_v11  ;;  %2788 = vmatpush.msra.mxu3 %v1937_v35  ;;  %v10032_v5 = vld [vmem:[#allocation17_spill] sm:$0xff]  ;;  %v10036_v14 = vld [vmem:[#allocation28_spill] sm:$0xff] }
 0x421   :  { %v2422_v40 = vperm.slane %v1375_v27, %v6955_v39  ;;  %v2344_v45 = vperm.slane %v1255_v38, %v6403_v46  ;;  %v1213_v23 = vpop.xlane.xlu0 %1212  ;;  %2770 = vmatpush.msra.mxu2 %v1901_v30  ;;  %2652 = vmatpush.msrb.mxu0 %v1896_v9  ;;  %v1892_v27 = vld [vmem:[%s9212_s2 + $0x420] sm:$0xff]  ;;  %v1893_v38 = vld [vmem:[%s9212_s2 + $0x428] sm:$0xff]  ;;  %v1891_v30 = vld [vmem:[%s9212_s2 + $0x418] sm:$0xff] }
 0x422   :  { %v2317_v31 = vperm.slane %v1213_v23, %v6489_v37  ;;  %2666 = vmatpush.msrb.mxu1 %v1940_v44  ;;  %2789 = vmatpush.msra.mxu3 %v1935_v61  ;;  %v1931_v44 = vld [vmem:[%s9212_s2 + $0x558] sm:$0xff]  ;;  %v1926_v11 = vld [vmem:[%s9212_s2 + $0x530] sm:$0xff] }
 0x423   :  { %v7554_v3 = vsel %vm10025_vm3, %v2344_v45, %v7417_v62  ;;  %v2423_v51 = vsel %vm2205_vm15, %v2422_v40, %v2421_v57  ;;  %2771 = vmatpush.msra.mxu2 %v1899_v7  ;;  %2653 = vmatpush.msrb.mxu0 %v1894_v41  ;;  %v10029_v40 = vld [vmem:[#allocation12_spill] sm:$0xff]  ;;  %v3010_v57 = vperm.slane %v10032_v5, %v6489_v37 }
 0x424   :  { %v7566_v15 = vsel %vm2181_vm9, %v2317_v31, %v7427_v52  ;;  %v2550_v62 = vsel %vm2548_vm7, %v2423_v51, %v2237_v49  ;;  %v10026_v52 = vld [vmem:[#allocation14_spill] sm:$0xff]  ;;  %2667 = vmatpush.msrb.mxu1 %v1938_v0  ;;  %v3008_v45 = vperm.slane %v10029_v40, %v6456_v25  ;;  %2790 = vmatpush.msra.mxu3 %v1933_v2  ;;  %v1889_v49 = vld [vmem:[%s9212_s2 + $0x408] sm:$0xff] }
 0x425   :  { %v3004_v10 = vperm.slane %v10026_v52, %v6350_v58  ;;  %2597 = vmatmul.f32.vlgmr.msra.gmra.mxu1 %v2550_v62  ;;  %2717 = vmatmul.f32.vlgmr.msrb.gmra.mxu3 %v2550_v62  ;;  %v1928_v51 = vld [vmem:[%s9212_s2 + $0x540] sm:$0xff]  ;;  %v1929_v7 = vld [vmem:[%s9212_s2 + $0x548] sm:$0xff]  ;;  %v1662_v62 = vld [vmem:[%s9213_s1 + $0x2f0] sm:$0xff] }
 0x426   :  { %2772 = vmatpush.msra.mxu2 %v1897_v55  ;;  %2668 = vmatpush.msrb.mxu1 %v1936_v48  ;;  %v10033_v0 = vld [vmem:[#allocation16_spill] sm:$0xff] }
 0x427   :  { %v3005_v33 = vsel %vm2169_vm6, %v3004_v10, %v3003_v28  ;;  %2654 = vmatpush.msrb.mxu0 %v1892_v27  ;;  %2791 = vmatpush.msra.mxu3 %v1931_v44  ;;  %v3012_v60 = vperm.slane %v10033_v0, %v6522_v22  ;;  %v10034_v10 = vld [vmem:[#allocation23_spill] sm:$0xff]  ;;  %v10035_v48 = vld [vmem:[#allocation24_spill] sm:$0xff]  ;;  %v10037_v28 = vld [vmem:[#allocation50_spill] sm:$0xff] }
 0x428   :  { %v7604_v53 = vpop.xlane.xlu2 %1215  ;;  %v1543_v12 = vpop.xlane.xlu1 %1542  ;;  %2773 = vmatpush.msra.mxu2 %v1895_v1  ;;  %2669 = vmatpush.msrb.mxu1 %v1934_v56  ;;  %v3007_v31 = vsel %vm10031_vm0, %v3006_v29, %v3005_v33  ;;  %v3025_v55 = vperm.slane %v10034_v10, %v6294_v42  ;;  %v3024_v35 = vperm.slane %v10035_v48, %v6291_v32  ;;  %v1853_v41 = vld [vmem:[%s9212_s2 + $0x2e8] sm:$0xff]  ;;  %v1927_v1 = vld [vmem:[%s9212_s2 + $0x538] sm:$0xff]  ;;  %v1660_v56 = vld [vmem:[%s9213_s1 + $0x2e0] sm:$0xff]  ;;  %vm10046_vm0 = vcmask 261312  }
 0x429   :  { %v2530_v50 = vperm.slane %v1543_v12, %v6403_v46  ;;  %v7611_v54 = vpop.xlane.xlu0 %1500  ;;  %2655 = vmatpush.msrb.mxu0 %v1890_v17  ;;  %v3009_v9 = vsel %vm2177_vm8, %v3008_v45, %v3007_v31  ;;  %v3027_v29 = vperm.slane %v10036_v14, %v6316_v13  ;;  %v3056_v12 = vperm.slane %v10037_v28, %v6294_v42  ;;  %v10038_v33 = vld [vmem:[#allocation15_spill] sm:$0xff]  ;;  %v10039_v40 = vld [vmem:[#allocation20_spill] sm:$0xff]  ;;  %v10042_v44 = vld [vmem:[#allocation49_spill] sm:$0xff] }
 0x42a   :  { %2774 = vmatpush.msra.mxu2 %v1893_v38  ;;  %2670 = vmatpush.msrb.mxu1 %v1932_v63  ;;  %v3011_v52 = vsel %vm2181_vm9, %v3010_v57, %v3009_v9  ;;  %v1924_v27 = vld [vmem:[%s9212_s2 + $0x520] sm:$0xff]  ;;  %v1851_v38 = vld [vmem:[%s9212_s2 + $0x2d8] sm:$0xff]  ;;  %v1925_v63 = vld [vmem:[%s9212_s2 + $0x528] sm:$0xff]  ;;  %v3016_v45 = vperm.slane %v10039_v40, %v6618_v18  ;;  %v3026_v5 = vsel %vm2149_vm1, %v3025_v55, %v3024_v35 }
 0x42b   :  { %v7629_v23 = vsel %vm10025_vm3, %v2530_v50, %v7473_v21  ;;  %v1930_v21 = vld [vmem:[%s9212_s2 + $0x550] sm:$0xff]  ;;  %2656 = vmatpush.msrb.mxu0 %v1888_v26  ;;  %2792 = vmatpush.msra.mxu3 %v1929_v7  ;;  %v3014_v50 = vperm.slane %v10038_v33, %v6555_v19  ;;  %v3013_v2 = vsel %vm2185_vm10, %v3012_v60, %v3011_v52  ;;  %v10040_v17 = vld [vmem:[#allocation43_spill] sm:$0xff]  ;;  %v1847_v9 = vld [vmem:[%s9212_s2 + $0x2b8] sm:$0xff] }
 0x42c   :  { %10030 = vst [vmem:[#allocation137_spill] sm:$0xff] %v7629_v23  ;;  %2775 = vmatpush.msra.mxu2 %v1891_v30  ;;  %2671 = vmatpush.msrb.mxu1 %v1930_v21  ;;  %v3055_v30 = vperm.slane %v10040_v17, %v6291_v32  ;;  %v1658_v31 = vld [vmem:[%s9213_s1 + $0x2d0] sm:$0xff]  ;;  %v10041_v57 = vld [vmem:[#allocation27_spill] sm:$0xff]  ;;  %v3058_v26 = vperm.slane %v10042_v44, %v6316_v13  ;;  %vm10053_vm3 = vmmov %vm10046_vm0 }
 0x42d   :  { %2721 = vmatpush.msra.mxu0 %v1855_v36  ;;  %2793 = vmatpush.msra.mxu3 %v1927_v1  ;;  %v3029_v21 = vperm.slane %v10041_v57, %v6322_v24  ;;  %v1923_v36 = vld [vmem:[%s9212_s2 + $0x518] sm:$0xff]  ;;  %v3028_v7 = vsel %vm2153_vm2, %v3027_v29, %v3026_v5  ;;  %v1656_v0 = vld [vmem:[%s9213_s1 + $0x2c0] sm:$0xff]  ;;  %v3015_v10 = vsel %vm2189_vm11, %v3014_v50, %v3013_v2  ;;  %v1921_v55 = vld [vmem:[%s9212_s2 + $0x508] sm:$0xff] }
 0x42e   :  { %2776 = vmatpush.msra.mxu2 %v1889_v49  ;;  %2672 = vmatpush.msrb.mxu1 %v1928_v51  ;;  %v1922_v49 = vld [vmem:[%s9212_s2 + $0x510] sm:$0xff]  ;;  %v1849_v51 = vld [vmem:[%s9212_s2 + $0x2c8] sm:$0xff]  ;;  %v1920_v60 = vld [vmem:[%s9212_s2 + $0x500] sm:$0xff]  ;;  %v3017_v35 = vsel %vm2193_vm12, %v3016_v45, %v3015_v10 }
 0x42f   :  { %2722 = vmatpush.msra.mxu0 %v1853_v41  ;;  %2794 = vmatpush.msra.mxu3 %v1925_v63  ;;  %v1654_v48 = vld [vmem:[%s9213_s1 + $0x2b0] sm:$0xff]  ;;  %v10044_v41 = vld [vmem:[#allocation26_spill] sm:$0xff]  ;;  %v1845_v2 = vld [vmem:[%s9212_s2 + $0x2a8] sm:$0xff] }
 0x430   :  { %v7675_v4 = vpop.xlane.xlu2 %1545  ;;  %v7677_v8 = vpop.xlane.xlu1 %1503  ;;  %3417 = vmatpush.msrb.mxu2 %v1662_v62  ;;  %2673 = vmatpush.msrb.mxu1 %v1926_v11  ;;  %v3057_v62 = vsel %vm2149_vm1, %v3056_v12, %v3055_v30  ;;  %v10043_v11 = vld [vmem:[#allocation19_spill] sm:$0xff]  ;;  %v3031_v1 = vperm.slane %v10044_v41, %v6309_v47  ;;  %v1887_v29 = vld [vmem:[%s9212_s2 + $0x3f8] sm:$0xff]  ;;  %v1694_v28 = vld [vmem:[%s9213_s1 + $0x3f0] sm:$0xff]  ;;  %v3030_v12 = vsel %vm10046_vm0, %v3029_v21, %v3028_v7 }
 0x431   :  { %v7692_v61 = vpop.xlane.xlu0 %1257  ;;  %2723 = vmatpush.msra.mxu0 %v1851_v38  ;;  %v3018_v52 = vperm.slane %v10043_v11, %v6654_v16  ;;  %2795 = vmatpush.msra.mxu3 %v1923_v36  ;;  %v3059_v33 = vsel %vm2153_vm2, %v3058_v26, %v3057_v62  ;;  %v10047_v50 = vld [vmem:[#allocation54_spill] sm:$0xff]  ;;  %v10049_v30 = vld [vmem:[#allocation32_spill] sm:$0xff]  ;;  %v10050_v26 = vld [vmem:[#allocation71_spill] sm:$0xff] }
 0x432   :  { %3418 = vmatpush.msrb.mxu2 %v1660_v56  ;;  %2674 = vmatpush.msrb.mxu1 %v1924_v27  ;;  %v10045_v56 = vld [vmem:[#allocation48_spill] sm:$0xff]  ;;  %v3062_v27 = vperm.slane %v10047_v50, %v6309_v47  ;;  %v1652_v40 = vld [vmem:[%s9213_s1 + $0x2a0] sm:$0xff]  ;;  %v1843_v7 = vld [vmem:[%s9212_s2 + $0x298] sm:$0xff] }
 0x433   :  { %2724 = vmatpush.msra.mxu0 %v1849_v51  ;;  %v3060_v14 = vperm.slane %v10045_v56, %v6322_v24  ;;  %v10048_v45 = vld [vmem:[#allocation18_spill] sm:$0xff]  ;;  %2796 = vmatpush.msra.mxu3 %v1921_v55  ;;  %v1885_v57 = vld [vmem:[%s9212_s2 + $0x3e8] sm:$0xff]  ;;  %v7785_v44 = vsel %vm2197_vm13, %v3018_v52, %v3017_v35  ;;  %v1650_v62 = vld [vmem:[%s9213_s1 + $0x290] sm:$0xff] }
 0x434   :  { %3419 = vmatpush.msrb.mxu2 %v1658_v31  ;;  %2675 = vmatpush.msrb.mxu1 %v1922_v49  ;;  %v3020_v17 = vperm.slane %v10048_v45, %v6930_v34  ;;  %v3033_v31 = vperm.slane %v10049_v30, %v6319_v20  ;;  %v1692_v21 = vld [vmem:[%s9213_s1 + $0x3e0] sm:$0xff]  ;;  %v3087_v49 = vperm.slane %v10050_v26, %v6294_v42  ;;  %v10051_v51 = vld [vmem:[#allocation72_spill] sm:$0xff]  ;;  %v1883_v52 = vld [vmem:[%s9212_s2 + $0x3d8] sm:$0xff] }
 0x435   :  { %2725 = vmatpush.msra.mxu0 %v1847_v9  ;;  %v3086_v36 = vperm.slane %v10051_v51, %v6291_v32  ;;  %3437 = vmatpush.msrb.mxu3 %v1694_v28  ;;  %v3061_v11 = vsel %vm10053_vm3, %v3060_v14, %v3059_v33  ;;  %v1690_v10 = vld [vmem:[%s9213_s1 + $0x3d0] sm:$0xff]  ;;  %v10054_v55 = vld [vmem:[#allocation31_spill] sm:$0xff]  ;;  %v10057_v33 = vld [vmem:[#allocation70_spill] sm:$0xff]  ;;  %vm10069_vm3 = vcmask 523712  }
 0x436   :  { %3420 = vmatpush.msrb.mxu2 %v1656_v0  ;;  %2676 = vmatpush.msrb.mxu1 %v1920_v60  ;;  %v3032_v0 = vsel %vm2161_vm4, %v3031_v1, %v3030_v12  ;;  %v10052_v60 = vld [vmem:[#allocation53_spill] sm:$0xff]  ;;  %v3063_v35 = vsel %vm2161_vm4, %v3062_v27, %v3061_v11  ;;  %v10055_v41 = vld [vmem:[#allocation171_spill] sm:$0xff]  ;;  %v10056_v28 = vld [vmem:[#allocation52_spill] sm:$0xff]  ;;  %v3089_v50 = vperm.slane %v10057_v33, %v6316_v13 }
 0x437   :  { %v3064_v9 = vperm.slane %v10052_v60, %v6319_v20  ;;  %2726 = vmatpush.msra.mxu0 %v1845_v2  ;;  %v3242_v1 = vperm.slane %v10055_v41, %v6294_v42  ;;  %3438 = vmatpush.msrb.mxu3 %v1692_v21  ;;  %v1841_v56 = vld [vmem:[%s9212_s2 + $0x288] sm:$0xff]  ;;  %v1648_v14 = vld [vmem:[%s9213_s1 + $0x280] sm:$0xff]  ;;  %v3066_v12 = vperm.slane %v10056_v28, %v6350_v58  ;;  %v1839_v26 = vld [vmem:[%s9212_s2 + $0x278] sm:$0xff] }
 0x438   :  { %v7762_v38 = vpop.xlane.xlu2 %1506  ;;  %v7764_v63 = vpop.xlane.xlu1 %1260  ;;  %3421 = vmatpush.msrb.mxu2 %v1654_v48  ;;  %2741 = vmatpush.msra.mxu1 %v1887_v29  ;;  %v3035_v48 = vperm.slane %v10054_v55, %v6350_v58  ;;  %v3034_v29 = vsel %vm2165_vm5, %v3033_v31, %v3032_v0  ;;  %v1881_v27 = vld [vmem:[%s9212_s2 + $0x3c8] sm:$0xff]  ;;  %v1688_v2 = vld [vmem:[%s9213_s1 + $0x3c0] sm:$0xff]  ;;  %v1646_v51 = vld [vmem:[%s9213_s1 + $0x270] sm:$0xff] }
 0x439   :  { %v7776_v5 = vpop.xlane.xlu0 %1218  ;;  %2727 = vmatpush.msra.mxu0 %v1843_v7  ;;  %v10058_v30 = vld [vmem:[#allocation75_spill] sm:$0xff]  ;;  %3439 = vmatpush.msrb.mxu3 %v1690_v10  ;;  %v10060_v7 = vld [vmem:[#allocation30_spill] sm:$0xff]  ;;  %v1686_v11 = vld [vmem:[%s9213_s1 + $0x3b0] sm:$0xff] }
 0x43a   :  { %3422 = vmatpush.msrb.mxu2 %v1652_v40  ;;  %2742 = vmatpush.msra.mxu1 %v1885_v57  ;;  %v3088_v40 = vsel %vm2149_vm1, %v3087_v49, %v3086_v36  ;;  %v3091_v31 = vperm.slane %v10058_v30, %v6322_v24  ;;  %v10059_v57 = vld [vmem:[#allocation164_spill] sm:$0xff]  ;;  %v3065_v49 = vsel %vm2165_vm5, %v3064_v9, %v3063_v35  ;;  %v10061_v36 = vld [vmem:[#allocation170_spill] sm:$0xff]  ;;  %v10062_v10 = vld [vmem:[#allocation59_spill] sm:$0xff] }
 0x43b   :  { %v3241_v21 = vperm.slane %v10059_v57, %v6291_v32  ;;  %v3244_v0 = vperm.slane %v10061_v36, %v6316_v13  ;;  %2728 = vmatpush.msra.mxu0 %v1841_v56  ;;  %v1879_v60 = vld [vmem:[%s9212_s2 + $0x3b8] sm:$0xff]  ;;  %v3068_v55 = vperm.slane %v10062_v10, %v6403_v46  ;;  %3440 = vmatpush.msrb.mxu3 %v1688_v2  ;;  %v1837_v56 = vld [vmem:[%s9212_s2 + $0x268] sm:$0xff]  ;;  %v1684_v2 = vld [vmem:[%s9213_s1 + $0x3a0] sm:$0xff] }
 0x43c   :  { %3423 = vmatpush.msrb.mxu2 %v1650_v62  ;;  %2743 = vmatpush.msra.mxu1 %v1883_v52  ;;  %v3037_v62 = vperm.slane %v10060_v7, %v6403_v46  ;;  %v3036_v52 = vsel %vm2169_vm6, %v3035_v48, %v3034_v29  ;;  %v10063_v48 = vld [vmem:[#allocation36_spill] sm:$0xff]  ;;  %v10064_v28 = vld [vmem:[#allocation74_spill] sm:$0xff]  ;;  %v3090_v33 = vsel %vm2153_vm2, %v3089_v50, %v3088_v40  ;;  %v10066_v7 = vld [vmem:[#allocation169_spill] sm:$0xff] }
 0x43d   :  { %v3243_v9 = vsel %vm2149_vm1, %v3242_v1, %v3241_v21  ;;  %v3039_v29 = vperm.slane %v10063_v48, %v6456_v25  ;;  %v3093_v1 = vperm.slane %v10064_v28, %v6309_v47  ;;  %2729 = vmatpush.msra.mxu0 %v1839_v26  ;;  %v3067_v57 = vsel %vm2169_vm6, %v3066_v12, %v3065_v49  ;;  %v1835_v50 = vld [vmem:[%s9212_s2 + $0x258] sm:$0xff]  ;;  %v1642_v40 = vld [vmem:[%s9213_s1 + $0x250] sm:$0xff] }
 0x43e   :  { %3424 = vmatpush.msrb.mxu2 %v1648_v14  ;;  %2744 = vmatpush.msra.mxu1 %v1881_v27  ;;  %v1644_v14 = vld [vmem:[%s9213_s1 + $0x260] sm:$0xff]  ;;  %v1877_v27 = vld [vmem:[%s9212_s2 + $0x3a8] sm:$0xff]  ;;  %v3092_v21 = vsel %vm10046_vm0, %v3091_v31, %v3090_v33  ;;  %v3246_v36 = vperm.slane %v10066_v7, %v6322_v24  ;;  %v3245_v12 = vsel %vm2153_vm2, %v3244_v0, %v3243_v9  ;;  %vm10070_vm0 = vmmov %vm10069_vm3 }
 0x43f   :  { %3441 = vmatpush.msrb.mxu3 %v1686_v11  ;;  %v10067_v26 = vld [vmem:[#allocation58_spill] sm:$0xff]  ;;  %v10068_v31 = vld [vmem:[#allocation175_spill] sm:$0xff]  ;;  %2730 = vmatpush.msra.mxu0 %v1837_v56  ;;  %v1682_v11 = vld [vmem:[%s9213_s1 + $0x390] sm:$0xff]  ;;  %v3038_v10 = vsel %vm10069_vm3, %v3037_v62, %v3036_v52  ;;  %v3069_v48 = vsel %vm10070_vm0, %v3068_v55, %v3067_v57  ;;  %v3094_v62 = vsel %vm2161_vm4, %v3093_v1, %v3092_v21  ;;  %vm10075_vm3 = vcmask 261312  }
 0x440   :  { %v7855_v35 = vpop.xlane.xlu2 %1263  ;;  %v7857_v41 = vpop.xlane.xlu1 %1221  ;;  %3425 = vmatpush.msrb.mxu2 %v1646_v51  ;;  %2745 = vmatpush.msra.mxu1 %v1879_v60  ;;  %v3070_v51 = vperm.slane %v10067_v26, %v6456_v25  ;;  %v3248_v49 = vperm.slane %v10068_v31, %v6309_v47  ;;  %v1875_v60 = vld [vmem:[%s9212_s2 + $0x398] sm:$0xff]  ;;  %v1833_v9 = vld [vmem:[%s9212_s2 + $0x248] sm:$0xff]  ;;  %v1640_v56 = vld [vmem:[%s9213_s1 + $0x240] sm:$0xff]  ;;  %v3040_v57 = vsel %vm2177_vm8, %v3039_v29, %v3038_v10 }
 0x441   :  { %v7870_v30 = vpop.xlane.xlu0 %1548  ;;  %v10071_v28 = vld [vmem:[#allocation73_spill] sm:$0xff]  ;;  %3442 = vmatpush.msrb.mxu3 %v1684_v2  ;;  %v10073_v52 = vld [vmem:[#allocation78_spill] sm:$0xff]  ;;  %2731 = vmatpush.msra.mxu0 %v1835_v50  ;;  %v3247_v1 = vsel %vm10075_vm3, %v3246_v36, %v3245_v12  ;;  %vm10087_vm3 = vmmov %vm10070_vm0 }
 0x442   :  { %10065 = vst [vmem:[#allocation46_spill] sm:$0xff] %v7870_v30  ;;  %3426 = vmatpush.msrb.mxu2 %v1644_v14  ;;  %v3095_v0 = vperm.slane %v10071_v28, %v6319_v20  ;;  %2746 = vmatpush.msra.mxu1 %v1877_v27  ;;  %v10072_v14 = vld [vmem:[#allocation35_spill] sm:$0xff]  ;;  %v3097_v55 = vperm.slane %v10073_v52, %v6350_v58  ;;  %v10074_v7 = vld [vmem:[#allocation174_spill] sm:$0xff]  ;;  %v1638_v50 = vld [vmem:[%s9213_s1 + $0x230] sm:$0xff] }
 0x443   :  { %v3041_v33 = vperm.slane %v10072_v14, %v6489_v37  ;;  %v1873_v27 = vld [vmem:[%s9212_s2 + $0x388] sm:$0xff]  ;;  %v1680_v2 = vld [vmem:[%s9213_s1 + $0x380] sm:$0xff]  ;;  %v3250_v26 = vperm.slane %v10074_v7, %v6319_v20  ;;  %3443 = vmatpush.msrb.mxu3 %v1682_v11  ;;  %v1831_v21 = vld [vmem:[%s9212_s2 + $0x238] sm:$0xff]  ;;  %v3071_v29 = vsel %vm2177_vm8, %v3070_v51, %v3069_v48  ;;  %v3249_v10 = vsel %vm2161_vm4, %v3248_v49, %v3247_v1 }
 0x444   :  { %3427 = vmatpush.msrb.mxu2 %v1642_v40  ;;  %2747 = vmatpush.msra.mxu1 %v1875_v60  ;;  %v10076_v40 = vld [vmem:[#allocation57_spill] sm:$0xff]  ;;  %v10077_v60 = vld [vmem:[#allocation63_spill] sm:$0xff]  ;;  %v3096_v51 = vsel %vm2165_vm5, %v3095_v0, %v3094_v62 }
 0x445   :  { %v3072_v31 = vperm.slane %v10076_v40, %v6489_v37  ;;  %2732 = vmatpush.msra.mxu0 %v1833_v9  ;;  %v1871_v36 = vld [vmem:[%s9212_s2 + $0x378] sm:$0xff]  ;;  %v1678_v12 = vld [vmem:[%s9213_s1 + $0x370] sm:$0xff]  ;;  %v3074_v11 = vperm.slane %v10077_v60, %v6522_v22  ;;  %3444 = vmatpush.msrb.mxu3 %v1680_v2  ;;  %v1829_v9 = vld [vmem:[%s9212_s2 + $0x228] sm:$0xff]  ;;  %v3098_v52 = vsel %vm2169_vm6, %v3097_v55, %v3096_v51 }
 0x446   :  { %3428 = vmatpush.msrb.mxu2 %v1640_v56  ;;  %v10078_v28 = vld [vmem:[#allocation77_spill] sm:$0xff]  ;;  %2748 = vmatpush.msra.mxu1 %v1873_v27  ;;  %v1636_v56 = vld [vmem:[%s9213_s1 + $0x220] sm:$0xff]  ;;  %v1869_v62 = vld [vmem:[%s9212_s2 + $0x368] sm:$0xff]  ;;  %v7971_v55 = vsel %vm2201_vm14, %v3020_v17, %v7785_v44  ;;  %v3042_v17 = vsel %vm2181_vm9, %v3041_v33, %v3040_v57 }
 0x447   :  { %v3099_v14 = vperm.slane %v10078_v28, %v6403_v46  ;;  %v10080_v7 = vld [vmem:[#allocation173_spill] sm:$0xff]  ;;  %2733 = vmatpush.msra.mxu0 %v1831_v21  ;;  %v1676_v27 = vld [vmem:[%s9213_s1 + $0x360] sm:$0xff]  ;;  %v3251_v21 = vsel %vm2165_vm5, %v3250_v26, %v3249_v10  ;;  %3445 = vmatpush.msrb.mxu3 %v1678_v12  ;;  %v3073_v26 = vsel %vm2181_vm9, %v3072_v31, %v3071_v29  ;;  %v1825_v31 = vld [vmem:[%s9212_s2 + $0x208] sm:$0xff] }
 0x448   :  { %v7945_v48 = vpop.xlane.xlu2 %1224  ;;  %v7947_v49 = vpop.xlane.xlu1 %1551  ;;  %v3252_v1 = vperm.slane %v10080_v7, %v6350_v58  ;;  %3429 = vmatpush.msrb.mxu2 %v1638_v50  ;;  %v10081_v2 = vld [vmem:[#allocation34_spill] sm:$0xff]  ;;  %v10082_v50 = vld [vmem:[#allocation180_spill] sm:$0xff]  ;;  %2749 = vmatpush.msra.mxu1 %v1871_v36  ;;  %v3075_v12 = vsel %vm2185_vm10, %v3074_v11, %v3073_v26  ;;  %v10086_v11 = vld [vmem:[#allocation179_spill] sm:$0xff] }
 0x449   :  { %10079 = vst [vmem:[#allocation5_spill] sm:$0xff] %v7947_v49  ;;  %v7958_v0 = vpop.xlane.xlu0 %1509  ;;  %v3043_v40 = vperm.slane %v10081_v2, %v6522_v22  ;;  %v3254_v60 = vperm.slane %v10082_v50, %v6403_v46  ;;  %v1827_v28 = vld [vmem:[%s9212_s2 + $0x218] sm:$0xff]  ;;  %v1634_v45 = vld [vmem:[%s9213_s1 + $0x210] sm:$0xff]  ;;  %2734 = vmatpush.msra.mxu0 %v1829_v9  ;;  %v3100_v57 = vsel %vm10070_vm0, %v3099_v14, %v3098_v52  ;;  %v1632_v29 = vld [vmem:[%s9213_s1 + $0x200] sm:$0xff]  ;;  %vm10107_vm0 = vcmask 261312  }
 0x44a   :  { %v10083_v44 = vld [vmem:[#allocation62_spill] sm:$0xff]  ;;  %3430 = vmatpush.msrb.mxu2 %v1636_v56  ;;  %v1674_v36 = vld [vmem:[%s9213_s1 + $0x350] sm:$0xff]  ;;  %2750 = vmatpush.msra.mxu1 %v1869_v62  ;;  %v3256_v2 = vperm.slane %v10086_v11, %v6456_v25  ;;  %v3253_v50 = vsel %vm2169_vm6, %v3252_v1, %v3251_v21  ;;  %v1865_v14 = vld [vmem:[%s9212_s2 + $0x348] sm:$0xff] }
 0x44b   :  { %v3076_v51 = vperm.slane %v10083_v44, %v6555_v19  ;;  %v1867_v10 = vld [vmem:[%s9212_s2 + $0x358] sm:$0xff]  ;;  %v10084_v7 = vld [vmem:[#allocation76_spill] sm:$0xff]  ;;  %3446 = vmatpush.msrb.mxu3 %v1676_v27  ;;  %2735 = vmatpush.msra.mxu0 %v1827_v28  ;;  %v3255_v52 = vsel %vm10087_vm3, %v3254_v60, %v3253_v50  ;;  %v1672_v1 = vld [vmem:[%s9213_s1 + $0x340] sm:$0xff] }
 0x44c   :  { %v3101_v33 = vperm.slane %v10084_v7, %v6456_v25  ;;  %v10085_v9 = vld [vmem:[#allocation81_spill] sm:$0xff]  ;;  %3431 = vmatpush.msrb.mxu2 %v1634_v45  ;;  %v10088_v62 = vld [vmem:[#allocation192_spill] sm:$0xff]  ;;  %2751 = vmatpush.msra.mxu1 %v1867_v10  ;;  %v8023_v45 = vsel %vm2185_vm10, %v3043_v40, %v3042_v17  ;;  %v10116_v49 = vld [vmem:[#allocation66_spill] sm:$0xff] }
 0x44d   :  { %v3103_v56 = vperm.slane %v10085_v9, %v6489_v37  ;;  %v3273_v27 = vperm.slane %v10088_v62, %v6294_v42  ;;  %v10089_v44 = vld [vmem:[#allocation193_spill] sm:$0xff]  ;;  %3447 = vmatpush.msrb.mxu3 %v1674_v36  ;;  %2736 = vmatpush.msra.mxu0 %v1825_v31  ;;  %v3077_v36 = vsel %vm2189_vm11, %v3076_v51, %v3075_v12  ;;  %v10092_v9 = vld [vmem:[#allocation80_spill] sm:$0xff]  ;;  %vm10125_vm3 = vmmov %vm10107_vm0 }
 0x44e   :  { %v3272_v26 = vperm.slane %v10089_v44, %v6291_v32  ;;  %v10090_v21 = vld [vmem:[#allocation25_spill] sm:$0xff]  ;;  %3432 = vmatpush.msrb.mxu2 %v1632_v29  ;;  %v3105_v11 = vperm.slane %v10092_v9, %v6522_v22  ;;  %v3102_v50 = vsel %vm2177_vm8, %v3101_v33, %v3100_v57  ;;  %2752 = vmatpush.msra.mxu1 %v1865_v14  ;;  %v10094_v29 = vld [vmem:[#allocation178_spill] sm:$0xff]  ;;  %v10095_v44 = vld [vmem:[#allocation191_spill] sm:$0xff] }
 0x44f   :  { %v10091_v60 = vld [vmem:[#allocation61_spill] sm:$0xff]  ;;  %3448 = vmatpush.msrb.mxu3 %v1672_v1  ;;  %v3104_v31 = vsel %vm2181_vm9, %v3103_v56, %v3102_v50  ;;  %v3258_v51 = vperm.slane %v10094_v29, %v6489_v37  ;;  %v3257_v12 = vsel %vm2177_vm8, %v3256_v2, %v3255_v52  ;;  %v3275_v33 = vperm.slane %v10095_v44, %v6316_v13  ;;  %v10098_v9 = vld [vmem:[#allocation196_spill] sm:$0xff]  ;;  %v1668_v2 = vld [vmem:[%s9213_s1 + $0x320] sm:$0xff] }
 0x450   :  { %v3078_v7 = vperm.slane %v10091_v60, %v6618_v18  ;;  %v1863_v10 = vld [vmem:[%s9212_s2 + $0x338] sm:$0xff]  ;;  %v8034_v62 = vpop.xlane.xlu2 %1554  ;;  %v8036_v40 = vpop.xlane.xlu1 %1512  ;;  %v1670_v17 = vld [vmem:[%s9213_s1 + $0x330] sm:$0xff]  ;;  %v3274_v1 = vsel %vm2149_vm1, %v3273_v27, %v3272_v26  ;;  %v3277_v28 = vperm.slane %v10098_v9, %v6322_v24  ;;  %v1861_v56 = vld [vmem:[%s9212_s2 + $0x328] sm:$0xff]  ;;  %v3106_v43 = vsel %vm2185_vm10, %v3105_v11, %v3104_v31 }
 0x451   :  { %10093 = vst [vmem:[#allocation167_spill] sm:$0xff] %v8034_v62  ;;  %v8047_v57 = vpop.xlane.xlu0 %1266  ;;  %v10097_v60 = vld [vmem:[#allocation184_spill] sm:$0xff]  ;;  %2753 = vmatpush.msra.mxu1 %v1863_v10  ;;  %3449 = vmatpush.msrb.mxu3 %v1670_v17  ;;  %v10100_v29 = vld [vmem:[#allocation41_spill] sm:$0xff]  ;;  %v10102_v10 = vld [vmem:[#allocation79_spill] sm:$0xff]  ;;  %v3259_v23 = vsel %vm2181_vm9, %v3258_v51, %v3257_v12 }
 0x452   :  { %10096 = vst [vmem:[#allocation51_spill] sm:$0xff] %v8047_v57  ;;  %v3260_v14 = vperm.slane %v10097_v60, %v6522_v22  ;;  %v10099_v52 = vld [vmem:[#allocation40_spill] sm:$0xff]  ;;  %v3045_v44 = vperm.slane %v10100_v29, %v6555_v19  ;;  %v3107_v17 = vperm.slane %v10102_v10, %v6555_v19  ;;  %v10103_v60 = vld [vmem:[#allocation67_spill] sm:$0xff]  ;;  %v3079_v59 = vsel %vm2193_vm12, %v3078_v7, %v3077_v36  ;;  %v10106_v11 = vld [vmem:[#allocation85_spill] sm:$0xff] }
 0x453   :  { %v3047_v50 = vperm.slane %v10099_v52, %v6618_v18  ;;  %v10101_v27 = vld [vmem:[#allocation68_spill] sm:$0xff]  ;;  %v3082_v9 = vperm.slane %v10103_v60, %v6930_v34  ;;  %2754 = vmatpush.msra.mxu1 %v1861_v56  ;;  %3450 = vmatpush.msrb.mxu3 %v1668_v2  ;;  %v1859_v52 = vld [vmem:[%s9212_s2 + $0x318] sm:$0xff]  ;;  %v10105_v60 = vld [vmem:[#allocation195_spill] sm:$0xff]  ;;  %v3276_v36 = vsel %vm2153_vm2, %v3275_v33, %v3274_v1 }
 0x454   :  { %v3080_v26 = vperm.slane %v10101_v27, %v6654_v16  ;;  %v1666_v29 = vld [vmem:[%s9213_s1 + $0x310] sm:$0xff]  ;;  %v10104_v27 = vld [vmem:[#allocation183_spill] sm:$0xff]  ;;  %v3279_v7 = vperm.slane %v10105_v60, %v6309_v47  ;;  %v3109_v31 = vperm.slane %v10106_v11, %v6618_v18  ;;  %v3261_v56 = vsel %vm2185_vm10, %v3260_v14, %v3259_v23  ;;  %v10108_v1 = vld [vmem:[#allocation126_spill] sm:$0xff] }
 0x455   :  { %v3262_v10 = vperm.slane %v10104_v27, %v6555_v19  ;;  %v3278_v2 = vsel %vm10107_vm0, %v3277_v28, %v3276_v36  ;;  %2755 = vmatpush.msra.mxu1 %v1859_v52  ;;  %3451 = vmatpush.msrb.mxu3 %v1666_v29  ;;  %v1857_v27 = vld [vmem:[%s9212_s2 + $0x308] sm:$0xff]  ;;  %v1664_v51 = vld [vmem:[%s9213_s1 + $0x300] sm:$0xff]  ;;  %v3108_v33 = vsel %vm2189_vm11, %v3107_v17, %v3106_v43  ;;  %vm10129_vm0 = vcmask 523712  }
 0x456   :  { %v3081_v12 = vsel %vm2197_vm13, %v3080_v26, %v3079_v59  ;;  %v3180_v60 = vperm.slane %v10108_v1, %v6294_v42  ;;  %v10109_v23 = vld [vmem:[#allocation127_spill] sm:$0xff]  ;;  %v10110_v14 = vld [vmem:[#allocation84_spill] sm:$0xff]  ;;  %v10111_v29 = vld [vmem:[#allocation182_spill] sm:$0xff]  ;;  %v3280_v1 = vsel %vm2161_vm4, %v3279_v7, %v3278_v2 }
 0x457   :  { %v3179_v28 = vperm.slane %v10109_v23, %v6291_v32  ;;  %v3111_v52 = vperm.slane %v10110_v14, %v6654_v16  ;;  %v3264_v36 = vperm.slane %v10111_v29, %v6618_v18  ;;  %v10112_v11 = vld [vmem:[#allocation194_spill] sm:$0xff]  ;;  %2756 = vmatpush.msra.mxu1 %v1857_v27  ;;  %3452 = vmatpush.msrb.mxu3 %v1664_v51  ;;  %v10114_v26 = vld [vmem:[#allocation189_spill] sm:$0xff]  ;;  %v10115_v23 = vld [vmem:[#allocation199_spill] sm:$0xff] }
 0x458   :  { %v3281_v62 = vperm.slane %v10112_v11, %v6319_v20  ;;  %v8106_v57 = vpop.xlane.xlu2 %1515  ;;  %v8108_v59 = vpop.xlane.xlu1 %1269  ;;  %v3263_v43 = vsel %vm2189_vm11, %v3262_v10, %v3261_v56  ;;  %v3266_v17 = vperm.slane %v10114_v26, %v6654_v16  ;;  %v3283_v14 = vperm.slane %v10115_v23, %v6350_v58  ;;  %v10117_v10 = vld [vmem:[#allocation125_spill] sm:$0xff]  ;;  %v10118_v51 = vld [vmem:[#allocation83_spill] sm:$0xff]  ;;  %v10119_v2 = vld [vmem:[#allocation130_spill] sm:$0xff] }
 0x459   :  { %10113 = vst [vmem:[#allocation29_spill] sm:$0xff] %v8108_v59  ;;  %v8116_v29 = vpop.xlane.xlu0 %1227  ;;  %v3046_v11 = vsel %vm2189_vm11, %v3045_v44, %v8023_v45  ;;  %v3084_v59 = vperm.slane %v10116_v49, %v6955_v39  ;;  %v3110_v27 = vsel %vm2193_vm12, %v3109_v31, %v3108_v33  ;;  %v3182_v56 = vperm.slane %v10117_v10, %v6316_v13  ;;  %v10120_v45 = vld [vmem:[#allocation188_spill] sm:$0xff]  ;;  %v10121_v31 = vld [vmem:[#allocation198_spill] sm:$0xff] }
 0x45a   :  { %v3113_v26 = vperm.slane %v10118_v51, %v6930_v34  ;;  %v3181_v7 = vsel %vm2149_vm1, %v3180_v60, %v3179_v28  ;;  %v3184_v23 = vperm.slane %v10119_v2, %v6322_v24  ;;  %v3083_v30 = vsel %vm2201_vm14, %v3082_v9, %v3081_v12  ;;  %v10123_v28 = vld [vmem:[#allocation39_spill] sm:$0xff] }
 0x45b   :  { %v3268_v44 = vperm.slane %v10120_v45, %v6930_v34  ;;  %v3265_v49 = vsel %vm2193_vm12, %v3264_v36, %v3263_v43  ;;  %v3285_v33 = vperm.slane %v10121_v31, %v6403_v46  ;;  %v3282_v10 = vsel %vm2165_vm5, %v3281_v62, %v3280_v1  ;;  %v10124_v62 = vld [vmem:[#allocation129_spill] sm:$0xff]  ;;  %v10128_v45 = vld [vmem:[#allocation88_spill] sm:$0xff] }
 0x45c   :  { %v3112_v13 = vsel %vm2197_vm13, %v3111_v52, %v3110_v27  ;;  %v3267_v51 = vsel %vm2197_vm13, %v3266_v17, %v3265_v49  ;;  %v3284_v60 = vsel %vm2169_vm6, %v3283_v14, %v3282_v10  ;;  %v10122_v9 = vperm.slane %v10090_v21, %v6955_v39  ;;  %v10126_v14 = vld [vmem:[#allocation187_spill] sm:$0xff]  ;;  %v10127_v21 = vld [vmem:[#allocation197_spill] sm:$0xff] }
 0x45d   :  { %v8150_v43 = vsel %vm2193_vm12, %v3047_v50, %v3046_v11  ;;  %v3186_v52 = vperm.slane %v10124_v62, %v6309_v47  ;;  %v3183_v17 = vsel %vm2153_vm2, %v3182_v56, %v3181_v7  ;;  %v3270_v27 = vperm.slane %v10126_v14, %v6955_v39 }
 0x45e   :  { %v8145_v12 = vsel %vm2205_vm15, %v10122_v9, %v7971_v55  ;;  %v3185_v1 = vsel %vm10125_vm3, %v3184_v23, %v3183_v17  ;;  %v3287_v55 = vperm.slane %v10127_v21, %v6456_v25  ;;  %v8161_v2 = vsel %vm2205_vm15, %v3084_v59, %v3083_v30  ;;  %v10130_v23 = vld [vmem:[#allocation89_spill] sm:$0xff]  ;;  %v10131_v9 = vld [vmem:[#allocation90_spill] sm:$0xff]  ;;  %v10132_v59 = vld [vmem:[#allocation128_spill] sm:$0xff] }
 0x45f   :  { %v3286_v11 = vsel %vm10129_vm0, %v3285_v33, %v3284_v60  ;;  %v3269_v56 = vsel %vm2201_vm14, %v3268_v44, %v3267_v51  ;;  %v8170_v7 = vsel %vm2201_vm14, %v3113_v26, %v3112_v13  ;;  %v3188_v62 = vperm.slane %v10132_v59, %v6319_v20  ;;  %v10133_v17 = vld [vmem:[#allocation202_spill] sm:$0xff]  ;;  %v10134_v13 = vld [vmem:[#allocation133_spill] sm:$0xff]  ;;  %v10135_v21 = vld [vmem:[#allocation143_spill] sm:$0xff] }
 0x460   :  { %v8166_v49 = vpop.xlane.xlu2 %1272  ;;  %v1231_v31 = vpop.xlane.xlu1 %1230  ;;  %v3289_v33 = vperm.slane %v10133_v17, %v6489_v37  ;;  %v8183_v14 = vsel %vm2161_vm4, %v3186_v52, %v3185_v1  ;;  %v3190_v26 = vperm.slane %v10134_v13, %v6350_v58  ;;  %v2319_v44 = vperm.slane %v7604_v53, %v6522_v22  ;;  %v10136_v1 = vld [vmem:[#allocation201_spill] sm:$0xff]  ;;  %v1589_v13 = vld [vmem:[%s9213_s1 + $0xa8] sm:$0xff]  ;;  %vm10156_vm3 = vmmov %vm10129_vm0 }
 0x461   :  { %v8180_v60 = vpop.xlane.xlu0 %1557  ;;  %v2503_v51 = vperm.slane %v7611_v54, %v6489_v37  ;;  %v3211_v36 = vperm.slane %v10135_v21, %v6294_v42  ;;  %v3288_v30 = vsel %vm2177_vm8, %v3287_v55, %v3286_v11  ;;  %v2505_v17 = vperm.slane %v7677_v8, %v6522_v22  ;;  %v1591_v59 = vld [vmem:[%s9213_s1 + $0xb8] sm:$0xff] }
 0x462   :  { %v8197_v52 = vsel %vm2205_vm15, %v3270_v27, %v3269_v56  ;;  %v3291_v50 = vperm.slane %v10136_v1, %v6522_v22  ;;  %v2346_v53 = vperm.slane %v7692_v61, %v6456_v25  ;;  %v2507_v54 = vperm.slane %v7762_v38, %v6555_v19 }
 0x463   :  { %v2321_v10 = vperm.slane %v7776_v5, %v6555_v19  ;;  %v3290_v55 = vsel %vm2181_vm9, %v3289_v33, %v3288_v30  ;;  %v2348_v8 = vperm.slane %v7764_v63, %v6489_v37  ;;  %v2323_v27 = vperm.slane %v7857_v41, %v6618_v18 }
 0x464   :  { %v2509_v11 = vperm.slane %v7958_v0, %v6618_v18  ;;  %v2320_v61 = vsel %vm2185_vm10, %v2319_v44, %v7566_v15  ;;  %v2504_v38 = vsel %vm2181_vm9, %v2503_v51, %v7486_v6  ;;  %v2325_v5 = vperm.slane %v7945_v48, %v6654_v16 }
 0x465   :  { %v2511_v56 = vperm.slane %v8036_v40, %v6654_v16  ;;  %v2532_v63 = vperm.slane %v7675_v4, %v6456_v25  ;;  %v2506_v41 = vsel %vm2185_vm10, %v2505_v17, %v2504_v38  ;;  %v2513_v0 = vperm.slane %v8106_v57, %v6930_v34  ;;  %v10140_v38 = vld [vmem:[#allocation167_spill] sm:$0xff] }
 0x466   :  { %v2327_v15 = vperm.slane %v8116_v29, %v6930_v34  ;;  %v2347_v6 = vsel %vm2177_vm8, %v2346_v53, %v7554_v3  ;;  %v2508_v30 = vsel %vm2189_vm11, %v2507_v54, %v2506_v41  ;;  %v2322_v48 = vsel %vm2189_vm11, %v2321_v10, %v2320_v61  ;;  %v10137_v3 = vld [vmem:[#allocation46_spill] sm:$0xff]  ;;  %v10138_v54 = vld [vmem:[#allocation5_spill] sm:$0xff]  ;;  %v10139_v61 = vld [vmem:[#allocation51_spill] sm:$0xff] }
 0x467   :  { %v2329_v40 = vperm.slane %v1231_v31, %v6955_v39  ;;  %v2349_v4 = vsel %vm2181_vm9, %v2348_v8, %v2347_v6  ;;  %v2350_v51 = vperm.slane %v7855_v35, %v6522_v22  ;;  %v2324_v57 = vsel %vm2193_vm12, %v2323_v27, %v2322_v48  ;;  %v10141_v6 = vld [vmem:[#allocation29_spill] sm:$0xff] }
 0x468   :  { %v1276_v33 = vpop.xlane.xlu2 %1275  ;;  %v1561_v44 = vpop.xlane.xlu1 %1560  ;;  %v2510_v29 = vsel %vm2193_vm12, %v2509_v11, %v2508_v30  ;;  %v2534_v1 = vperm.slane %v10137_v3, %v6489_v37  ;;  %v2326_v53 = vsel %vm2197_vm13, %v2325_v5, %v2324_v57  ;;  %v2536_v8 = vperm.slane %v10138_v54, %v6522_v22  ;;  %v1598_v48 = vld [vmem:[%s9213_s1 + $0xf0] sm:$0xff] }
 0x469   :  { %v1519_v17 = vpop.xlane.xlu0 %1518  ;;  %v2512_v10 = vsel %vm2197_vm13, %v2511_v56, %v2510_v29  ;;  %v2352_v35 = vperm.slane %v10139_v61, %v6555_v19  ;;  %v2328_v11 = vsel %vm2201_vm14, %v2327_v15, %v2326_v53  ;;  %v2538_v41 = vperm.slane %v10140_v38, %v6555_v19  ;;  %v10142_v57 = vld [vmem:[#allocation137_spill] sm:$0xff] }
 0x46a   :  { %v2515_v31 = vperm.slane %v1519_v17, %v6955_v39  ;;  %v2514_v27 = vsel %vm2201_vm14, %v2513_v0, %v2512_v10  ;;  %v2354_v5 = vperm.slane %v10141_v6, %v6618_v18  ;;  %v2330_v56 = vsel %vm2205_vm15, %v2329_v40, %v2328_v11  ;;  %v1599_v0 = vld [vmem:[%s9213_s1 + $0xf8] sm:$0xff] }
 0x46b   :  { %v2533_v15 = vsel %vm2177_vm8, %v2532_v63, %v10142_v57  ;;  %v2351_v29 = vsel %vm2185_vm10, %v2350_v51, %v2349_v4  ;;  %v2356_v17 = vperm.slane %v8166_v49, %v6654_v16  ;;  %v2540_v53 = vperm.slane %v8180_v60, %v6618_v18  ;;  %v1596_v63 = vld [vmem:[%s9213_s1 + $0xe0] sm:$0xff]  ;;  %v1597_v4 = vld [vmem:[%s9213_s1 + $0xe8] sm:$0xff] }
 0x46c   :  { %v2516_v30 = vsel %vm2205_vm15, %v2515_v31, %v2514_v27  ;;  %v2535_v3 = vsel %vm2181_vm9, %v2534_v1, %v2533_v15  ;;  %v2358_v10 = vperm.slane %v1276_v33, %v6930_v34  ;;  %v2353_v51 = vsel %vm2189_vm11, %v2352_v35, %v2351_v29  ;;  %v10143_v60 = vld [vmem:[#allocation200_spill] sm:$0xff] }
 0x46d   :  { %v2553_v40 = vsel %vm2548_vm7, %v2516_v30, %v2330_v56  ;;  %v2537_v49 = vsel %vm2185_vm10, %v2536_v8, %v2535_v3  ;;  %v2542_v1 = vperm.slane %v1561_v44, %v6654_v16  ;;  %v3293_v33 = vperm.slane %v10143_v60, %v6555_v19  ;;  %v1594_v8 = vld [vmem:[%s9213_s1 + $0xd0] sm:$0xff]  ;;  %v1595_v44 = vld [vmem:[%s9213_s1 + $0xd8] sm:$0xff] }
 0x46e   :  { %2657 = vmatmul.f32.vlgmr.msrb.gmra.mxu0 %v2553_v40  ;;  %2777 = vmatmul.f32.vlgmr.msra.gmra.mxu2 %v2553_v40  ;;  %v3292_v31 = vsel %vm2185_vm10, %v3291_v50, %v3290_v55  ;;  %v2539_v54 = vsel %vm2189_vm11, %v2538_v41, %v2537_v49  ;;  %v2355_v61 = vsel %vm2193_vm12, %v2354_v5, %v2353_v51  ;;  %v10144_v41 = vld [vmem:[#allocation205_spill] sm:$0xff]  ;;  %v10145_v57 = vld [vmem:[#allocation144_spill] sm:$0xff]  ;;  %vm10161_vm0 = vcmask 261312  }
 0x46f   :  { %3377 = vmatpush.msrb.mxu0 %v1598_v48  ;;  %3497 = vmatpush.msra.mxu2 %v1599_v0  ;;  %v2357_v35 = vsel %vm2197_vm13, %v2356_v17, %v2355_v61  ;;  %v3295_v6 = vperm.slane %v10144_v41, %v6618_v18  ;;  %v2541_v5 = vsel %vm2193_vm12, %v2540_v53, %v2539_v54  ;;  %v1592_v48 = vld [vmem:[%s9213_s1 + $0xc0] sm:$0xff]  ;;  %v1593_v0 = vld [vmem:[%s9213_s1 + $0xc8] sm:$0xff] }
 0x470   :  { %v1279_v27 = vpop.xlane.xlu1 %1278  ;;  %v1567_v11 = vpop.xlane.xlu2 %1566  ;;  %v2359_v56 = vsel %vm2201_vm14, %v2358_v10, %v2357_v35  ;;  %v3210_v15 = vperm.slane %v10145_v57, %v6291_v32  ;;  %v2543_v29 = vsel %vm2197_vm13, %v2542_v1, %v2541_v5  ;;  %v3189_v40 = vsel %vm2165_vm5, %v3188_v62, %v8183_v14  ;;  %v10146_v3 = vld [vmem:[#allocation252_spill] sm:$0xff]  ;;  %v1588_v35 = vld [vmem:[%s9213_s1 + $0xa0] sm:$0xff]  ;;  %v1587_v57 = vld [vmem:[%s9213_s1 + $0x98] sm:$0xff] }
 0x471   :  { %3378 = vmatpush.msrb.mxu0 %v1596_v63  ;;  %3498 = vmatpush.msra.mxu2 %v1597_v4  ;;  %v2360_v50 = vperm.slane %v1279_v27, %v6955_v39  ;;  %v1564_v55 = vpop.xlane.xlu0 %1563  ;;  %v2546_v38 = vperm.slane %v1567_v11, %v6955_v39  ;;  %v10147_v53 = vld [vmem:[#allocation148_spill] sm:$0xff]  ;;  %v8324_v49 = vsel %vm2548_vm7, %v8197_v52, %v8161_v2  ;;  %v10150_v2 = vld [vmem:[#allocation82_spill] sm:$0xff] }
 0x472   :  { %v2544_v30 = vperm.slane %v1564_v55, %v6930_v34  ;;  %v3213_v10 = vperm.slane %v10147_v53, %v10146_v3  ;;  %v1590_v4 = vld [vmem:[%s9213_s1 + $0xb0] sm:$0xff]  ;;  %v3294_v51 = vsel %vm2189_vm11, %v3293_v33, %v3292_v31  ;;  %v1631_v33 = vld [vmem:[%s9213_s1 + $0x1f8] sm:$0xff]  ;;  %v3191_v31 = vsel %vm2169_vm6, %v3190_v26, %v3189_v40  ;;  %v1629_v41 = vld [vmem:[%s9213_s1 + $0x1e8] sm:$0xff] }
 0x473   :  { %3379 = vmatpush.msrb.mxu0 %v1594_v8  ;;  %3499 = vmatpush.msra.mxu2 %v1595_v44  ;;  %v2361_v17 = vsel %vm2205_vm15, %v2360_v50, %v2359_v56  ;;  %v10148_v62 = vld [vmem:[#allocation204_spill] sm:$0xff]  ;;  %v3296_v61 = vsel %vm2193_vm12, %v3295_v6, %v3294_v51  ;;  %v3212_v11 = vsel %vm2149_vm1, %v3211_v36, %v3210_v15  ;;  %v10151_v8 = vld [vmem:[#allocation147_spill] sm:$0xff]  ;;  %v10152_v26 = vld [vmem:[#allocation93_spill] sm:$0xff] }
 0x474   :  { %v2545_v63 = vsel %vm2201_vm14, %v2544_v30, %v2543_v29  ;;  %v3297_v14 = vperm.slane %v10148_v62, %v6654_v16  ;;  %v10149_v60 = vld [vmem:[#allocation132_spill] sm:$0xff]  ;;  %v3215_v44 = vperm.slane %v10151_v8, %v6322_v24  ;;  %v3120_v50 = vperm.slane %v10152_v26, %v10146_v3  ;;  %v10153_v36 = vld [vmem:[#allocation203_spill] sm:$0xff]  ;;  %v10158_v40 = vld [vmem:[#allocation146_spill] sm:$0xff] }
 0x475   :  { %3380 = vmatpush.msrb.mxu0 %v1592_v48  ;;  %3500 = vmatpush.msra.mxu2 %v1593_v0  ;;  %v2547_v1 = vsel %vm2205_vm15, %v2546_v38, %v2545_v63  ;;  %v3192_v54 = vperm.slane %v10149_v60, %v6403_v46  ;;  %v1630_v27 = vld [vmem:[%s9213_s1 + $0x1f0] sm:$0xff]  ;;  %v3214_v21 = vsel %vm2153_vm2, %v3213_v10, %v3212_v11  ;;  %v1628_v38 = vld [vmem:[%s9213_s1 + $0x1e0] sm:$0xff]  ;;  %v1627_v63 = vld [vmem:[%s9213_s1 + $0x1d8] sm:$0xff] }
 0x476   :  { %2737 = vmatmul.f32.vlgmr.msra.gmra.mxu0 %v10150_v2  ;;  %3433 = vmatmul.f32.vlgmr.msrb.gmra.mxu2 %v8324_v49  ;;  %v2554_v52 = vsel %vm2548_vm7, %v2547_v1, %v2361_v17  ;;  %v3299_v55 = vperm.slane %v10153_v36, %v6930_v34  ;;  %v10154_v6 = vld [vmem:[#allocation131_spill] sm:$0xff]  ;;  %v3298_v56 = vsel %vm2197_vm13, %v3297_v14, %v3296_v61  ;;  %v10155_v30 = vld [vmem:[#allocation208_spill] sm:$0xff]  ;;  %v10162_v51 = vld [vmem:[#allocation153_spill] sm:$0xff] }
 0x477   :  { %3381 = vmatpush.msrb.mxu0 %v1590_v4  ;;  %3501 = vmatpush.msra.mxu2 %v1591_v59  ;;  %v3194_v5 = vperm.slane %v10154_v6, %v6456_v25  ;;  %v3301_v48 = vperm.slane %v10155_v30, %v6955_v39  ;;  %v1586_v0 = vld [vmem:[%s9213_s1 + $0x90] sm:$0xff]  ;;  %v3193_v15 = vsel %vm10156_vm3, %v3192_v54, %v3191_v31  ;;  %v1584_v60 = vld [vmem:[%s9213_s1 + $0x80] sm:$0xff]  ;;  %vm10168_vm3 = vmmov %vm10161_vm0 }
 0x478   :  { %2677 = vmatmul.f32.vlgmr.msrb.gmra.mxu1 %v2554_v52  ;;  %2797 = vmatmul.f32.vlgmr.msra.gmra.mxu3 %v2554_v52  ;;  %v10157_v29 = vld [vmem:[#allocation136_spill] sm:$0xff]  ;;  %v3217_v53 = vperm.slane %v10158_v40, %v6309_v47  ;;  %v10159_v4 = vperm.slane %v10130_v23, %v6291_v32  ;;  %v10160_v59 = vperm.slane %v10128_v45, %v6294_v42  ;;  %v1624_v2 = vld [vmem:[%s9213_s1 + $0x1c0] sm:$0xff] }
 0x479   :  { %3397 = vmatpush.msrb.mxu1 %v1630_v27  ;;  %3517 = vmatpush.msra.mxu3 %v1631_v33  ;;  %v3196_v17 = vperm.slane %v10157_v29, %v6489_v37  ;;  %v1626_v10 = vld [vmem:[%s9213_s1 + $0x1d0] sm:$0xff]  ;;  %v3216_v14 = vsel %vm10161_vm0, %v3215_v44, %v3214_v21  ;;  %v3219_v1 = vperm.slane %v10162_v51, %v6319_v20  ;;  %v1585_v23 = vld [vmem:[%s9213_s1 + $0x88] sm:$0xff]  ;;  %v1583_v44 = vld [vmem:[%s9213_s1 + $0x78] sm:$0xff]  ;;  %vm10180_vm0 = vcmask 523712  }
 0x47a   :  { %3382 = vmatpush.msrb.mxu0 %v1588_v35  ;;  %3502 = vmatpush.msra.mxu2 %v1589_v13  ;;  %v3119_v62 = vsel %vm2149_vm1, %v10160_v59, %v10159_v4  ;;  %v10163_v54 = vld [vmem:[#allocation92_spill] sm:$0xff]  ;;  %v3300_v27 = vsel %vm2201_vm14, %v3299_v55, %v3298_v56  ;;  %v10164_v33 = vld [vmem:[#allocation135_spill] sm:$0xff]  ;;  %v3195_v11 = vsel %vm2177_vm8, %v3194_v5, %v3193_v15  ;;  %v1623_v56 = vld [vmem:[%s9213_s1 + $0x1b8] sm:$0xff] }
 0x47b   :  { %3398 = vmatpush.msrb.mxu1 %v1628_v38  ;;  %3518 = vmatpush.msra.mxu3 %v1629_v41  ;;  %v3122_v45 = vperm.slane %v10163_v54, %v6322_v24  ;;  %v3121_v61 = vsel %vm2153_vm2, %v3120_v50, %v3119_v62  ;;  %v1625_v52 = vld [vmem:[%s9213_s1 + $0x1c8] sm:$0xff]  ;;  %v3198_v31 = vperm.slane %v10164_v33, %v6522_v22  ;;  %v1582_v8 = vld [vmem:[%s9213_s1 + $0x70] sm:$0xff]  ;;  %v1619_v33 = vld [vmem:[%s9213_s1 + $0x198] sm:$0xff] }
 0x47c   :  { %3383 = vmatpush.msrb.mxu0 %v1586_v0  ;;  %3503 = vmatpush.msra.mxu2 %v1587_v57  ;;  %v3302_v35 = vsel %vm2205_vm15, %v3301_v48, %v3300_v27  ;;  %v3197_v13 = vsel %vm2181_vm9, %v3196_v17, %v3195_v11  ;;  %v10165_v26 = vld [vmem:[#allocation152_spill] sm:$0xff]  ;;  %v3218_v21 = vsel %vm2161_vm4, %v3217_v53, %v3216_v14  ;;  %v10166_v36 = vld [vmem:[#allocation91_spill] sm:$0xff]  ;;  %v10169_v48 = vld [vmem:[#allocation134_spill] sm:$0xff] }
 0x47d   :  { %3399 = vmatpush.msrb.mxu1 %v1626_v10  ;;  %3519 = vmatpush.msra.mxu3 %v1627_v63  ;;  %v3221_v50 = vperm.slane %v10165_v26, %v6350_v58  ;;  %v3124_v55 = vperm.slane %v10166_v36, %v6309_v47  ;;  %v3220_v38 = vsel %vm2165_vm5, %v3219_v1, %v3218_v21  ;;  %v1622_v41 = vld [vmem:[%s9213_s1 + $0x1b0] sm:$0xff]  ;;  %v10171_v40 = vld [vmem:[#allocation151_spill] sm:$0xff]  ;;  %v10172_v10 = vld [vmem:[#allocation150_spill] sm:$0xff] }
 0x47e   :  { %3384 = vmatpush.msrb.mxu0 %v1584_v60  ;;  %3504 = vmatpush.msra.mxu2 %v1585_v23  ;;  %v10167_v6 = vperm.slane %v10131_v9, %v6955_v39  ;;  %v3123_v30 = vsel %vm10168_vm3, %v3122_v45, %v3121_v61  ;;  %v3200_v0 = vperm.slane %v10169_v48, %v6555_v19  ;;  %v1580_v9 = vld [vmem:[%s9213_s1 + $0x60] sm:$0xff]  ;;  %v10170_v29 = vld [vmem:[#allocation140_spill] sm:$0xff]  ;;  %v10174_v51 = vld [vmem:[#allocation157_spill] sm:$0xff] }
 0x47f   :  { %3400 = vmatpush.msrb.mxu1 %v1624_v2  ;;  %3520 = vmatpush.msra.mxu3 %v1625_v52  ;;  %v3199_v15 = vsel %vm2185_vm10, %v3198_v31, %v3197_v13  ;;  %v3202_v17 = vperm.slane %v10170_v29, %v6618_v18  ;;  %v3223_v53 = vperm.slane %v10171_v40, %v6403_v46  ;;  %v1620_v63 = vld [vmem:[%s9213_s1 + $0x1a0] sm:$0xff]  ;;  %v1621_v4 = vld [vmem:[%s9213_s1 + $0x1a8] sm:$0xff]  ;;  %v1578_v60 = vld [vmem:[%s9213_s1 + $0x50] sm:$0xff] }
 0x480   :  { %v3116_v5 = vsel %vm2205_vm15, %v10167_v6, %v8170_v7  ;;  %3385 = vmatpush.msrb.mxu0 %v1582_v8  ;;  %3505 = vmatpush.msra.mxu2 %v1583_v44  ;;  %v1581_v7 = vld [vmem:[%s9213_s1 + $0x68] sm:$0xff]  ;;  %v3222_v14 = vsel %vm2169_vm6, %v3221_v50, %v3220_v38  ;;  %v3225_v1 = vperm.slane %v10174_v51, %v6456_v25  ;;  %v1579_v23 = vld [vmem:[%s9213_s1 + $0x58] sm:$0xff]  ;;  %v1618_v27 = vld [vmem:[%s9213_s1 + $0x190] sm:$0xff] }
 0x481   :  { %v8452_v57 = vsel %vm2548_vm7, %v3302_v35, %v3116_v5  ;;  %2757 = vmatmul.f32.vlgmr.msra.gmra.mxu1 %v10172_v10  ;;  %v10173_v59 = vld [vmem:[#allocation96_spill] sm:$0xff]  ;;  %3521 = vmatpush.msra.mxu3 %v1623_v56  ;;  %v10175_v54 = vperm.slane %v10123_v28, %v6654_v16  ;;  %v10176_v61 = vld [vmem:[#allocation45_spill] sm:$0xff]  ;;  %v3125_v52 = vsel %vm2161_vm4, %v3124_v55, %v3123_v30  ;;  %v10177_v31 = vld [vmem:[#allocation95_spill] sm:$0xff] }
 0x482   :  { %3453 = vmatmul.f32.vlgmr.msrb.gmra.mxu3 %v8452_v57  ;;  %v3126_v62 = vperm.slane %v10173_v59, %v6319_v20  ;;  %3401 = vmatpush.msrb.mxu1 %v1622_v41  ;;  %v3051_v2 = vperm.slane %v10176_v61, %v6930_v34  ;;  %v3128_v28 = vperm.slane %v10177_v31, %v6350_v58  ;;  %v1576_v44 = vld [vmem:[%s9213_s1 + $0x40] sm:$0xff]  ;;  %v1577_v35 = vld [vmem:[%s9213_s1 + $0x48] sm:$0xff]  ;;  %v1574_v56 = vld [vmem:[%s9213_s1 + $0x30] sm:$0xff] }
 0x483   :  { %v3050_v45 = vsel %vm2197_vm13, %v10175_v54, %v8150_v43  ;;  %3386 = vmatpush.msrb.mxu0 %v1580_v9  ;;  %3506 = vmatpush.msra.mxu2 %v1581_v7  ;;  %v10178_v43 = vld [vmem:[#allocation139_spill] sm:$0xff]  ;;  %v3201_v8 = vsel %vm2189_vm11, %v3200_v0, %v3199_v15  ;;  %v10179_v26 = vld [vmem:[#allocation156_spill] sm:$0xff]  ;;  %v3224_v21 = vsel %vm10180_vm0, %v3223_v53, %v3222_v14  ;;  %v1575_v30 = vld [vmem:[%s9213_s1 + $0x38] sm:$0xff] }
 0x484   :  { %v3204_v11 = vperm.slane %v10178_v43, %v6654_v16  ;;  %3402 = vmatpush.msrb.mxu1 %v1620_v63  ;;  %3522 = vmatpush.msra.mxu3 %v1621_v4  ;;  %v3203_v13 = vsel %vm2193_vm12, %v3202_v17, %v3201_v8  ;;  %v3227_v50 = vperm.slane %v10179_v26, %v6489_v37  ;;  %v1616_v36 = vld [vmem:[%s9213_s1 + $0x180] sm:$0xff]  ;;  %v1617_v55 = vld [vmem:[%s9213_s1 + $0x188] sm:$0xff]  ;;  %v1614_v29 = vld [vmem:[%s9213_s1 + $0x170] sm:$0xff] }
 0x485   :  { %3387 = vmatpush.msrb.mxu0 %v1578_v60  ;;  %3507 = vmatpush.msra.mxu2 %v1579_v23  ;;  %v10181_v38 = vld [vmem:[#allocation44_spill] sm:$0xff]  ;;  %v3127_v6 = vsel %vm2165_vm5, %v3126_v62, %v3125_v52  ;;  %v3226_v5 = vsel %vm2177_vm8, %v3225_v1, %v3224_v21  ;;  %v3052_v48 = vsel %vm2201_vm14, %v3051_v2, %v3050_v45  ;;  %v10182_v0 = vld [vmem:[#allocation94_spill] sm:$0xff]  ;;  %v10184_v53 = vld [vmem:[#allocation145_spill] sm:$0xff] }
 0x486   :  { %v3053_v41 = vperm.slane %v10181_v38, %v6955_v39  ;;  %3403 = vmatpush.msrb.mxu1 %v1618_v27  ;;  %3523 = vmatpush.msra.mxu3 %v1619_v33  ;;  %v3130_v9 = vperm.slane %v10182_v0, %v6403_v46  ;;  %v10183_v7 = vld [vmem:[#allocation138_spill] sm:$0xff]  ;;  %v3205_v40 = vsel %vm2197_vm13, %v3204_v11, %v3203_v13  ;;  %v10185_v63 = vld [vmem:[#allocation155_spill] sm:$0xff]  ;;  %v1570_v31 = vld [vmem:[%s9213_s1 + $0x10] sm:$0xff] }
 0x487   :  { %v3206_v15 = vperm.slane %v10183_v7, %v6930_v34  ;;  %3388 = vmatpush.msrb.mxu0 %v1576_v44  ;;  %3508 = vmatpush.msra.mxu2 %v1577_v35  ;;  %v1615_v17 = vld [vmem:[%s9213_s1 + $0x178] sm:$0xff]  ;;  %v3208_v10 = vperm.slane %v10184_v53, %v6955_v39  ;;  %v3229_v4 = vperm.slane %v10185_v63, %v6522_v22  ;;  %v1572_v59 = vld [vmem:[%s9213_s1 + $0x20] sm:$0xff]  ;;  %v1573_v62 = vld [vmem:[%s9213_s1 + $0x28] sm:$0xff] }
 0x488   :  { %3404 = vmatpush.msrb.mxu1 %v1616_v36  ;;  %3524 = vmatpush.msra.mxu3 %v1617_v55  ;;  %v3129_v14 = vsel %vm2169_vm6, %v3128_v28, %v3127_v6  ;;  %v3228_v51 = vsel %vm2181_vm9, %v3227_v50, %v3226_v5  ;;  %v10186_v1 = vld [vmem:[#allocation162_spill] sm:$0xff]  ;;  %v1613_v54 = vld [vmem:[%s9213_s1 + $0x168] sm:$0xff]  ;;  %v1610_v8 = vld [vmem:[%s9213_s1 + $0x150] sm:$0xff]  ;;  %v8583_v13 = vsel %vm2205_vm15, %v3053_v41, %v3052_v48 }
 0x489   :  { %v3231_v60 = vperm.slane %v10186_v1, %v6555_v19  ;;  %3389 = vmatpush.msrb.mxu0 %v1574_v56  ;;  %3509 = vmatpush.msra.mxu2 %v1575_v30  ;;  %v1612_v23 = vld [vmem:[%s9213_s1 + $0x160] sm:$0xff]  ;;  %v1571_v28 = vld [vmem:[%s9213_s1 + $0x18] sm:$0xff]  ;;  %v3207_v35 = vsel %vm2201_vm14, %v3206_v15, %v3205_v40  ;;  %v3230_v21 = vsel %vm2185_vm10, %v3229_v4, %v3228_v51  ;;  %v1569_v55 = vld [vmem:[%s9213_s1 + $0x8] sm:$0xff] }
 0x48a   :  { %v10187_v45 = vld [vmem:[#allocation99_spill] sm:$0xff]  ;;  %v10188_v2 = vld [vmem:[#allocation206_spill] sm:$0xff]  ;;  %3405 = vmatpush.msrb.mxu1 %v1614_v29  ;;  %3525 = vmatpush.msra.mxu3 %v1615_v17  ;;  %v10191_v26 = vld [vmem:[#allocation161_spill] sm:$0xff]  ;;  %v3209_v38 = vsel %vm2205_vm15, %v3208_v10, %v3207_v35 }
 0x48b   :  { %v3132_v61 = vperm.slane %v10187_v45, %v6456_v25  ;;  %v3304_v52 = vperm.slane %v10188_v2, %v6294_v42  ;;  %v10189_v27 = vld [vmem:[#allocation207_spill] sm:$0xff]  ;;  %3390 = vmatpush.msrb.mxu0 %v1572_v59  ;;  %3510 = vmatpush.msra.mxu2 %v1573_v62  ;;  %v1611_v44 = vld [vmem:[%s9213_s1 + $0x158] sm:$0xff]  ;;  %v3233_v50 = vperm.slane %v10191_v26, %v6618_v18  ;;  %vm10193_vm3 = vmmov %vm10180_vm0  ;;  %vm10201_vm0 = vcmask 261312  }
 0x48c   :  { %v3303_v33 = vperm.slane %v10189_v27, %v6291_v32  ;;  %v10190_v43 = vld [vmem:[#allocation211_spill] sm:$0xff]  ;;  %3406 = vmatpush.msrb.mxu1 %v1612_v23  ;;  %3526 = vmatpush.msra.mxu3 %v1613_v54  ;;  %v10192_v41 = vld [vmem:[#allocation98_spill] sm:$0xff]  ;;  %v3131_v5 = vsel %vm10193_vm3, %v3130_v9, %v3129_v14  ;;  %v3232_v56 = vsel %vm2189_vm11, %v3231_v60, %v3230_v21  ;;  %v1726_v9 = vld [vmem:[%s9213_s1 + $0x4f0] sm:$0xff] }
 0x48d   :  { %v3306_v11 = vperm.slane %v10190_v43, %v10146_v3  ;;  %v1568_v36 = vld [vmem:[%s9213_s1] sm:$0xff]  ;;  %v3134_v6 = vperm.slane %v10192_v41, %v6489_v37  ;;  %3391 = vmatpush.msrb.mxu0 %v1570_v31  ;;  %3511 = vmatpush.msra.mxu2 %v1571_v28  ;;  %v3133_v48 = vsel %vm2177_vm8, %v3132_v61, %v3131_v5  ;;  %v10195_v29 = vld [vmem:[#allocation160_spill] sm:$0xff]  ;;  %v1727_v63 = vld [vmem:[%s9213_s1 + $0x4f8] sm:$0xff] }
 0x48e   :  { %v1608_v30 = vld [vmem:[%s9213_s1 + $0x140] sm:$0xff]  ;;  %v3305_v0 = vsel %vm2149_vm1, %v3304_v52, %v3303_v33  ;;  %3407 = vmatpush.msrb.mxu1 %v1610_v8  ;;  %3527 = vmatpush.msra.mxu3 %v1611_v44  ;;  %v3235_v17 = vperm.slane %v10195_v29, %v6654_v16  ;;  %v3365_v53 = vsel %vm2548_vm7, %v3209_v38, %v8145_v12  ;;  %v1609_v10 = vld [vmem:[%s9213_s1 + $0x148] sm:$0xff]  ;;  %v10196_v4 = vld [vmem:[#allocation97_spill] sm:$0xff] }
 0x48f   :  { %v10194_v7 = vld [vmem:[#allocation210_spill] sm:$0xff]  ;;  %v3307_v40 = vsel %vm2153_vm2, %v3306_v11, %v3305_v0  ;;  %3392 = vmatpush.msrb.mxu0 %v1568_v36  ;;  %3512 = vmatpush.msra.mxu2 %v1569_v55  ;;  %v3136_v59 = vperm.slane %v10196_v4, %v6522_v22  ;;  %v3234_v62 = vsel %vm2193_vm12, %v3233_v50, %v3232_v56  ;;  %v1606_v12 = vld [vmem:[%s9213_s1 + $0x130] sm:$0xff]  ;;  %v1725_v52 = vld [vmem:[%s9213_s1 + $0x4e8] sm:$0xff] }
 0x490   :  { %v3308_v15 = vperm.slane %v10194_v7, %v6322_v24  ;;  %v10197_v14 = vld [vmem:[#allocation166_spill] sm:$0xff]  ;;  %3393 = vmatmul.f32.vlgmr.msrb.gmra.mxu0 %v3365_v53  ;;  %3408 = vmatpush.msrb.mxu1 %v1608_v30  ;;  %v3135_v60 = vsel %vm2181_vm9, %v3134_v6, %v3133_v48  ;;  %v10198_v23 = vld [vmem:[#allocation209_spill] sm:$0xff]  ;;  %v10200_v27 = vld [vmem:[#allocation111_spill] sm:$0xff] }
 0x491   :  { %v3237_v51 = vperm.slane %v10197_v14, %v6930_v34  ;;  %v1724_v1 = vld [vmem:[%s9213_s1 + $0x4e0] sm:$0xff]  ;;  %v3310_v54 = vperm.slane %v10198_v23, %v6309_v47  ;;  %3457 = vmatpush.msra.mxu0 %v1726_v9  ;;  %3513 = vmatmul.f32.vlgmr.msra.gmra.mxu2 %v3365_v53  ;;  %v1607_v2 = vld [vmem:[%s9213_s1 + $0x138] sm:$0xff]  ;;  %v3149_v33 = vperm.slane %v10200_v27, %v6294_v42  ;;  %v1722_v8 = vld [vmem:[%s9213_s1 + $0x4d0] sm:$0xff] }
 0x492   :  { %v10199_v45 = vld [vmem:[#allocation226_spill] sm:$0xff]  ;;  %v3309_v31 = vsel %vm10201_vm0, %v3308_v15, %v3307_v40  ;;  %3528 = vmatpush.msra.mxu3 %v1609_v10  ;;  %3577 = vmatpush.msrb.mxu2 %v1727_v63  ;;  %v10203_v44 = vld [vmem:[#allocation165_spill] sm:$0xff]  ;;  %v1605_v21 = vld [vmem:[%s9213_s1 + $0x128] sm:$0xff]  ;;  %v8686_v29 = vsel %vm2185_vm10, %v3136_v59, %v3135_v60 }
 0x493   :  { %v3335_v61 = vperm.slane %v10199_v45, %v6294_v42  ;;  %v10202_v28 = vld [vmem:[#allocation214_spill] sm:$0xff]  ;;  %v3239_v35 = vperm.slane %v10203_v44, %v6955_v39  ;;  %v3236_v42 = vsel %vm2197_vm13, %v3235_v17, %v3234_v62  ;;  %v10204_v26 = vld [vmem:[#allocation221_spill] sm:$0xff]  ;;  %3409 = vmatpush.msrb.mxu1 %v1606_v12  ;;  %3458 = vmatpush.msra.mxu0 %v1724_v1  ;;  %v1721_v9 = vld [vmem:[%s9213_s1 + $0x4c8] sm:$0xff] }
 0x494   :  { %v3312_v43 = vperm.slane %v10202_v28, %v6319_v20  ;;  %v1604_v11 = vld [vmem:[%s9213_s1 + $0x120] sm:$0xff]  ;;  %v3334_v50 = vperm.slane %v10204_v26, %v6291_v32  ;;  %v1723_v36 = vld [vmem:[%s9213_s1 + $0x4d8] sm:$0xff]  ;;  %v3238_v41 = vsel %vm2201_vm14, %v3237_v51, %v3236_v42  ;;  %3529 = vmatpush.msra.mxu3 %v1607_v2  ;;  %3578 = vmatpush.msrb.mxu2 %v1725_v52  ;;  %v1602_v56 = vld [vmem:[%s9213_s1 + $0x110] sm:$0xff] }
 0x495   :  { %v10205_v55 = vld [vmem:[#allocation105_spill] sm:$0xff]  ;;  %v1720_v30 = vld [vmem:[%s9213_s1 + $0x4c0] sm:$0xff]  ;;  %3410 = vmatpush.msrb.mxu1 %v1604_v11  ;;  %3459 = vmatpush.msra.mxu0 %v1722_v8  ;;  %v10209_v59 = vld [vmem:[#allocation224_spill] sm:$0xff]  ;;  %v3240_v51 = vsel %vm2205_vm15, %v3239_v35, %v3238_v41 }
 0x496   :  { %v3148_v38 = vperm.slane %v10205_v55, %v6291_v32  ;;  %v10206_v6 = vld [vmem:[#allocation225_spill] sm:$0xff]  ;;  %v3311_v32 = vsel %vm2161_vm4, %v3310_v54, %v3309_v31  ;;  %v3336_v7 = vsel %vm2149_vm1, %v3335_v61, %v3334_v50  ;;  %v10208_v17 = vld [vmem:[#allocation110_spill] sm:$0xff]  ;;  %3530 = vmatpush.msra.mxu3 %v1605_v21  ;;  %3579 = vmatpush.msrb.mxu2 %v1723_v36  ;;  %v10210_v12 = vld [vmem:[#allocation212_spill] sm:$0xff] }
 0x497   :  { %v3337_v5 = vperm.slane %v10206_v6, %v10146_v3  ;;  %v10207_v48 = vld [vmem:[#allocation213_spill] sm:$0xff]  ;;  %v3151_v40 = vperm.slane %v10208_v17, %v10146_v3  ;;  %v3313_v53 = vsel %vm2165_vm5, %v3312_v43, %v3311_v32  ;;  %v1600_v10 = vld [vmem:[%s9213_s1 + $0x100] sm:$0xff]  ;;  %v3339_v62 = vperm.slane %v10209_v59, %v6322_v24  ;;  %3411 = vmatpush.msrb.mxu1 %v1602_v56  ;;  %v1601_v3 = vld [vmem:[%s9213_s1 + $0x108] sm:$0xff] }
 0x498   :  { %v3314_v0 = vperm.slane %v10207_v48, %v6350_v58  ;;  %v1603_v15 = vld [vmem:[%s9213_s1 + $0x118] sm:$0xff]  ;;  %v1718_v63 = vld [vmem:[%s9213_s1 + $0x4b0] sm:$0xff]  ;;  %v3150_v4 = vsel %vm2149_vm1, %v3149_v33, %v3148_v38  ;;  %3460 = vmatpush.msra.mxu0 %v1720_v30  ;;  %v3316_v1 = vperm.slane %v10210_v12, %v6403_v46  ;;  %3580 = vmatpush.msrb.mxu2 %v1721_v9  ;;  %v1716_v8 = vld [vmem:[%s9213_s1 + $0x4a0] sm:$0xff] }
 0x499   :  { %v1719_v14 = vld [vmem:[%s9213_s1 + $0x4b8] sm:$0xff]  ;;  %v3338_v60 = vsel %vm2153_vm2, %v3337_v5, %v3336_v7  ;;  %3531 = vmatpush.msra.mxu3 %v1603_v15  ;;  %3412 = vmatpush.msrb.mxu1 %v1600_v10  ;;  %v1758_v33 = vld [vmem:[%s9213_s1 + $0x5f0] sm:$0xff]  ;;  %v3152_v28 = vsel %vm2153_vm2, %v3151_v40, %v3150_v4  ;;  %v3366_v11 = vsel %vm2548_vm7, %v3240_v51, %v8583_v13  ;;  %v1717_v44 = vld [vmem:[%s9213_s1 + $0x4a8] sm:$0xff] }
 0x49a   :  { %v10211_v23 = vld [vmem:[#allocation229_spill] sm:$0xff]  ;;  %v3315_v2 = vsel %vm2169_vm6, %v3314_v0, %v3313_v53  ;;  %3461 = vmatpush.msra.mxu0 %v1718_v63  ;;  %v10214_v43 = vld [vmem:[#allocation114_spill] sm:$0xff]  ;;  %3581 = vmatpush.msrb.mxu2 %v1719_v14  ;;  %v10216_v26 = vld [vmem:[#allocation228_spill] sm:$0xff] }
 0x49b   :  { %v3341_v54 = vperm.slane %v10211_v23, %v6309_v47  ;;  %v10212_v45 = vld [vmem:[#allocation109_spill] sm:$0xff]  ;;  %3532 = vmatpush.msra.mxu3 %v1601_v3  ;;  %v3343_v50 = vperm.slane %v10216_v26, %v6319_v20  ;;  %vm10217_vm1 = vmmov %vm10201_vm0  ;;  %3413 = vmatmul.f32.vlgmr.msrb.gmra.mxu1 %v3366_v11  ;;  %v1756_v13 = vld [vmem:[%s9213_s1 + $0x5e0] sm:$0xff] }
 0x49c   :  { %v3153_v61 = vperm.slane %v10212_v45, %v6322_v24  ;;  %v10213_v52 = vld [vmem:[#allocation217_spill] sm:$0xff]  ;;  %v3155_v24 = vperm.slane %v10214_v43, %v6309_v47  ;;  %v3340_v47 = vsel %vm10217_vm1, %v3339_v62, %v3338_v60  ;;  %3533 = vmatmul.f32.vlgmr.msra.gmra.mxu3 %v3366_v11  ;;  %v1757_v21 = vld [vmem:[%s9213_s1 + $0x5e8] sm:$0xff]  ;;  %vm10219_vm2 = vmmov %vm10193_vm3  ;;  %3477 = vmatpush.msra.mxu1 %v1758_v33 }
 0x49d   :  { %v3318_v27 = vperm.slane %v10213_v52, %v6456_v25  ;;  %v1759_v31 = vld [vmem:[%s9213_s1 + $0x5f8] sm:$0xff]  ;;  %v10218_v36 = vld [vmem:[#allocation216_spill] sm:$0xff]  ;;  %v3317_v38 = vsel %vm10219_vm2, %v3316_v1, %v3315_v2  ;;  %v3342_v41 = vsel %vm2161_vm4, %v3341_v54, %v3340_v47  ;;  %vm10221_vm3 = vmmov %vm10201_vm0  ;;  %3462 = vmatpush.msra.mxu0 %v1716_v8  ;;  %3582 = vmatpush.msrb.mxu2 %v1717_v44 }
 0x49e   :  { %v10215_v35 = vld [vmem:[#allocation101_spill] sm:$0xff]  ;;  %v3320_v55 = vperm.slane %v10218_v36, %v6489_v37  ;;  %3597 = vmatpush.msrb.mxu3 %v1759_v31  ;;  %v3154_v48 = vsel %vm10221_vm3, %v3153_v61, %v3152_v28  ;;  %v10222_v15 = vld [vmem:[#allocation103_spill] sm:$0xff]  ;;  %3478 = vmatpush.msra.mxu1 %v1756_v13  ;;  %v3344_v59 = vsel %vm2165_vm5, %v3343_v50, %v3342_v41  ;;  %v10225_v62 = vld [vmem:[#allocation232_spill] sm:$0xff] }
 0x49f   :  { %v3142_v42 = vperm.slane %v10215_v35, %v6654_v16  ;;  %v1714_v6 = vld [vmem:[%s9213_s1 + $0x490] sm:$0xff]  ;;  %v1715_v5 = vld [vmem:[%s9213_s1 + $0x498] sm:$0xff]  ;;  %v3319_v0 = vsel %vm2177_vm8, %v3318_v27, %v3317_v38  ;;  %v3138_v9 = vperm.slane %v10222_v15, %v6555_v19  ;;  %v3156_v17 = vsel %vm2161_vm4, %v3155_v24, %v3154_v48  ;;  %v1712_v53 = vld [vmem:[%s9213_s1 + $0x480] sm:$0xff] }
 0x4a0   :  { %v10220_v56 = vld [vmem:[#allocation113_spill] sm:$0xff]  ;;  %3598 = vmatpush.msrb.mxu3 %v1757_v21  ;;  %v1713_v10 = vld [vmem:[%s9213_s1 + $0x488] sm:$0xff]  ;;  %v3347_v3 = vperm.slane %v10225_v62, %v6403_v46  ;;  %3463 = vmatpush.msra.mxu0 %v1714_v6  ;;  %v1752_v14 = vld [vmem:[%s9213_s1 + $0x5c0] sm:$0xff]  ;;  %v3321_v60 = vsel %vm2181_vm9, %v3320_v55, %v3319_v0 }
 0x4a1   :  { %v3157_v30 = vperm.slane %v10220_v56, %v6319_v20  ;;  %v1754_v32 = vld [vmem:[%s9213_s1 + $0x5d0] sm:$0xff]  ;;  %v1755_v7 = vld [vmem:[%s9213_s1 + $0x5d8] sm:$0xff]  ;;  %v10223_v20 = vld [vmem:[#allocation227_spill] sm:$0xff]  ;;  %3583 = vmatpush.msrb.mxu2 %v1715_v5  ;;  %v3139_v43 = vsel %vm2189_vm11, %v3138_v9, %v8686_v29 }
 0x4a2   :  { %v3345_v40 = vperm.slane %v10223_v20, %v6350_v58  ;;  %v10224_v63 = vld [vmem:[#allocation215_spill] sm:$0xff]  ;;  %v10226_v12 = vld [vmem:[#allocation112_spill] sm:$0xff]  ;;  %3479 = vmatpush.msra.mxu1 %v1754_v32  ;;  %3599 = vmatpush.msrb.mxu3 %v1755_v7  ;;  %v1711_v61 = vld [vmem:[%s9213_s1 + $0x478] sm:$0xff] }
 0x4a3   :  { %v3322_v4 = vperm.slane %v10224_v63, %v6522_v22  ;;  %v1753_v51 = vld [vmem:[%s9213_s1 + $0x5c8] sm:$0xff]  ;;  %v3159_v1 = vperm.slane %v10226_v12, %v6350_v58  ;;  %v1710_v45 = vld [vmem:[%s9213_s1 + $0x470] sm:$0xff]  ;;  %v10228_v2 = vld [vmem:[#allocation102_spill] sm:$0xff]  ;;  %v3158_v58 = vsel %vm2165_vm5, %v3157_v30, %v3156_v17  ;;  %3464 = vmatpush.msra.mxu0 %v1712_v53  ;;  %3584 = vmatpush.msrb.mxu2 %v1713_v10 }
 0x4a4   :  { %v10227_v23 = vld [vmem:[#allocation220_spill] sm:$0xff]  ;;  %v3140_v52 = vperm.slane %v10228_v2, %v6618_v18  ;;  %v10229_v27 = vld [vmem:[#allocation117_spill] sm:$0xff]  ;;  %v10230_v24 = vld [vmem:[#allocation231_spill] sm:$0xff]  ;;  %v3346_v8 = vsel %vm2169_vm6, %v3345_v40, %v3344_v59  ;;  %3480 = vmatpush.msra.mxu1 %v1752_v14  ;;  %3600 = vmatpush.msrb.mxu3 %v1753_v51 }
 0x4a5   :  { %v3324_v54 = vperm.slane %v10227_v23, %v6555_v19  ;;  %v3161_v33 = vperm.slane %v10229_v27, %v6403_v46  ;;  %v1750_v31 = vld [vmem:[%s9213_s1 + $0x5b0] sm:$0xff]  ;;  %v1751_v28 = vld [vmem:[%s9213_s1 + $0x5b8] sm:$0xff]  ;;  %v3349_v11 = vperm.slane %v10230_v24, %v6456_v25  ;;  %v1708_v46 = vld [vmem:[%s9213_s1 + $0x460] sm:$0xff]  ;;  %v3323_v29 = vsel %vm2185_vm10, %v3322_v4, %v3321_v60  ;;  %3465 = vmatpush.msra.mxu0 %v1710_v45 }
 0x4a6   :  { %v1709_v44 = vld [vmem:[%s9213_s1 + $0x468] sm:$0xff]  ;;  %vm10232_vm4 = vmmov %vm10219_vm2  ;;  %3585 = vmatpush.msrb.mxu2 %v1711_v61  ;;  %v1748_v13 = vld [vmem:[%s9213_s1 + $0x5a0] sm:$0xff]  ;;  %v3160_v38 = vsel %vm2169_vm6, %v3159_v1, %v3158_v58  ;;  %3481 = vmatpush.msra.mxu1 %v1750_v31  ;;  %v3141_v56 = vsel %vm2193_vm12, %v3140_v52, %v3139_v43  ;;  %vm3709_vm6 = vcmask 517120  }
 0x4a7   :  { %v10231_v26 = vld [vmem:[#allocation219_spill] sm:$0xff]  ;;  %v3348_v47 = vsel %vm10232_vm4, %v3347_v3, %v3346_v8  ;;  %v10233_v36 = vld [vmem:[#allocation116_spill] sm:$0xff]  ;;  %v3325_v41 = vsel %vm2189_vm11, %v3324_v54, %v3323_v29  ;;  %3601 = vmatpush.msrb.mxu3 %v1751_v28  ;;  %v1707_v5 = vld [vmem:[%s9213_s1 + $0x458] sm:$0xff]  ;;  %3466 = vmatpush.msra.mxu0 %v1708_v46 }
 0x4a8   :  { %v3326_v50 = vperm.slane %v10231_v26, %v6618_v18  ;;  %v1749_v21 = vld [vmem:[%s9213_s1 + $0x5a8] sm:$0xff]  ;;  %v3163_v55 = vperm.slane %v10233_v36, %v6456_v25  ;;  %v1706_v6 = vld [vmem:[%s9213_s1 + $0x450] sm:$0xff]  ;;  %vm10234_vm5 = vmmov %vm10219_vm2  ;;  %3586 = vmatpush.msrb.mxu2 %v1709_v44  ;;  %v3350_v9 = vsel %vm2177_vm8, %v3349_v11, %v3348_v47  ;;  %3482 = vmatpush.msra.mxu1 %v1748_v13 }
 0x4a9   :  { %v3162_v30 = vsel %vm10234_vm5, %v3161_v33, %v3160_v38  ;;  %v10235_v25 = vld [vmem:[#allocation230_spill] sm:$0xff]  ;;  %v1746_v0 = vld [vmem:[%s9213_s1 + $0x590] sm:$0xff]  ;;  %v10237_v17 = vld [vmem:[#allocation235_spill] sm:$0xff]  ;;  %3602 = vmatpush.msrb.mxu3 %v1749_v21  ;;  %3467 = vmatpush.msra.mxu0 %v1706_v6 }
 0x4aa   :  { %v3351_v48 = vperm.slane %v10235_v25, %v6489_v37  ;;  %v1747_v32 = vld [vmem:[%s9213_s1 + $0x598] sm:$0xff]  ;;  %v3353_v20 = vperm.slane %v10237_v17, %v6522_v22  ;;  %v1704_v40 = vld [vmem:[%s9213_s1 + $0x440] sm:$0xff]  ;;  %v1705_v53 = vld [vmem:[%s9213_s1 + $0x448] sm:$0xff]  ;;  %v3327_v4 = vsel %vm2193_vm12, %v3326_v50, %v3325_v41  ;;  %3587 = vmatpush.msrb.mxu2 %v1707_v5  ;;  %v3164_v51 = vsel %vm2177_vm8, %v3163_v55, %v3162_v30 }
 0x4ab   :  { %v10236_v7 = vld [vmem:[#allocation218_spill] sm:$0xff]  ;;  %v10238_v10 = vld [vmem:[#allocation115_spill] sm:$0xff]  ;;  %v10240_v12 = vld [vmem:[#allocation120_spill] sm:$0xff]  ;;  %3483 = vmatpush.msra.mxu1 %v1746_v0  ;;  %3603 = vmatpush.msrb.mxu3 %v1747_v32 }
 0x4ac   :  { %v3328_v15 = vperm.slane %v10236_v7, %v6654_v16  ;;  %v3165_v63 = vperm.slane %v10238_v10, %v6489_v37  ;;  %v10239_v59 = vld [vmem:[#allocation223_spill] sm:$0xff]  ;;  %v3143_v37 = vsel %vm2197_vm13, %v3142_v42, %v3141_v56  ;;  %v3167_v1 = vperm.slane %v10240_v12, %v6522_v22  ;;  %v1702_v60 = vld [vmem:[%s9213_s1 + $0x430] sm:$0xff]  ;;  %v1703_v23 = vld [vmem:[%s9213_s1 + $0x438] sm:$0xff]  ;;  %3468 = vmatpush.msra.mxu0 %v1704_v40 }
 0x4ad   :  { %v3330_v62 = vperm.slane %v10239_v59, %v6930_v34  ;;  %v1744_v3 = vld [vmem:[%s9213_s1 + $0x580] sm:$0xff]  ;;  %v1745_v14 = vld [vmem:[%s9213_s1 + $0x588] sm:$0xff]  ;;  %v3352_v61 = vsel %vm2181_vm9, %v3351_v48, %v3350_v9  ;;  %3588 = vmatpush.msrb.mxu2 %v1705_v53  ;;  %v1742_v22 = vld [vmem:[%s9213_s1 + $0x570] sm:$0xff] }
 0x4ae   :  { %v10241_v54 = vld [vmem:[#allocation107_spill] sm:$0xff]  ;;  %v10242_v42 = vld [vmem:[#allocation234_spill] sm:$0xff]  ;;  %v3329_v27 = vsel %vm2197_vm13, %v3328_v15, %v3327_v4  ;;  %v3354_v33 = vsel %vm2185_vm10, %v3353_v20, %v3352_v61  ;;  %3484 = vmatpush.msra.mxu1 %v1744_v3  ;;  %3604 = vmatpush.msrb.mxu3 %v1745_v14  ;;  %v3166_v11 = vsel %vm2181_vm9, %v3165_v63, %v3164_v51  ;;  %v1698_v13 = vld [vmem:[%s9213_s1 + $0x410] sm:$0xff] }
 0x4af   :  { %v3144_v35 = vperm.slane %v10241_v54, %v6930_v34  ;;  %v3355_v45 = vperm.slane %v10242_v42, %v6555_v19  ;;  %v1743_v2 = vld [vmem:[%s9213_s1 + $0x578] sm:$0xff]  ;;  %v1700_v31 = vld [vmem:[%s9213_s1 + $0x420] sm:$0xff]  ;;  %v1701_v28 = vld [vmem:[%s9213_s1 + $0x428] sm:$0xff]  ;;  %v3331_v8 = vsel %vm2201_vm14, %v3330_v62, %v3329_v27  ;;  %3469 = vmatpush.msra.mxu0 %v1702_v60  ;;  %3589 = vmatpush.msrb.mxu2 %v1703_v23 }
 0x4b0   :  { %v10243_v52 = vld [vmem:[#allocation222_spill] sm:$0xff]  ;;  %v10244_v43 = vld [vmem:[#allocation119_spill] sm:$0xff]  ;;  %v3168_v29 = vsel %vm2185_vm10, %v3167_v1, %v3166_v11  ;;  %3485 = vmatpush.msra.mxu1 %v1742_v22  ;;  %3605 = vmatpush.msrb.mxu3 %v1743_v2  ;;  %v1738_v6 = vld [vmem:[%s9213_s1 + $0x550] sm:$0xff] }
 0x4b1   :  { %v3332_v58 = vperm.slane %v10243_v52, %v6955_v39  ;;  %v3169_v24 = vperm.slane %v10244_v43, %v6555_v19  ;;  %v1740_v46 = vld [vmem:[%s9213_s1 + $0x560] sm:$0xff]  ;;  %v1741_v44 = vld [vmem:[%s9213_s1 + $0x568] sm:$0xff]  ;;  %v10246_v19 = vld [vmem:[#allocation233_spill] sm:$0xff]  ;;  %v3145_v36 = vsel %vm2201_vm14, %v3144_v35, %v3143_v37  ;;  %v3356_v55 = vsel %vm2189_vm11, %v3355_v45, %v3354_v33  ;;  %3470 = vmatpush.msra.mxu0 %v1700_v31 }
 0x4b2   :  { %v10245_v26 = vld [vmem:[#allocation106_spill] sm:$0xff]  ;;  %v3357_v47 = vperm.slane %v10246_v19, %v6618_v18  ;;  %3590 = vmatpush.msrb.mxu2 %v1701_v28  ;;  %3486 = vmatpush.msra.mxu1 %v1740_v46  ;;  %v1697_v48 = vld [vmem:[%s9213_s1 + $0x408] sm:$0xff]  ;;  %v10250_v9 = vld [vmem:[#allocation237_spill] sm:$0xff] }
 0x4b3   :  { %v3146_v50 = vperm.slane %v10245_v26, %v6955_v39  ;;  %v1699_v21 = vld [vmem:[%s9213_s1 + $0x418] sm:$0xff]  ;;  %3606 = vmatpush.msrb.mxu3 %v1741_v44  ;;  %v1696_v25 = vld [vmem:[%s9213_s1 + $0x400] sm:$0xff]  ;;  %v3333_v0 = vsel %vm2205_vm15, %v3332_v58, %v3331_v8  ;;  %v3170_v32 = vsel %vm2189_vm11, %v3169_v24, %v3168_v29  ;;  %3471 = vmatpush.msra.mxu0 %v1698_v13  ;;  %v1737_v63 = vld [vmem:[%s9213_s1 + $0x548] sm:$0xff]  ;;  %vm10254_vm11 = vcmask 523264  }
 0x4b4   :  { %v10247_v38 = vld [vmem:[#allocation238_spill] sm:$0xff]  ;;  %v10249_v7 = vld [vmem:[#allocation123_spill] sm:$0xff]  ;;  %3591 = vmatpush.msrb.mxu2 %v1699_v21  ;;  %v3361_v17 = vperm.slane %v10250_v9, %v6930_v34  ;;  %v3358_v20 = vsel %vm2193_vm12, %v3357_v47, %v3356_v55  ;;  %3487 = vmatpush.msra.mxu1 %v1738_v6  ;;  %v1734_v4 = vld [vmem:[%s9213_s1 + $0x530] sm:$0xff] }
 0x4b5   :  { %v3359_v41 = vperm.slane %v10247_v38, %v6654_v16  ;;  %v1739_v5 = vld [vmem:[%s9213_s1 + $0x558] sm:$0xff]  ;;  %v3173_v15 = vperm.slane %v10249_v7, %v6654_v16  ;;  %v3147_v40 = vsel %vm2205_vm15, %v3146_v50, %v3145_v36  ;;  %3472 = vmatpush.msra.mxu0 %v1696_v25  ;;  %v1661_v14 = vld [vmem:[%s9213_s1 + $0x2e8] sm:$0xff]  ;;  %v1730_v45 = vld [vmem:[%s9213_s1 + $0x510] sm:$0xff] }
 0x4b6   :  { %v10248_v56 = vld [vmem:[#allocation118_spill] sm:$0xff]  ;;  %3607 = vmatpush.msrb.mxu3 %v1739_v5  ;;  %3592 = vmatpush.msrb.mxu2 %v1697_v48  ;;  %v3369_v10 = vsel %vm2548_vm7, %v3333_v0, %v3147_v40  ;;  %v10252_v51 = vld [vmem:[#allocation236_spill] sm:$0xff]  ;;  %v10253_v54 = vld [vmem:[#allocation121_spill] sm:$0xff] }
 0x4b7   :  { %v3171_v30 = vperm.slane %v10248_v56, %v6618_v18  ;;  %v1736_v18 = vld [vmem:[%s9213_s1 + $0x540] sm:$0xff]  ;;  %v1663_v53 = vld [vmem:[%s9213_s1 + $0x2f8] sm:$0xff]  ;;  %v3360_v16 = vsel %vm2197_vm13, %v3359_v41, %v3358_v20  ;;  %3473 = vmatmul.f32.vlgmr.msra.gmra.mxu0 %v3369_v10  ;;  %v3363_v12 = vperm.slane %v10252_v51, %v6955_v39  ;;  %3593 = vmatmul.f32.vlgmr.msrb.gmra.mxu2 %v3369_v10  ;;  %v1733_v42 = vld [vmem:[%s9213_s1 + $0x528] sm:$0xff]  ;;  %v2638_v51 = vpop.f32.mrf.mxu3 }
 0x4b8   :  { %v10251_v59 = vld [vmem:[#allocation122_spill] sm:$0xff]  ;;  %3488 = vmatpush.msra.mxu1 %v1736_v18  ;;  %3537 = vmatpush.msrb.mxu0 %v1663_v53  ;;  %v3362_v23 = vsel %vm2201_vm14, %v3361_v17, %v3360_v16  ;;  %v3177_v35 = vperm.slane %v10253_v54, %v6955_v39  ;;  %v1657_v61 = vld [vmem:[%s9213_s1 + $0x2c8] sm:$0xff]  ;;  %v3637_v17 = vld [vmem:[%s9215_s4 + $0x50] sm:$0xff]  ;;  %v2578_v53 = vpop.f32.mrf.mxu0  ;;  %v2598_v16 = vpop.f32.mrf.mxu1 }
 0x4b9   :  { %v3175_v62 = vperm.slane %v10251_v59, %v6930_v34  ;;  %v3172_v3 = vsel %vm2193_vm12, %v3171_v30, %v3170_v32  ;;  %v1735_v1 = vld [vmem:[%s9213_s1 + $0x538] sm:$0xff]  ;;  %v1732_v34 = vld [vmem:[%s9213_s1 + $0x520] sm:$0xff]  ;;  %3608 = vmatpush.msrb.mxu3 %v1737_v63  ;;  %v3364_v52 = vsel %vm2205_vm15, %v3363_v12, %v3362_v23  ;;  %v1729_v27 = vld [vmem:[%s9213_s1 + $0x508] sm:$0xff]  ;;  %v2618_v59 = vpop.f32.mrf.mxu2 }
 0x4ba   :  { %v3174_v37 = vsel %vm2197_vm13, %v3173_v15, %v3172_v3  ;;  %3489 = vmatpush.msra.mxu1 %v1734_v4  ;;  %v1659_v60 = vld [vmem:[%s9213_s1 + $0x2d8] sm:$0xff]  ;;  %3538 = vmatpush.msrb.mxu0 %v1661_v14  ;;  %v1728_v2 = vld [vmem:[%s9213_s1 + $0x500] sm:$0xff]  ;;  %v1653_v43 = vld [vmem:[%s9213_s1 + $0x2a8] sm:$0xff] }
 0x4bb   :  { %3609 = vmatpush.msrb.mxu3 %v1735_v1  ;;  %v3176_v22 = vsel %vm2201_vm14, %v3175_v62, %v3174_v37  ;;  %v1731_v39 = vld [vmem:[%s9213_s1 + $0x518] sm:$0xff]  ;;  %v1693_v24 = vld [vmem:[%s9213_s1 + $0x3e8] sm:$0xff]  ;;  %v3641_v15 = vld [vmem:[%s9215_s4 + $0x70] sm:$0xff]  ;;  %v2599_v1 = vadd.f32 %v2598_v16, %v2578_v53 }
 0x4bc   :  { %3490 = vmatpush.msra.mxu1 %v1732_v34  ;;  %3539 = vmatpush.msrb.mxu0 %v1659_v60  ;;  %v1655_v58 = vld [vmem:[%s9213_s1 + $0x2b8] sm:$0xff]  ;;  %v3178_v33 = vsel %vm2205_vm15, %v3177_v35, %v3176_v22  ;;  %v1649_v46 = vld [vmem:[%s9213_s1 + $0x288] sm:$0xff]  ;;  %v3639_v9 = vld [vmem:[%s9215_s4 + $0x60] sm:$0xff] }
 0x4bd   :  { %3610 = vmatpush.msrb.mxu3 %v1733_v42  ;;  %v1695_v31 = vld [vmem:[%s9213_s1 + $0x3f8] sm:$0xff]  ;;  %v3370_v28 = vsel %vm2548_vm7, %v3364_v52, %v3178_v33  ;;  %v1689_v44 = vld [vmem:[%s9213_s1 + $0x3c8] sm:$0xff]  ;;  %v3635_v40 = vld [vmem:[%s9215_s4 + $0x40] sm:$0xff] }
 0x4be   :  { %3491 = vmatpush.msra.mxu1 %v1730_v45  ;;  %3540 = vmatpush.msrb.mxu0 %v1657_v61  ;;  %v1651_v11 = vld [vmem:[%s9213_s1 + $0x298] sm:$0xff]  ;;  %v1645_v29 = vld [vmem:[%s9213_s1 + $0x268] sm:$0xff]  ;;  %v3633_v63 = vld [vmem:[%s9215_s4 + $0x30] sm:$0xff]  ;;  %v2619_v45 = vadd.f32 %v2618_v59, %v2599_v1 }
 0x4bf   :  { %3611 = vmatpush.msrb.mxu3 %v1731_v39  ;;  %v1691_v8 = vld [vmem:[%s9213_s1 + $0x3d8] sm:$0xff]  ;;  %v1685_v19 = vld [vmem:[%s9213_s1 + $0x3a8] sm:$0xff]  ;;  %v3631_v3 = vld [vmem:[%s9215_s4 + $0x20] sm:$0xff]  ;;  %v2718_v61 = vpop.f32.mrf.mxu3 }
 0x4c0   :  { %3492 = vmatpush.msra.mxu1 %v1728_v2  ;;  %3541 = vmatpush.msrb.mxu0 %v1655_v58  ;;  %v1647_v26 = vld [vmem:[%s9213_s1 + $0x278] sm:$0xff]  ;;  %v1641_v21 = vld [vmem:[%s9213_s1 + $0x248] sm:$0xff]  ;;  %v3629_v12 = vld [vmem:[%s9215_s4 + $0x10] sm:$0xff]  ;;  %v2639_v52 = vadd.f32 %v2638_v51, %v2619_v45 }
 0x4c1   :  { %3493 = vmatmul.f32.vlgmr.msra.gmra.mxu1 %v3370_v28  ;;  %3612 = vmatpush.msrb.mxu3 %v1729_v27  ;;  %v1687_v50 = vld [vmem:[%s9213_s1 + $0x3b8] sm:$0xff]  ;;  %v1681_v36 = vld [vmem:[%s9213_s1 + $0x388] sm:$0xff]  ;;  %v9141_v60 = vpop.f32.mrf.mxu2  ;;  %v3627_v23 = vld [vmem:[%s9215_s4] sm:$0xff] }
 0x4c2   :  { %3557 = vmatpush.msrb.mxu1 %v1695_v31  ;;  %3613 = vmatmul.f32.vlgmr.msrb.gmra.mxu3 %v3370_v28  ;;  %v1643_v47 = vld [vmem:[%s9213_s1 + $0x258] sm:$0xff]  ;;  %v1637_v41 = vld [vmem:[%s9213_s1 + $0x228] sm:$0xff]  ;;  %v3657_v42 = vld [vmem:[%s9215_s4 + $0xf0] sm:$0xff] }
 0x4c3   :  { %3542 = vmatpush.msrb.mxu0 %v1653_v43  ;;  %v1683_v13 = vld [vmem:[%s9213_s1 + $0x398] sm:$0xff]  ;;  %v1677_v6 = vld [vmem:[%s9213_s1 + $0x368] sm:$0xff]  ;;  %v3655_v2 = vld [vmem:[%s9215_s4 + $0xe0] sm:$0xff] }
 0x4c4   :  { %3558 = vmatpush.msrb.mxu1 %v1693_v24  ;;  %v1639_v55 = vld [vmem:[%s9213_s1 + $0x238] sm:$0xff]  ;;  %v1633_v30 = vld [vmem:[%s9213_s1 + $0x208] sm:$0xff]  ;;  %v3653_v28 = vld [vmem:[%s9215_s4 + $0xd0] sm:$0xff] }
 0x4c5   :  { %3543 = vmatpush.msrb.mxu0 %v1651_v11  ;;  %v1679_v38 = vld [vmem:[%s9213_s1 + $0x378] sm:$0xff]  ;;  %v1673_v25 = vld [vmem:[%s9213_s1 + $0x348] sm:$0xff]  ;;  %v4232_v45 = vld [vmem:[%s9217_s6] ss:$0 sm:$0xff] }
 0x4c6   :  { %3559 = vmatpush.msrb.mxu1 %v1691_v8  ;;  %v1635_v5 = vld [vmem:[%s9213_s1 + $0x218] sm:$0xff]  ;;  %v1669_v0 = vld [vmem:[%s9213_s1 + $0x328] sm:$0xff] }
 0x4c7   :  { %3544 = vmatpush.msrb.mxu0 %v1649_v46  ;;  %v1675_v56 = vld [vmem:[%s9213_s1 + $0x358] sm:$0xff]  ;;  %v1665_v7 = vld [vmem:[%s9213_s1 + $0x308] sm:$0xff] }
 0x4c8   :  { %3560 = vmatpush.msrb.mxu1 %v1689_v44  ;;  %v1671_v48 = vld [vmem:[%s9213_s1 + $0x338] sm:$0xff]  ;;  %v3640_v18 = vld [vmem:[%s9215_s4 + $0x68] sm:$0xff] }
 0x4c9   :  { %3545 = vmatpush.msrb.mxu0 %v1647_v26  ;;  %v1667_v32 = vld [vmem:[%s9213_s1 + $0x318] sm:$0xff]  ;;  %v3636_v20 = vld [vmem:[%s9215_s4 + $0x48] sm:$0xff] }
 0x4ca   :  { %3561 = vmatpush.msrb.mxu1 %v1687_v50  ;;  %v3634_v10 = vld [vmem:[%s9215_s4 + $0x38] sm:$0xff]  ;;  %v3632_v4 = vld [vmem:[%s9215_s4 + $0x28] sm:$0xff]  ;;  %v3651_v50 = vld [vmem:[%s9215_s4 + $0xc0] sm:$0xff] }
 0x4cb   :  { %3546 = vmatpush.msrb.mxu0 %v1645_v29  ;;  %v3630_v37 = vld [vmem:[%s9215_s4 + $0x18] sm:$0xff]  ;;  %v3628_v34 = vld [vmem:[%s9215_s4 + $0x8] sm:$0xff] }
 0x4cc   :  { %3562 = vmatpush.msrb.mxu1 %v1685_v19  ;;  %v3658_v35 = vld [vmem:[%s9215_s4 + $0xf8] sm:$0xff]  ;;  %v3656_v39 = vld [vmem:[%s9215_s4 + $0xe8] sm:$0xff] }
 0x4cd   :  { %3547 = vmatpush.msrb.mxu0 %v1643_v47  ;;  %v3654_v27 = vld [vmem:[%s9215_s4 + $0xd8] sm:$0xff]  ;;  %v3652_v26 = vld [vmem:[%s9215_s4 + $0xc8] sm:$0xff] }
 0x4ce   :  { %3563 = vmatpush.msrb.mxu1 %v1683_v13  ;;  %v3650_v19 = vld [vmem:[%s9215_s4 + $0xb8] sm:$0xff] }
 0x4cf   :  { %3548 = vmatpush.msrb.mxu0 %v1641_v21  ;;  %v3617_v21 = vld [vmem:[%s9216_s3] sm:$0x3] }
 0x4d0   :  { %3564 = vmatpush.msrb.mxu1 %v1681_v36  ;;  %v3649_v36 = vld [vmem:[%s9215_s4 + $0xb0] sm:$0xff] }
 0x4d1   :  { %3549 = vmatpush.msrb.mxu0 %v1639_v55 }
 0x4d2   :  { %3565 = vmatpush.msrb.mxu1 %v1679_v38 }
 0x4d3   :  { %3550 = vmatpush.msrb.mxu0 %v1637_v41  ;;  %v3619_v41 = vperm.slane %v3617_v21, 0 }
 0x4d4   :  { %3566 = vmatpush.msrb.mxu1 %v1677_v6 }
 0x4d5   :  { %3551 = vmatpush.msrb.mxu0 %v1635_v5  ;;  %v3648_v5 = vld [vmem:[%s9215_s4 + $0xa8] sm:$0xff] }
 0x4d6   :  { %3567 = vmatpush.msrb.mxu1 %v1675_v56 }
 0x4d7   :  { %3552 = vmatpush.msrb.mxu0 %v1633_v30  ;;  %v3647_v30 = vld [vmem:[%s9215_s4 + $0xa0] sm:$0xff] }
 0x4d8   :  { %3553 = vmatmul.f32.vlgmr.msrb.gmra.mxu0 %v8324_v49  ;;  %3568 = vmatpush.msrb.mxu1 %v1673_v25  ;;  %v3642_v49 = vld [vmem:[%s9215_s4 + $0x78] sm:$0xff] }
 0x4d9   :  { %3663 = vmatpush.msra.mxu0 %v3642_v49  ;;  %v3643_v49 = vld [vmem:[%s9215_s4 + $0x80] sm:$0xff] }
 0x4da   :  { %3569 = vmatpush.msrb.mxu1 %v1671_v48  ;;  %v3646_v48 = vld [vmem:[%s9215_s4 + $0x98] sm:$0xff] }
 0x4db   :  { %3664 = vmatpush.msra.mxu0 %v3641_v15  ;;  %v2719_v15 = vadd.f32 %v2718_v61, %v9141_v60  ;;  %v4231_v60 = vld [vmem:[%s9214_s5] ss:$0 sm:$0xff] }
 0x4dc   :  { %3570 = vmatpush.msrb.mxu1 %v1669_v0 }
 0x4dd   :  { %3665 = vmatpush.msra.mxu0 %v3640_v18 }
 0x4de   :  { %3571 = vmatpush.msrb.mxu1 %v1667_v32  ;;  %v3645_v32 = vld [vmem:[%s9215_s4 + $0x90] sm:$0xff] }
 0x4df   :  { %3666 = vmatpush.msra.mxu0 %v3639_v9 }
 0x4e0   :  { %3572 = vmatpush.msrb.mxu1 %v1665_v7  ;;  %v3644_v7 = vld [vmem:[%s9215_s4 + $0x88] sm:$0xff] }
 0x4e1   :  { %3573 = vmatmul.f32.vlgmr.msrb.gmra.mxu1 %v8452_v57  ;;  %v3638_v57 = vld [vmem:[%s9215_s4 + $0x58] sm:$0xff] }
 0x4e2   :  { %3667 = vmatpush.msra.mxu0 %v3638_v57  ;;  %3683 = vmatpush.msra.mxu1 %v3658_v35 }
 0x4e4   :  { %3668 = vmatpush.msra.mxu0 %v3637_v17  ;;  %3684 = vmatpush.msra.mxu1 %v3657_v42 }
 0x4e6   :  { %3669 = vmatpush.msra.mxu0 %v3636_v20  ;;  %3685 = vmatpush.msra.mxu1 %v3656_v39 }
 0x4e8   :  { %3670 = vmatpush.msra.mxu0 %v3635_v40  ;;  %3686 = vmatpush.msra.mxu1 %v3655_v2  ;;  %v4238_v2 = vmov 0  }
 0x4e9   :  { %4229 = vset.pattern.permute.xlu1 %v4238_v2  ;;  %4230 = vset.pattern.permute.xlu0 %v4238_v2 }
 0x4ea   :  { %3671 = vmatpush.msra.mxu0 %v3634_v10  ;;  %3687 = vmatpush.msra.mxu1 %v3654_v27 }
 0x4eb   :  { %v2658_v62 = vpop.f32.mrf.mxu0 }
 0x4ec   :  { %3672 = vmatpush.msra.mxu0 %v3633_v63  ;;  %v2659_v33 = vadd.f32 %v2658_v62, %v2639_v52  ;;  %3688 = vmatpush.msra.mxu1 %v3653_v28 }
 0x4ee   :  { %3673 = vmatpush.msra.mxu0 %v3632_v4  ;;  %3689 = vmatpush.msra.mxu1 %v3652_v26 }
 0x4f0   :  { %3674 = vmatpush.msra.mxu0 %v3631_v3  ;;  %3690 = vmatpush.msra.mxu1 %v3651_v50  ;;  %v3620_v3 = vperm.slane %v3617_v21, 1 }
 0x4f1   :  { %v2778_v58 = vpop.f32.mrf.mxu2 }
 0x4f2   :  { %3675 = vmatpush.msra.mxu0 %v3630_v37  ;;  %3691 = vmatpush.msra.mxu1 %v3650_v19 }
 0x4f3   :  { %v2738_v54 = vpop.f32.mrf.mxu0 }
 0x4f4   :  { %3676 = vmatpush.msra.mxu0 %v3629_v12  ;;  %3692 = vmatpush.msra.mxu1 %v3649_v36  ;;  %v2739_v18 = vadd.f32 %v2738_v54, %v2719_v15 }
 0x4f5   :  { %v2678_v14 = vpop.f32.mrf.mxu1 }
 0x4f6   :  { %3677 = vmatpush.msra.mxu0 %v3628_v34  ;;  %v2679_v43 = vadd.f32 %v2678_v14, %v2659_v33  ;;  %3693 = vmatpush.msra.mxu1 %v3648_v5  ;;  %v13_v34 = vstv %s9218_s7 }
 0x4f7   :  { %14 = vst [vmem:[#allocation2] sm:$0x1] %v13_v34 }
 0x4f8   :  { %3678 = vmatpush.msra.mxu0 %v3627_v23  ;;  %3694 = vmatpush.msra.mxu1 %v3647_v30 }
 0x4f9   :  { %v3434_v44 = vpop.f32.mrf.mxu2 }
 0x4fa   :  { %3695 = vmatpush.msra.mxu1 %v3646_v48 }
 0x4fb   :  { %v2798_v24 = vpop.f32.mrf.mxu3 }
 0x4fc   :  { %3696 = vmatpush.msra.mxu1 %v3645_v32 }
 0x4fe   :  { %v2758_v22 = vpop.f32.mrf.mxu1  ;;  %3697 = vmatpush.msra.mxu1 %v3644_v7  ;;  %v4233_v52 = vld [vmem:[#allocation2] ss:$0 sm:$0xff] }
 0x4ff   :  { %v2759_v9 = vadd.f32 %v2758_v22, %v2739_v18 }
 0x500   :  { %3698 = vmatpush.msra.mxu1 %v3643_v49 }
 0x501   :  { %v2779_v57 = vadd.f32 %v2778_v58, %v2759_v9 }
 0x503   :  { %v2799_v20 = vadd.f32 %v2798_v24, %v2779_v57 }
 0x505   :  { %v3454_v47 = vpop.f32.mrf.mxu3 }
 0x50d   :  { %v3394_v31 = vpop.f32.mrf.mxu0 }
 0x50e   :  { %v3395_v8 = vadd.f32 %v3394_v31, %v2679_v43 }
 0x514   :  { %v3514_v17 = vpop.f32.mrf.mxu2 }
 0x515   :  { %v3515_v53 = vadd.f32 %v3514_v17, %v2799_v20 }
 0x518   :  { %v3414_v11 = vpop.f32.mrf.mxu1 }
 0x519   :  { %v3415_v46 = vadd.f32 %v3414_v11, %v3395_v8 }
 0x51b   :  { %v3435_v29 = vadd.f32 %v3434_v44, %v3415_v46 }
 0x51d   :  { %v3455_v55 = vadd.f32 %v3454_v47, %v3435_v29 }
 0x51f   :  { %v3534_v40 = vpop.f32.mrf.mxu3 }
 0x520   :  { %v3535_v10 = vadd.f32 %v3534_v40, %v3515_v53 }
 0x534   :  { %v3474_v13 = vpop.f32.mrf.mxu0 }
 0x535   :  { %v3475_v38 = vadd.f32 %v3474_v13, %v3455_v55 }
 0x53a   :  { %v3594_v62 = vpop.f32.mrf.mxu2 }
 0x53e   :  { %v3494_v6 = vpop.f32.mrf.mxu1 }
 0x53f   :  { %v3495_v56 = vadd.f32 %v3494_v6, %v3475_v38 }
 0x541   :  { %v3623_v25 = vadd.f32 %v3619_v41, %v3495_v56 }
 0x543   :  { %v3625_v0 = vmax.f32 %v3623_v25, 0.0 }
 0x545   :  { %3679 = vmatmul.f32.vlgmr.msra.gmra.mxu0 %v3625_v0  ;;  %v3614_v37 = vpop.f32.mrf.mxu3 }
 0x555   :  { %v3554_v16 = vpop.f32.mrf.mxu0 }
 0x556   :  { %v3555_v63 = vadd.f32 %v3554_v16, %v3535_v10 }
 0x55e   :  { %v3574_v4 = vpop.f32.mrf.mxu1 }
 0x55f   :  { %v3575_v59 = vadd.f32 %v3574_v4, %v3555_v63 }
 0x561   :  { %v3595_v14 = vadd.f32 %v3594_v62, %v3575_v59 }
 0x563   :  { %v3615_v51 = vadd.f32 %v3614_v37, %v3595_v14 }
 0x565   :  { %v3624_v12 = vadd.f32 %v3620_v3, %v3615_v51 }
 0x567   :  { %v3626_v1 = vmax.f32 %v3624_v12, 0.0 }
 0x569   :  { %3699 = vmatmul.f32.vlgmr.msra.gmra.mxu1 %v3626_v1 }
 0x5c2   :  { %v3680_v23 = vpop.f32.mrf.mxu0 }
 0x5c3   :  { %v3681_v54 = vadd.f32 %v4231_v60, %v3680_v23 }
 0x5e6   :  { %v3700_v35 = vpop.f32.mrf.mxu1 }
 0x5e7   :  { %v3701_v42 = vadd.f32 %v3700_v35, %v3681_v54 }
 0x5e9   :  { %v3703_v61 = vmax.f32 %v3701_v42, 0.0 }
 0x5eb   :  { %v3708_v22 = vmul.f32 %v4232_v45, %v3703_v61 }
 0x5ed   :  { %v3710_v39 = vsel %vm3709_vm6, %v3708_v22, 0.0 }
 0x5ee   :  { %3711 = vadd.xlane.f32.xlu0 %v3710_v39 }
 0x661   :  { %v3712_v58 = vpop.xlane.xlu0 %3711 }
 0x662   :  { %v3717_v27 = vadd.f32 %v4233_v52, %v3712_v58 }
 0x664   :  { %v3748_v33 = vmul.f32 -1.442695, %v3717_v27 }
 0x666   :  { %4234 = vpow2.f32 %v3748_v33 }
 0x66c   :  { %v4235_v31 = vpop.eup %4234 }
 0x66d   :  { %v3721_v28 = vadd.f32 1.0, %v4235_v31 }
 0x66f   :  { %4236 = vrcp.f32 %v3721_v28  ;;  %v3733_v8 = vand.u32 2147483648, %v3721_v28  ;;  %v3731_v44 = vand.u32 2147483647, %v3721_v28  ;;  %vm3727_vm8 = vweird.f32 %v3721_v28 }
 0x671   :  { %v3734_v50 = vor.u32 1.1754944e-38, %v3733_v8  ;;  %vm3732_vm10 = vcmp.eq.f32.partialorder %v3731_v44, 8.507059e+37 }
 0x675   :  { %v4237_v43 = vpop.eup %4236 }
 0x676   :  { %v3723_v24 = vmul.f32 %v4237_v43, %v3721_v28  ;;  %vm3728_vm7 = vweird.f32 %v4237_v43 }
 0x677   :  { %vm3729_vm9 = vmor %vm3727_vm8, %vm3728_vm7 }
 0x678   :  { %v3724_v11 = vsub.f32 1.0, %v3723_v24 }
 0x67a   :  { %v3725_v46 = vmul.f32 %v4237_v43, %v3724_v11 }
 0x67c   :  { %v3726_v26 = vadd.f32 %v4237_v43, %v3725_v46 }
 0x67e   :  { %v3730_v29 = vsel %vm3729_vm9, %v4237_v43, %v3726_v26 }
 0x67f   :  { %v3735_v19 = vsel %vm3732_vm10, %v3734_v50, %v3730_v29 }
 0x680   :  { %3739 = vperm.xlu1 %4229, %v3735_v19  }
 0x6f2   :  { %v3740_v47 = vpop.permute.xlu1 %3739 }
 0x6f3   :  { %v3742_v13 = vsel %vm10254_vm11, %v3703_v61, %v3740_v47 }
 0x6f4   :  { %3743 = vst [vmem:[%s9219_s8] sm:$0x3] %v3742_v13 }

</bundles_post_ra>
